<compile_context>
chip_gen: v5e
topology: v5e:2x2
jax: 0.10.0
libtpu: 0.0.40
codegen_flags: <defaults>
</compile_context>

<pallas_src>
import functools

import numpy as np

import jax
import jax.numpy as jnp
from jax.experimental import pallas as pl
from jax.experimental.pallas import tpu as pltpu

NCLASSES = 43
LANES = 128  # all channel / feature dims padded to this


# ----------------------------------------------------------------------------
# Pallas kernels
# ----------------------------------------------------------------------------
def _conv_stack_kernel(p_ref, w1_ref, b1_ref, w2_ref, b2_ref, s2_ref,
                       w3_ref, b3_ref, s3_ref, o_ref, a1_ref, a2_ref, a3_ref):
    """conv1(+pool) -> conv2(+pool) -> conv3 for one image, all in VMEM.

    p_ref : (1, 1024, 128) bf16  im2col'd conv1 patches, rows pre-grouped by
                                 pool quadrant: row = g*256 + pp*16 + qq.
    w1_ref: (128, 128) bf16      conv1 weight, K = (i*5+j)*3 + c, padded.
    w2_ref/w3_ref: (9,128,128) bf16  3x3 tap weights, lanes = padded channels.
    s2_ref: (49, 205) f32        pool2 anchor selection (0/1).
    s3_ref: (25, 33)  f32        conv3 valid-row selection (0/1).
    o_ref : (1, 25, 128) bf16    conv3 output, rows = p*5+q, lanes = channels.
    """
    f32 = jnp.float32
    bf16 = jnp.bfloat16

    # conv1: one K-packed MXU matmul per pool quadrant, fused 2x2 max-pool.
    p1 = None
    for g in range(4):
        yg = jnp.dot(p_ref[0, pl.ds(g * 256, 256), :], w1_ref[...],
                     preferred_element_type=f32)
        p1 = yg if p1 is None else jnp.maximum(p1, yg)
    # bias + ReLU commute with max-pool -> apply once on the pooled 16x16 tile.
    a1_ref[...] = jnp.maximum(p1 + b1_ref[...], 0.0)             # (256,128)

    # conv2 (3x3, valid): flattened-row trick; each tap is a contiguous slice.
    y2 = None
    for i in range(3):
        for j in range(3):
            lhs = a1_ref[pl.ds(i * 16 + j, 222), :].astype(bf16)
            t = jnp.dot(lhs, w2_ref[i * 3 + j], preferred_element_type=f32)
            y2 = t if y2 is None else y2 + t
    a2_ref[pl.ds(0, 222), :] = y2                                 # 14x16 raster
    # 2x2 max-pool: 4 shifted reads + tiny anchor-selection matmul.
    m2 = jnp.maximum(
        jnp.maximum(a2_ref[pl.ds(0, 205), :], a2_ref[pl.ds(1, 205), :]),
        jnp.maximum(a2_ref[pl.ds(16, 205), :], a2_ref[pl.ds(17, 205), :]))
    p2 = jnp.dot(s2_ref[...], m2, preferred_element_type=f32)     # (49,128)
    a3_ref[pl.ds(0, 49), :] = jnp.maximum(p2 + b2_ref[...], 0.0)  # 7x7 raster

    # conv3 (3x3, valid, no pool) + valid-row selection.
    y3 = None
    for i in range(3):
        for j in range(3):
            lhs = a3_ref[pl.ds(i * 7 + j, 33), :].astype(bf16)
            t = jnp.dot(lhs, w3_ref[i * 3 + j], preferred_element_type=f32)
            y3 = t if y3 is None else y3 + t
    o3 = jnp.dot(s3_ref[...], y3, preferred_element_type=f32)     # (25,128)
    o_ref[0] = jnp.maximum(o3 + b3_ref[...], 0.0).astype(o_ref.dtype)


def _fc_head_kernel(x_ref, w1_ref, b1_ref, w2_ref, b2_ref, w3_ref, b3_ref,
                    o_ref, *, nvalid):
    """fc1+ReLU -> fc2+ReLU -> fc3+log_softmax; intermediates stay in VMEM."""
    h = jnp.dot(x_ref[...], w1_ref[...], preferred_element_type=jnp.float32)
    h = jnp.maximum(h + b1_ref[...], 0.0).astype(jnp.bfloat16)
    h = jnp.dot(h, w2_ref[...], preferred_element_type=jnp.float32)
    h = jnp.maximum(h + b2_ref[...], 0.0).astype(jnp.bfloat16)
    y = jnp.dot(h, w3_ref[...], preferred_element_type=jnp.float32) + b3_ref[...]

    # log_softmax restricted to the first `nvalid` lanes (rest are padding).
    lane = jax.lax.broadcasted_iota(jnp.int32, y.shape, 1)
    ym = jnp.where(lane < nvalid, y, -1e30)
    m = jnp.max(ym, axis=-1, keepdims=True)
    z = ym - m
    lse = jnp.log(jnp.sum(jnp.exp(z), axis=-1, keepdims=True))
    o_ref[...] = (z - lse).astype(o_ref.dtype)


# ----------------------------------------------------------------------------
# pallas_call wrappers
# ----------------------------------------------------------------------------
def conv_stack(patches, w1c, b1c, w2c, b2c, s2, w3c, b3c, s3):
    B = patches.shape[0]
    return pl.pallas_call(
        _conv_stack_kernel,
        out_shape=jax.ShapeDtypeStruct((B, 25, LANES), jnp.bfloat16),
        grid=(B,),
        in_specs=[
            pl.BlockSpec((1, 1024, LANES), lambda b: (b, 0, 0)),
            pl.BlockSpec(w1c.shape, lambda b: (0, 0)),
            pl.BlockSpec(b1c.shape, lambda b: (0, 0)),
            pl.BlockSpec(w2c.shape, lambda b: (0, 0, 0)),
            pl.BlockSpec(b2c.shape, lambda b: (0, 0)),
            pl.BlockSpec(s2.shape, lambda b: (0, 0)),
            pl.BlockSpec(w3c.shape, lambda b: (0, 0, 0)),
            pl.BlockSpec(b3c.shape, lambda b: (0, 0)),
            pl.BlockSpec(s3.shape, lambda b: (0, 0)),
        ],
        out_specs=pl.BlockSpec((1, 25, LANES), lambda b: (b, 0, 0)),
        scratch_shapes=[
            pltpu.VMEM((256, LANES), jnp.float32),   # pooled conv1 (16x16)
            pltpu.VMEM((224, LANES), jnp.float32),   # raw conv2 (14x16)
            pltpu.VMEM((56, LANES), jnp.float32),    # pooled conv2 (7x7)
        ],
        compiler_params=pltpu.CompilerParams(
            dimension_semantics=("parallel",)),
    )(patches, w1c, b1c, w2c, b2c, s2, w3c, b3c, s3)


def fc_head(x, w1, b1, w2, b2, w3, b3, *, block_b=128):
    B, K = x.shape
    Bt = min(B, block_b)
    Bp = ((B + Bt - 1) // Bt) * Bt
    if Bp != B:
        x = jnp.pad(x, ((0, Bp - B), (0, 0)))
    out = pl.pallas_call(
        functools.partial(_fc_head_kernel, nvalid=NCLASSES),
        out_shape=jax.ShapeDtypeStruct((Bp, LANES), jnp.float32),
        grid=(Bp // Bt,),
        in_specs=[
            pl.BlockSpec((Bt, K), lambda i: (i, 0)),
            pl.BlockSpec(w1.shape, lambda i: (0, 0)),
            pl.BlockSpec(b1.shape, lambda i: (0, 0)),
            pl.BlockSpec(w2.shape, lambda i: (0, 0)),
            pl.BlockSpec(b2.shape, lambda i: (0, 0)),
            pl.BlockSpec(w3.shape, lambda i: (0, 0)),
            pl.BlockSpec(b3.shape, lambda i: (0, 0)),
        ],
        out_specs=pl.BlockSpec((Bt, LANES), lambda i: (i, 0)),
        compiler_params=pltpu.CompilerParams(
            dimension_semantics=("parallel",)),
    )(x, w1, b1, w2, b2, w3, b3)
    return out[:B]


# ----------------------------------------------------------------------------
# Parameter preparation (layout / padding / bf16 cast, done once)
# ----------------------------------------------------------------------------
def _prep_conv1_w(w):
    """(6,3,5,5) -> (128,128) bf16 with K index = (i*5+j)*3 + c."""
    cout = w.shape[0]
    t = jnp.transpose(w, (2, 3, 1, 0)).reshape(75, cout)
    out = jnp.zeros((LANES, LANES), jnp.float32).at[:75, :cout].set(t)
    return out.astype(jnp.bfloat16)


def _prep_conv_taps(w):
    """(Cout,Cin,3,3) -> (9,128,128) bf16: tap t=i*3+j, lanes = padded chans."""
    Cout, Cin, KH, KW = w.shape
    t = jnp.transpose(w, (2, 3, 1, 0)).reshape(KH * KW, Cin, Cout)
    out = jnp.zeros((KH * KW, LANES, LANES), jnp.float32).at[:, :Cin, :Cout].set(t)
    return out.astype(jnp.bfloat16)


def _pad_bias(b):
    return jnp.zeros((1, LANES), jnp.float32).at[0, : b.shape[0]].set(b)


def _make_pool2_select():
    """pooled2 (pp,qq) <- 4-shift-max row anchored at (2pp)*16 + 2qq."""
    S = np.zeros((49, 205), np.float32)
    for pp in range(7):
        for qq in range(7):
            S[pp * 7 + qq, 32 * pp + 2 * qq] = 1.0
    return jnp.asarray(S)


def _make_conv3_valid_select():
    """Keep flat rows p*7+q with q < 5, reordered to raster p*5+q."""
    S = np.zeros((25, 33), np.float32)
    for p in range(5):
        for q in range(5):
            S[p * 5 + q, p * 7 + q] = 1.0
    return jnp.asarray(S)


def prepare_params(params):
    # fc1: fold PyTorch (C,H,W) flatten order + the 128-lane channel padding of
    # conv3's output into a pre-permuted, zero-expanded (3200,128) weight.
    w1 = params["fc1_w"]                                     # (800,120), rows = c*25+s
    t = jnp.transpose(w1.reshape(32, 25, 120), (1, 0, 2))    # [s, c, n]
    w1e = jnp.zeros((25, LANES, 120), jnp.float32).at[:, :32, :].set(t)
    w1e = w1e.reshape(25 * LANES, 120)
    w1p = jnp.zeros((25 * LANES, LANES), jnp.float32).at[:, :120].set(w1e)

    w2p = jnp.zeros((LANES, LANES), jnp.float32).at[:120, :84].set(params["fc2_w"])
    w3p = jnp.zeros((LANES, LANES), jnp.float32).at[:84, :NCLASSES].set(params["fc3_w"])

    return {
        "c1_w": _prep_conv1_w(params["conv1_w"]),
        "c1_b": _pad_bias(params["conv1_b"]),
        "c2_w": _prep_conv_taps(params["conv2_w"]),
        "c2_b": _pad_bias(params["conv2_b"]),
        "c3_w": _prep_conv_taps(params["conv3_w"]),
        "c3_b": _pad_bias(params["conv3_b"]),
        "pool2_sel": _make_pool2_select(),
        "conv3_sel": _make_conv3_valid_select(),
        "w1": w1p.astype(jnp.bfloat16), "b1": _pad_bias(params["fc1_b"]),
        "w2": w2p.astype(jnp.bfloat16), "b2": _pad_bias(params["fc2_b"]),
        "w3": w3p.astype(jnp.bfloat16), "b3": _pad_bias(params["fc3_b"]),
    }


# ----------------------------------------------------------------------------
# Forward pass
# ----------------------------------------------------------------------------
def nnnet_forward(prep, x_nchw):
    x = jnp.transpose(x_nchw, (0, 2, 3, 1)).astype(jnp.float32)   # NCHW -> NHWC
    B = x.shape[0]

    # conv1 im2col in XLA (K-packed so the kernel does a single MXU matmul per
    # pool quadrant); rows are grouped by 2x2-pool quadrant so the in-kernel
    # pool is 4 contiguous slab maxes.  Lane index = (i*5+j)*3 + c.
    xp = jnp.pad(x, ((0, 0), (2, 2), (2, 2), (0, 0)))             # (B,36,36,3)
    taps = [xp[:, i:i + 32, j:j + 32, :] for i in range(5) for j in range(5)]
    pt = jnp.concatenate(taps, axis=-1)                           # (B,32,32,75)
    pt = jnp.concatenate([pt[:, 0::2, 0::2], pt[:, 0::2, 1::2],
                          pt[:, 1::2, 0::2], pt[:, 1::2, 1::2]], axis=1)
    pt = pt.reshape(B, 1024, 75)
    pt = jnp.pad(pt, ((0, 0), (0, 0), (0, LANES - 75))).astype(jnp.bfloat16)

    # Fused conv1+pool -> conv2+pool -> conv3 (single kernel, per-image grid).
    o3 = conv_stack(pt, prep["c1_w"], prep["c1_b"], prep["c2_w"], prep["c2_b"],
                    prep["pool2_sel"], prep["c3_w"], prep["c3_b"],
                    prep["conv3_sel"])                            # (B,25,128) bf16

    # Fused FC head (flatten is a free reshape; PyTorch order baked into w1).
    xfc = o3.reshape(B, 25 * LANES)
    out = fc_head(xfc, prep["w1"], prep["b1"], prep["w2"], prep["b2"],
                  prep["w3"], prep["b3"])
    return out[:, :NCLASSES]                                      # (B, 43) log-probs


# ----------------------------------------------------------------------------
# Synthetic params + pure-JAX f32 reference for verification
# ----------------------------------------------------------------------------
def init_params(key):
    ks = jax.random.split(key, 12)

    def u(k, shape, fan_in):
        bound = 1.0 / jnp.sqrt(fan_in)
        return jax.random.uniform(k, shape, jnp.float32, -bound, bound)

    return {
        "conv1_w": u(ks[0], (6, 3, 5, 5), 3 * 5 * 5),
        "conv1_b": u(ks[1], (6,), 3 * 5 * 5),
        "conv2_w": u(ks[2], (16, 6, 3, 3), 6 * 3 * 3),
        "conv2_b": u(ks[3], (16,), 6 * 3 * 3),
        "conv3_w": u(ks[4], (32, 16, 3, 3), 16 * 3 * 3),
        "conv3_b": u(ks[5], (32,), 16 * 3 * 3),
        # fc weights stored as (in, out); rows follow PyTorch (C,H,W) flatten order
        "fc1_w": u(ks[6], (32 * 5 * 5, 120), 32 * 5 * 5),
        "fc1_b": u(ks[7], (120,), 32 * 5 * 5),
        "fc2_w": u(ks[8], (120, 84), 120),
        "fc2_b": u(ks[9], (84,), 120),
        "fc3_w": u(ks[10], (84, NCLASSES), 84),
        "fc3_b": u(ks[11], (NCLASSES,), 84),
    }


def reference_forward(params, x_nchw):
    x = jnp.transpose(x_nchw, (0, 2, 3, 1)).astype(jnp.float32)

    def conv(x, w, b, pad):
        out = jax.lax.conv_general_dilated(
            x, jnp.transpose(w, (2, 3, 1, 0)), (1, 1),
            [(pad, pad), (pad, pad)],
            dimension_numbers=("NHWC", "HWIO", "NHWC"))
        return jax.nn.relu(out + b)

    def pool(x):
        return jax.lax.reduce_window(x, -jnp.inf, jax.lax.max,
                                     (1, 2, 2, 1), (1, 2, 2, 1), "VALID")

    o = pool(conv(x, params["conv1_w"], params["conv1_b"], 2))
    o = pool(conv(o, params["conv2_w"], params["conv2_b"], 0))
    o = conv(o, params["conv3_w"], params["conv3_b"], 0)
    B = o.shape[0]
    flat = jnp.transpose(o, (0, 3, 1, 2)).reshape(B, -1)
    h = jax.nn.relu(flat @ params["fc1_w"] + params["fc1_b"])
    h = jax.nn.relu(h @ params["fc2_w"] + params["fc2_b"])
    y = h @ params["fc3_w"] + params["fc3_b"]
    return jax.nn.log_softmax(y, axis=-1)


if __name__ == "__main__":
    key = jax.random.PRNGKey(0)
    pkey, xkey = jax.random.split(key)
    params = init_params(pkey)
    prep = prepare_params(params)

    # Spatial size 32 is dictated by fc1 = 32*5*5; small batch of 2.
    x = jax.random.normal(xkey, (2, 3, 32, 32), dtype=jnp.float32)

    logp = jax.block_until_ready(jax.jit(nnnet_forward)(prep, x))
    assert logp.shape == (2, NCLASSES)
    assert jnp.allclose(jnp.exp(logp).sum(axis=1), 1.0, atol=1e-3)

    ref = jax.block_until_ready(jax.jit(reference_forward)(params, x))
    max_err = float(jnp.max(jnp.abs(logp - ref)))
    # bf16 MXU inputs (f32 accumulation, f32 log_softmax) -> loosened tolerance.
    assert max_err < 5e-2, f"mismatch vs reference: {max_err}"
    print("KERNEL_OK")
</pallas_src>

<mosaic_0001>
module attributes {stable_mosaic.version = 11 : i64} {
  func.func @_conv_stack_kernel(%arg0: i32, %arg1: memref<1x1024x128xbf16, #tpu.memory_space<vmem>>, %arg2: memref<128x128xbf16, #tpu.memory_space<vmem>>, %arg3: memref<1x128xf32, #tpu.memory_space<vmem>>, %arg4: memref<9x128x128xbf16, #tpu.memory_space<vmem>>, %arg5: memref<1x128xf32, #tpu.memory_space<vmem>>, %arg6: memref<49x205xf32, #tpu.memory_space<vmem>>, %arg7: memref<9x128x128xbf16, #tpu.memory_space<vmem>>, %arg8: memref<1x128xf32, #tpu.memory_space<vmem>>, %arg9: memref<25x33xf32, #tpu.memory_space<vmem>>, %arg10: memref<1x25x128xbf16, #tpu.memory_space<vmem>>, %arg11: memref<256x128xf32, #tpu.memory_space<vmem>>, %arg12: memref<224x128xf32, #tpu.memory_space<vmem>>, %arg13: memref<56x128xf32, #tpu.memory_space<vmem>>) attributes {dimension_semantics = [#tpu.dimension_semantics<parallel>], iteration_bounds = array<i64: 2>, scalar_prefetch = 0 : i64, scratch_operands = 3 : i64, tpu.core_type = #tpu.core_type<tc>, window_params = [{transform_indices = @transform_0, window_bounds = array<i64: 1, 1024, 128>}, {pipeline_mode = #tpu.pipeline_mode<synchronous>, transform_indices = @transform_1, window_bounds = array<i64: 128, 128>}, {pipeline_mode = #tpu.pipeline_mode<synchronous>, transform_indices = @transform_2, window_bounds = array<i64: 1, 128>}, {pipeline_mode = #tpu.pipeline_mode<synchronous>, transform_indices = @transform_3, window_bounds = array<i64: 9, 128, 128>}, {pipeline_mode = #tpu.pipeline_mode<synchronous>, transform_indices = @transform_4, window_bounds = array<i64: 1, 128>}, {pipeline_mode = #tpu.pipeline_mode<synchronous>, transform_indices = @transform_5, window_bounds = array<i64: 49, 205>}, {pipeline_mode = #tpu.pipeline_mode<synchronous>, transform_indices = @transform_6, window_bounds = array<i64: 9, 128, 128>}, {pipeline_mode = #tpu.pipeline_mode<synchronous>, transform_indices = @transform_7, window_bounds = array<i64: 1, 128>}, {pipeline_mode = #tpu.pipeline_mode<synchronous>, transform_indices = @transform_8, window_bounds = array<i64: 25, 33>}, {transform_indices = @transform_9, window_bounds = array<i64: 1, 25, 128>}]} {
    %c0 = arith.constant 0 : index
    %c0_0 = arith.constant 0 : index
    %c0_1 = arith.constant 0 : index
    %0 = vector.load %arg1[%c0, %c0_0, %c0_1] : memref<1x1024x128xbf16, #tpu.memory_space<vmem>>, vector<1x256x128xbf16>
    %1 = vector.shape_cast %0 : vector<1x256x128xbf16> to vector<256x128xbf16>
    %c0_2 = arith.constant 0 : index
    %c0_3 = arith.constant 0 : index
    %2 = vector.load %arg2[%c0_2, %c0_3] : memref<128x128xbf16, #tpu.memory_space<vmem>>, vector<128x128xbf16>
    %cst = arith.constant dense<0.000000e+00> : vector<256x128xf32>
    %3 = tpu.matmul %1, %2, %cst {dimension_numbers = #tpu.dot_dimension_numbers<[1], [0], [0], [1], [0, 0, 1, 1], [], []>} : vector<256x128xbf16>, vector<128x128xbf16>, vector<256x128xf32> -> vector<256x128xf32>
    %c0_4 = arith.constant 0 : index
    %c256 = arith.constant 256 : index
    %c0_5 = arith.constant 0 : index
    %4 = vector.load %arg1[%c0_4, %c256, %c0_5] : memref<1x1024x128xbf16, #tpu.memory_space<vmem>>, vector<1x256x128xbf16>
    %5 = vector.shape_cast %4 : vector<1x256x128xbf16> to vector<256x128xbf16>
    %c0_6 = arith.constant 0 : index
    %c0_7 = arith.constant 0 : index
    %6 = vector.load %arg2[%c0_6, %c0_7] : memref<128x128xbf16, #tpu.memory_space<vmem>>, vector<128x128xbf16>
    %cst_8 = arith.constant dense<0.000000e+00> : vector<256x128xf32>
    %7 = tpu.matmul %5, %6, %cst_8 {dimension_numbers = #tpu.dot_dimension_numbers<[1], [0], [0], [1], [0, 0, 1, 1], [], []>} : vector<256x128xbf16>, vector<128x128xbf16>, vector<256x128xf32> -> vector<256x128xf32>
    %8 = arith.maximumf %3, %7 : vector<256x128xf32>
    %c0_9 = arith.constant 0 : index
    %c512 = arith.constant 512 : index
    %c0_10 = arith.constant 0 : index
    %9 = vector.load %arg1[%c0_9, %c512, %c0_10] : memref<1x1024x128xbf16, #tpu.memory_space<vmem>>, vector<1x256x128xbf16>
    %10 = vector.shape_cast %9 : vector<1x256x128xbf16> to vector<256x128xbf16>
    %c0_11 = arith.constant 0 : index
    %c0_12 = arith.constant 0 : index
    %11 = vector.load %arg2[%c0_11, %c0_12] : memref<128x128xbf16, #tpu.memory_space<vmem>>, vector<128x128xbf16>
    %cst_13 = arith.constant dense<0.000000e+00> : vector<256x128xf32>
    %12 = tpu.matmul %10, %11, %cst_13 {dimension_numbers = #tpu.dot_dimension_numbers<[1], [0], [0], [1], [0, 0, 1, 1], [], []>} : vector<256x128xbf16>, vector<128x128xbf16>, vector<256x128xf32> -> vector<256x128xf32>
    %13 = arith.maximumf %8, %12 : vector<256x128xf32>
    %c0_14 = arith.constant 0 : index
    %c768 = arith.constant 768 : index
    %c0_15 = arith.constant 0 : index
    %14 = vector.load %arg1[%c0_14, %c768, %c0_15] : memref<1x1024x128xbf16, #tpu.memory_space<vmem>>, vector<1x256x128xbf16>
    %15 = vector.shape_cast %14 : vector<1x256x128xbf16> to vector<256x128xbf16>
    %c0_16 = arith.constant 0 : index
    %c0_17 = arith.constant 0 : index
    %16 = vector.load %arg2[%c0_16, %c0_17] : memref<128x128xbf16, #tpu.memory_space<vmem>>, vector<128x128xbf16>
    %cst_18 = arith.constant dense<0.000000e+00> : vector<256x128xf32>
    %17 = tpu.matmul %15, %16, %cst_18 {dimension_numbers = #tpu.dot_dimension_numbers<[1], [0], [0], [1], [0, 0, 1, 1], [], []>} : vector<256x128xbf16>, vector<128x128xbf16>, vector<256x128xf32> -> vector<256x128xf32>
    %18 = arith.maximumf %13, %17 : vector<256x128xf32>
    %c0_19 = arith.constant 0 : index
    %c0_20 = arith.constant 0 : index
    %19 = vector.load %arg3[%c0_19, %c0_20] : memref<1x128xf32, #tpu.memory_space<vmem>>, vector<1x128xf32>
    %20 = vector.broadcast %19 : vector<1x128xf32> to vector<256x128xf32>
    %21 = arith.addf %18, %20 : vector<256x128xf32>
    %cst_21 = arith.constant 0.000000e+00 : f32
    %22 = vector.broadcast %cst_21 : f32 to vector<256x128xf32>
    %23 = arith.maximumf %21, %22 : vector<256x128xf32>
    %c0_22 = arith.constant 0 : index
    %c0_23 = arith.constant 0 : index
    %24 = vector.load %arg11[%c0_22, %c0_23] : memref<256x128xf32, #tpu.memory_space<vmem>>, vector<256x128xf32>
    tpu.vector_store %arg11[%c0_22, %c0_23], %23 {strides = array<i32>} : memref<256x128xf32, #tpu.memory_space<vmem>>, vector<256x128xf32>,
    %c0_24 = arith.constant 0 : index
    %c0_25 = arith.constant 0 : index
    %25 = vector.load %arg11[%c0_24, %c0_25] : memref<256x128xf32, #tpu.memory_space<vmem>>, vector<222x128xf32>
    %26 = arith.truncf %25 : vector<222x128xf32> to vector<222x128xbf16>
    %c0_26 = arith.constant 0 : index
    %c0_27 = arith.constant 0 : index
    %c0_28 = arith.constant 0 : index
    %27 = vector.load %arg4[%c0_26, %c0_27, %c0_28] : memref<9x128x128xbf16, #tpu.memory_space<vmem>>, vector<1x128x128xbf16>
    %28 = vector.shape_cast %27 : vector<1x128x128xbf16> to vector<128x128xbf16>
    %cst_29 = arith.constant dense<0.000000e+00> : vector<222x128xf32>
    %29 = tpu.matmul %26, %28, %cst_29 {dimension_numbers = #tpu.dot_dimension_numbers<[1], [0], [0], [1], [0, 0, 1, 1], [], []>} : vector<222x128xbf16>, vector<128x128xbf16>, vector<222x128xf32> -> vector<222x128xf32>
    %c1 = arith.constant 1 : index
    %c0_30 = arith.constant 0 : index
    %30 = vector.load %arg11[%c1, %c0_30] : memref<256x128xf32, #tpu.memory_space<vmem>>, vector<222x128xf32>
    %31 = arith.truncf %30 : vector<222x128xf32> to vector<222x128xbf16>
    %c1_31 = arith.constant 1 : index
    %c0_32 = arith.constant 0 : index
    %c0_33 = arith.constant 0 : index
    %32 = vector.load %arg4[%c1_31, %c0_32, %c0_33] : memref<9x128x128xbf16, #tpu.memory_space<vmem>>, vector<1x128x128xbf16>
    %33 = vector.shape_cast %32 : vector<1x128x128xbf16> to vector<128x128xbf16>
    %cst_34 = arith.constant dense<0.000000e+00> : vector<222x128xf32>
    %34 = tpu.matmul %31, %33, %cst_34 {dimension_numbers = #tpu.dot_dimension_numbers<[1], [0], [0], [1], [0, 0, 1, 1], [], []>} : vector<222x128xbf16>, vector<128x128xbf16>, vector<222x128xf32> -> vector<222x128xf32>
    %35 = arith.addf %29, %34 : vector<222x128xf32>
    %c2 = arith.constant 2 : index
    %c0_35 = arith.constant 0 : index
    %36 = vector.load %arg11[%c2, %c0_35] : memref<256x128xf32, #tpu.memory_space<vmem>>, vector<222x128xf32>
    %37 = arith.truncf %36 : vector<222x128xf32> to vector<222x128xbf16>
    %c2_36 = arith.constant 2 : index
    %c0_37 = arith.constant 0 : index
    %c0_38 = arith.constant 0 : index
    %38 = vector.load %arg4[%c2_36, %c0_37, %c0_38] : memref<9x128x128xbf16, #tpu.memory_space<vmem>>, vector<1x128x128xbf16>
    %39 = vector.shape_cast %38 : vector<1x128x128xbf16> to vector<128x128xbf16>
    %cst_39 = arith.constant dense<0.000000e+00> : vector<222x128xf32>
    %40 = tpu.matmul %37, %39, %cst_39 {dimension_numbers = #tpu.dot_dimension_numbers<[1], [0], [0], [1], [0, 0, 1, 1], [], []>} : vector<222x128xbf16>, vector<128x128xbf16>, vector<222x128xf32> -> vector<222x128xf32>
    %41 = arith.addf %35, %40 : vector<222x128xf32>
    %c16 = arith.constant 16 : index
    %c0_40 = arith.constant 0 : index
    %42 = vector.load %arg11[%c16, %c0_40] : memref<256x128xf32, #tpu.memory_space<vmem>>, vector<222x128xf32>
    %43 = arith.truncf %42 : vector<222x128xf32> to vector<222x128xbf16>
    %c3 = arith.constant 3 : index
    %c0_41 = arith.constant 0 : index
    %c0_42 = arith.constant 0 : index
    %44 = vector.load %arg4[%c3, %c0_41, %c0_42] : memref<9x128x128xbf16, #tpu.memory_space<vmem>>, vector<1x128x128xbf16>
    %45 = vector.shape_cast %44 : vector<1x128x128xbf16> to vector<128x128xbf16>
    %cst_43 = arith.constant dense<0.000000e+00> : vector<222x128xf32>
    %46 = tpu.matmul %43, %45, %cst_43 {dimension_numbers = #tpu.dot_dimension_numbers<[1], [0], [0], [1], [0, 0, 1, 1], [], []>} : vector<222x128xbf16>, vector<128x128xbf16>, vector<222x128xf32> -> vector<222x128xf32>
    %47 = arith.addf %41, %46 : vector<222x128xf32>
    %c17 = arith.constant 17 : index
    %c0_44 = arith.constant 0 : index
    %48 = vector.load %arg11[%c17, %c0_44] : memref<256x128xf32, #tpu.memory_space<vmem>>, vector<222x128xf32>
    %49 = arith.truncf %48 : vector<222x128xf32> to vector<222x128xbf16>
    %c4 = arith.constant 4 : index
    %c0_45 = arith.constant 0 : index
    %c0_46 = arith.constant 0 : index
    %50 = vector.load %arg4[%c4, %c0_45, %c0_46] : memref<9x128x128xbf16, #tpu.memory_space<vmem>>, vector<1x128x128xbf16>
    %51 = vector.shape_cast %50 : vector<1x128x128xbf16> to vector<128x128xbf16>
    %cst_47 = arith.constant dense<0.000000e+00> : vector<222x128xf32>
    %52 = tpu.matmul %49, %51, %cst_47 {dimension_numbers = #tpu.dot_dimension_numbers<[1], [0], [0], [1], [0, 0, 1, 1], [], []>} : vector<222x128xbf16>, vector<128x128xbf16>, vector<222x128xf32> -> vector<222x128xf32>
    %53 = arith.addf %47, %52 : vector<222x128xf32>
    %c18 = arith.constant 18 : index
    %c0_48 = arith.constant 0 : index
    %54 = vector.load %arg11[%c18, %c0_48] : memref<256x128xf32, #tpu.memory_space<vmem>>, vector<222x128xf32>
    %55 = arith.truncf %54 : vector<222x128xf32> to vector<222x128xbf16>
    %c5 = arith.constant 5 : index
    %c0_49 = arith.constant 0 : index
    %c0_50 = arith.constant 0 : index
    %56 = vector.load %arg4[%c5, %c0_49, %c0_50] : memref<9x128x128xbf16, #tpu.memory_space<vmem>>, vector<1x128x128xbf16>
    %57 = vector.shape_cast %56 : vector<1x128x128xbf16> to vector<128x128xbf16>
    %cst_51 = arith.constant dense<0.000000e+00> : vector<222x128xf32>
    %58 = tpu.matmul %55, %57, %cst_51 {dimension_numbers = #tpu.dot_dimension_numbers<[1], [0], [0], [1], [0, 0, 1, 1], [], []>} : vector<222x128xbf16>, vector<128x128xbf16>, vector<222x128xf32> -> vector<222x128xf32>
    %59 = arith.addf %53, %58 : vector<222x128xf32>
    %c32 = arith.constant 32 : index
    %c0_52 = arith.constant 0 : index
    %60 = vector.load %arg11[%c32, %c0_52] : memref<256x128xf32, #tpu.memory_space<vmem>>, vector<222x128xf32>
    %61 = arith.truncf %60 : vector<222x128xf32> to vector<222x128xbf16>
    %c6 = arith.constant 6 : index
    %c0_53 = arith.constant 0 : index
    %c0_54 = arith.constant 0 : index
    %62 = vector.load %arg4[%c6, %c0_53, %c0_54] : memref<9x128x128xbf16, #tpu.memory_space<vmem>>, vector<1x128x128xbf16>
    %63 = vector.shape_cast %62 : vector<1x128x128xbf16> to vector<128x128xbf16>
    %cst_55 = arith.constant dense<0.000000e+00> : vector<222x128xf32>
    %64 = tpu.matmul %61, %63, %cst_55 {dimension_numbers = #tpu.dot_dimension_numbers<[1], [0], [0], [1], [0, 0, 1, 1], [], []>} : vector<222x128xbf16>, vector<128x128xbf16>, vector<222x128xf32> -> vector<222x128xf32>
    %65 = arith.addf %59, %64 : vector<222x128xf32>
    %c33 = arith.constant 33 : index
    %c0_56 = arith.constant 0 : index
    %66 = vector.load %arg11[%c33, %c0_56] : memref<256x128xf32, #tpu.memory_space<vmem>>, vector<222x128xf32>
    %67 = arith.truncf %66 : vector<222x128xf32> to vector<222x128xbf16>
    %c7 = arith.constant 7 : index
    %c0_57 = arith.constant 0 : index
    %c0_58 = arith.constant 0 : index
    %68 = vector.load %arg4[%c7, %c0_57, %c0_58] : memref<9x128x128xbf16, #tpu.memory_space<vmem>>, vector<1x128x128xbf16>
    %69 = vector.shape_cast %68 : vector<1x128x128xbf16> to vector<128x128xbf16>
    %cst_59 = arith.constant dense<0.000000e+00> : vector<222x128xf32>
    %70 = tpu.matmul %67, %69, %cst_59 {dimension_numbers = #tpu.dot_dimension_numbers<[1], [0], [0], [1], [0, 0, 1, 1], [], []>} : vector<222x128xbf16>, vector<128x128xbf16>, vector<222x128xf32> -> vector<222x128xf32>
    %71 = arith.addf %65, %70 : vector<222x128xf32>
    %c34 = arith.constant 34 : index
    %c0_60 = arith.constant 0 : index
    %72 = vector.load %arg11[%c34, %c0_60] : memref<256x128xf32, #tpu.memory_space<vmem>>, vector<222x128xf32>
    %73 = arith.truncf %72 : vector<222x128xf32> to vector<222x128xbf16>
    %c8 = arith.constant 8 : index
    %c0_61 = arith.constant 0 : index
    %c0_62 = arith.constant 0 : index
    %74 = vector.load %arg4[%c8, %c0_61, %c0_62] : memref<9x128x128xbf16, #tpu.memory_space<vmem>>, vector<1x128x128xbf16>
    %75 = vector.shape_cast %74 : vector<1x128x128xbf16> to vector<128x128xbf16>
    %cst_63 = arith.constant dense<0.000000e+00> : vector<222x128xf32>
    %76 = tpu.matmul %73, %75, %cst_63 {dimension_numbers = #tpu.dot_dimension_numbers<[1], [0], [0], [1], [0, 0, 1, 1], [], []>} : vector<222x128xbf16>, vector<128x128xbf16>, vector<222x128xf32> -> vector<222x128xf32>
    %77 = arith.addf %71, %76 : vector<222x128xf32>
    %c0_64 = arith.constant 0 : index
    %c0_65 = arith.constant 0 : index
    %78 = vector.load %arg12[%c0_64, %c0_65] : memref<224x128xf32, #tpu.memory_space<vmem>>, vector<222x128xf32>
    tpu.vector_store %arg12[%c0_64, %c0_65], %77 {strides = array<i32>} : memref<224x128xf32, #tpu.memory_space<vmem>>, vector<222x128xf32>,
    %c0_66 = arith.constant 0 : index
    %c0_67 = arith.constant 0 : index
    %79 = vector.load %arg12[%c0_66, %c0_67] : memref<224x128xf32, #tpu.memory_space<vmem>>, vector<205x128xf32>
    %c1_68 = arith.constant 1 : index
    %c0_69 = arith.constant 0 : index
    %80 = vector.load %arg12[%c1_68, %c0_69] : memref<224x128xf32, #tpu.memory_space<vmem>>, vector<205x128xf32>
    %81 = arith.maximumf %79, %80 : vector<205x128xf32>
    %c16_70 = arith.constant 16 : index
    %c0_71 = arith.constant 0 : index
    %82 = vector.load %arg12[%c16_70, %c0_71] : memref<224x128xf32, #tpu.memory_space<vmem>>, vector<205x128xf32>
    %c17_72 = arith.constant 17 : index
    %c0_73 = arith.constant 0 : index
    %83 = vector.load %arg12[%c17_72, %c0_73] : memref<224x128xf32, #tpu.memory_space<vmem>>, vector<205x128xf32>
    %84 = arith.maximumf %82, %83 : vector<205x128xf32>
    %85 = arith.maximumf %81, %84 : vector<205x128xf32>
    %c0_74 = arith.constant 0 : index
    %c0_75 = arith.constant 0 : index
    %86 = vector.load %arg6[%c0_74, %c0_75] : memref<49x205xf32, #tpu.memory_space<vmem>>, vector<49x205xf32>
    %cst_76 = arith.constant dense<0.000000e+00> : vector<49x128xf32>
    %87 = tpu.matmul %86, %85, %cst_76 {dimension_numbers = #tpu.dot_dimension_numbers<[1], [0], [0], [1], [0, 0, 1, 1], [], []>} : vector<49x205xf32>, vector<205x128xf32>, vector<49x128xf32> -> vector<49x128xf32>
    %c0_77 = arith.constant 0 : index
    %c0_78 = arith.constant 0 : index
    %88 = vector.load %arg5[%c0_77, %c0_78] : memref<1x128xf32, #tpu.memory_space<vmem>>, vector<1x128xf32>
    %89 = vector.broadcast %88 : vector<1x128xf32> to vector<49x128xf32>
    %90 = arith.addf %87, %89 : vector<49x128xf32>
    %cst_79 = arith.constant 0.000000e+00 : f32
    %91 = vector.broadcast %cst_79 : f32 to vector<49x128xf32>
    %92 = arith.maximumf %90, %91 : vector<49x128xf32>
    %c0_80 = arith.constant 0 : index
    %c0_81 = arith.constant 0 : index
    %93 = vector.load %arg13[%c0_80, %c0_81] : memref<56x128xf32, #tpu.memory_space<vmem>>, vector<49x128xf32>
    tpu.vector_store %arg13[%c0_80, %c0_81], %92 {strides = array<i32>} : memref<56x128xf32, #tpu.memory_space<vmem>>, vector<49x128xf32>,
    %c0_82 = arith.constant 0 : index
    %c0_83 = arith.constant 0 : index
    %94 = vector.load %arg13[%c0_82, %c0_83] : memref<56x128xf32, #tpu.memory_space<vmem>>, vector<33x128xf32>
    %95 = arith.truncf %94 : vector<33x128xf32> to vector<33x128xbf16>
    %c0_84 = arith.constant 0 : index
    %c0_85 = arith.constant 0 : index
    %c0_86 = arith.constant 0 : index
    %96 = vector.load %arg7[%c0_84, %c0_85, %c0_86] : memref<9x128x128xbf16, #tpu.memory_space<vmem>>, vector<1x128x128xbf16>
    %97 = vector.shape_cast %96 : vector<1x128x128xbf16> to vector<128x128xbf16>
    %cst_87 = arith.constant dense<0.000000e+00> : vector<33x128xf32>
    %98 = tpu.matmul %95, %97, %cst_87 {dimension_numbers = #tpu.dot_dimension_numbers<[1], [0], [0], [1], [0, 0, 1, 1], [], []>} : vector<33x128xbf16>, vector<128x128xbf16>, vector<33x128xf32> -> vector<33x128xf32>
    %c1_88 = arith.constant 1 : index
    %c0_89 = arith.constant 0 : index
    %99 = vector.load %arg13[%c1_88, %c0_89] : memref<56x128xf32, #tpu.memory_space<vmem>>, vector<33x128xf32>
    %100 = arith.truncf %99 : vector<33x128xf32> to vector<33x128xbf16>
    %c1_90 = arith.constant 1 : index
    %c0_91 = arith.constant 0 : index
    %c0_92 = arith.constant 0 : index
    %101 = vector.load %arg7[%c1_90, %c0_91, %c0_92] : memref<9x128x128xbf16, #tpu.memory_space<vmem>>, vector<1x128x128xbf16>
    %102 = vector.shape_cast %101 : vector<1x128x128xbf16> to vector<128x128xbf16>
    %cst_93 = arith.constant dense<0.000000e+00> : vector<33x128xf32>
    %103 = tpu.matmul %100, %102, %cst_93 {dimension_numbers = #tpu.dot_dimension_numbers<[1], [0], [0], [1], [0, 0, 1, 1], [], []>} : vector<33x128xbf16>, vector<128x128xbf16>, vector<33x128xf32> -> vector<33x128xf32>
    %104 = arith.addf %98, %103 : vector<33x128xf32>
    %c2_94 = arith.constant 2 : index
    %c0_95 = arith.constant 0 : index
    %105 = vector.load %arg13[%c2_94, %c0_95] : memref<56x128xf32, #tpu.memory_space<vmem>>, vector<33x128xf32>
    %106 = arith.truncf %105 : vector<33x128xf32> to vector<33x128xbf16>
    %c2_96 = arith.constant 2 : index
    %c0_97 = arith.constant 0 : index
    %c0_98 = arith.constant 0 : index
    %107 = vector.load %arg7[%c2_96, %c0_97, %c0_98] : memref<9x128x128xbf16, #tpu.memory_space<vmem>>, vector<1x128x128xbf16>
    %108 = vector.shape_cast %107 : vector<1x128x128xbf16> to vector<128x128xbf16>
    %cst_99 = arith.constant dense<0.000000e+00> : vector<33x128xf32>
    %109 = tpu.matmul %106, %108, %cst_99 {dimension_numbers = #tpu.dot_dimension_numbers<[1], [0], [0], [1], [0, 0, 1, 1], [], []>} : vector<33x128xbf16>, vector<128x128xbf16>, vector<33x128xf32> -> vector<33x128xf32>
    %110 = arith.addf %104, %109 : vector<33x128xf32>
    %c7_100 = arith.constant 7 : index
    %c0_101 = arith.constant 0 : index
    %111 = vector.load %arg13[%c7_100, %c0_101] : memref<56x128xf32, #tpu.memory_space<vmem>>, vector<33x128xf32>
    %112 = arith.truncf %111 : vector<33x128xf32> to vector<33x128xbf16>
    %c3_102 = arith.constant 3 : index
    %c0_103 = arith.constant 0 : index
    %c0_104 = arith.constant 0 : index
    %113 = vector.load %arg7[%c3_102, %c0_103, %c0_104] : memref<9x128x128xbf16, #tpu.memory_space<vmem>>, vector<1x128x128xbf16>
    %114 = vector.shape_cast %113 : vector<1x128x128xbf16> to vector<128x128xbf16>
    %cst_105 = arith.constant dense<0.000000e+00> : vector<33x128xf32>
    %115 = tpu.matmul %112, %114, %cst_105 {dimension_numbers = #tpu.dot_dimension_numbers<[1], [0], [0], [1], [0, 0, 1, 1], [], []>} : vector<33x128xbf16>, vector<128x128xbf16>, vector<33x128xf32> -> vector<33x128xf32>
    %116 = arith.addf %110, %115 : vector<33x128xf32>
    %c8_106 = arith.constant 8 : index
    %c0_107 = arith.constant 0 : index
    %117 = vector.load %arg13[%c8_106, %c0_107] : memref<56x128xf32, #tpu.memory_space<vmem>>, vector<33x128xf32>
    %118 = arith.truncf %117 : vector<33x128xf32> to vector<33x128xbf16>
    %c4_108 = arith.constant 4 : index
    %c0_109 = arith.constant 0 : index
    %c0_110 = arith.constant 0 : index
    %119 = vector.load %arg7[%c4_108, %c0_109, %c0_110] : memref<9x128x128xbf16, #tpu.memory_space<vmem>>, vector<1x128x128xbf16>
    %120 = vector.shape_cast %119 : vector<1x128x128xbf16> to vector<128x128xbf16>
    %cst_111 = arith.constant dense<0.000000e+00> : vector<33x128xf32>
    %121 = tpu.matmul %118, %120, %cst_111 {dimension_numbers = #tpu.dot_dimension_numbers<[1], [0], [0], [1], [0, 0, 1, 1], [], []>} : vector<33x128xbf16>, vector<128x128xbf16>, vector<33x128xf32> -> vector<33x128xf32>
    %122 = arith.addf %116, %121 : vector<33x128xf32>
    %c9 = arith.constant 9 : index
    %c0_112 = arith.constant 0 : index
    %123 = vector.load %arg13[%c9, %c0_112] : memref<56x128xf32, #tpu.memory_space<vmem>>, vector<33x128xf32>
    %124 = arith.truncf %123 : vector<33x128xf32> to vector<33x128xbf16>
    %c5_113 = arith.constant 5 : index
    %c0_114 = arith.constant 0 : index
    %c0_115 = arith.constant 0 : index
    %125 = vector.load %arg7[%c5_113, %c0_114, %c0_115] : memref<9x128x128xbf16, #tpu.memory_space<vmem>>, vector<1x128x128xbf16>
    %126 = vector.shape_cast %125 : vector<1x128x128xbf16> to vector<128x128xbf16>
    %cst_116 = arith.constant dense<0.000000e+00> : vector<33x128xf32>
    %127 = tpu.matmul %124, %126, %cst_116 {dimension_numbers = #tpu.dot_dimension_numbers<[1], [0], [0], [1], [0, 0, 1, 1], [], []>} : vector<33x128xbf16>, vector<128x128xbf16>, vector<33x128xf32> -> vector<33x128xf32>
    %128 = arith.addf %122, %127 : vector<33x128xf32>
    %c14 = arith.constant 14 : index
    %c0_117 = arith.constant 0 : index
    %129 = vector.load %arg13[%c14, %c0_117] : memref<56x128xf32, #tpu.memory_space<vmem>>, vector<33x128xf32>
    %130 = arith.truncf %129 : vector<33x128xf32> to vector<33x128xbf16>
    %c6_118 = arith.constant 6 : index
    %c0_119 = arith.constant 0 : index
    %c0_120 = arith.constant 0 : index
    %131 = vector.load %arg7[%c6_118, %c0_119, %c0_120] : memref<9x128x128xbf16, #tpu.memory_space<vmem>>, vector<1x128x128xbf16>
    %132 = vector.shape_cast %131 : vector<1x128x128xbf16> to vector<128x128xbf16>
    %cst_121 = arith.constant dense<0.000000e+00> : vector<33x128xf32>
    %133 = tpu.matmul %130, %132, %cst_121 {dimension_numbers = #tpu.dot_dimension_numbers<[1], [0], [0], [1], [0, 0, 1, 1], [], []>} : vector<33x128xbf16>, vector<128x128xbf16>, vector<33x128xf32> -> vector<33x128xf32>
    %134 = arith.addf %128, %133 : vector<33x128xf32>
    %c15 = arith.constant 15 : index
    %c0_122 = arith.constant 0 : index
    %135 = vector.load %arg13[%c15, %c0_122] : memref<56x128xf32, #tpu.memory_space<vmem>>, vector<33x128xf32>
    %136 = arith.truncf %135 : vector<33x128xf32> to vector<33x128xbf16>
    %c7_123 = arith.constant 7 : index
    %c0_124 = arith.constant 0 : index
    %c0_125 = arith.constant 0 : index
    %137 = vector.load %arg7[%c7_123, %c0_124, %c0_125] : memref<9x128x128xbf16, #tpu.memory_space<vmem>>, vector<1x128x128xbf16>
    %138 = vector.shape_cast %137 : vector<1x128x128xbf16> to vector<128x128xbf16>
    %cst_126 = arith.constant dense<0.000000e+00> : vector<33x128xf32>
    %139 = tpu.matmul %136, %138, %cst_126 {dimension_numbers = #tpu.dot_dimension_numbers<[1], [0], [0], [1], [0, 0, 1, 1], [], []>} : vector<33x128xbf16>, vector<128x128xbf16>, vector<33x128xf32> -> vector<33x128xf32>
    %140 = arith.addf %134, %139 : vector<33x128xf32>
    %c16_127 = arith.constant 16 : index
    %c0_128 = arith.constant 0 : index
    %141 = vector.load %arg13[%c16_127, %c0_128] : memref<56x128xf32, #tpu.memory_space<vmem>>, vector<33x128xf32>
    %142 = arith.truncf %141 : vector<33x128xf32> to vector<33x128xbf16>
    %c8_129 = arith.constant 8 : index
    %c0_130 = arith.constant 0 : index
    %c0_131 = arith.constant 0 : index
    %143 = vector.load %arg7[%c8_129, %c0_130, %c0_131] : memref<9x128x128xbf16, #tpu.memory_space<vmem>>, vector<1x128x128xbf16>
    %144 = vector.shape_cast %143 : vector<1x128x128xbf16> to vector<128x128xbf16>
    %cst_132 = arith.constant dense<0.000000e+00> : vector<33x128xf32>
    %145 = tpu.matmul %142, %144, %cst_132 {dimension_numbers = #tpu.dot_dimension_numbers<[1], [0], [0], [1], [0, 0, 1, 1], [], []>} : vector<33x128xbf16>, vector<128x128xbf16>, vector<33x128xf32> -> vector<33x128xf32>
    %146 = arith.addf %140, %145 : vector<33x128xf32>
    %c0_133 = arith.constant 0 : index
    %c0_134 = arith.constant 0 : index
    %147 = vector.load %arg9[%c0_133, %c0_134] : memref<25x33xf32, #tpu.memory_space<vmem>>, vector<25x33xf32>
    %cst_135 = arith.constant dense<0.000000e+00> : vector<25x128xf32>
    %148 = tpu.matmul %147, %146, %cst_135 {dimension_numbers = #tpu.dot_dimension_numbers<[1], [0], [0], [1], [0, 0, 1, 1], [], []>} : vector<25x33xf32>, vector<33x128xf32>, vector<25x128xf32> -> vector<25x128xf32>
    %c0_136 = arith.constant 0 : index
    %c0_137 = arith.constant 0 : index
    %149 = vector.load %arg8[%c0_136, %c0_137] : memref<1x128xf32, #tpu.memory_space<vmem>>, vector<1x128xf32>
    %150 = vector.broadcast %149 : vector<1x128xf32> to vector<25x128xf32>
    %151 = arith.addf %148, %150 : vector<25x128xf32>
    %cst_138 = arith.constant 0.000000e+00 : f32
    %152 = vector.broadcast %cst_138 : f32 to vector<25x128xf32>
    %153 = arith.maximumf %151, %152 : vector<25x128xf32>
    %154 = arith.truncf %153 : vector<25x128xf32> to vector<25x128xbf16>
    %c0_139 = arith.constant 0 : index
    %c0_140 = arith.constant 0 : index
    %c0_141 = arith.constant 0 : index
    %155 = vector.load %arg10[%c0_139, %c0_140, %c0_141] : memref<1x25x128xbf16, #tpu.memory_space<vmem>>, vector<1x25x128xbf16>
    %156 = vector.shape_cast %155 : vector<1x25x128xbf16> to vector<25x128xbf16>
    %157 = vector.shape_cast %154 : vector<25x128xbf16> to vector<1x25x128xbf16>
    tpu.vector_store %arg10[%c0_139, %c0_140, %c0_141], %157 {strides = array<i32>} : memref<1x25x128xbf16, #tpu.memory_space<vmem>>, vector<1x25x128xbf16>,
    return
  }
  func.func @transform_0(%arg0: i32) -> (i32, i32, i32) {
    %c0_i32 = arith.constant 0 : i32
    %c0_i32_0 = arith.constant 0 : i32
    %c0_i32_1 = arith.constant 0 : i32
    return %arg0, %c0_i32, %c0_i32_0 : i32, i32, i32
  }
  func.func @transform_1(%arg0: i32) -> (i32, i32) {
    %c0_i32 = arith.constant 0 : i32
    %c0_i32_0 = arith.constant 0 : i32
    %c0_i32_1 = arith.constant 0 : i32
    return %c0_i32, %c0_i32_0 : i32, i32
  }
  func.func @transform_2(%arg0: i32) -> (i32, i32) {
    %c0_i32 = arith.constant 0 : i32
    %c0_i32_0 = arith.constant 0 : i32
    %c0_i32_1 = arith.constant 0 : i32
    return %c0_i32, %c0_i32_0 : i32, i32
  }
  func.func @transform_3(%arg0: i32) -> (i32, i32, i32) {
    %c0_i32 = arith.constant 0 : i32
    %c0_i32_0 = arith.constant 0 : i32
    %c0_i32_1 = arith.constant 0 : i32
    %c0_i32_2 = arith.constant 0 : i32
    return %c0_i32, %c0_i32_0, %c0_i32_1 : i32, i32, i32
  }
  func.func @transform_4(%arg0: i32) -> (i32, i32) {
    %c0_i32 = arith.constant 0 : i32
    %c0_i32_0 = arith.constant 0 : i32
    %c0_i32_1 = arith.constant 0 : i32
    return %c0_i32, %c0_i32_0 : i32, i32
  }
  func.func @transform_5(%arg0: i32) -> (i32, i32) {
    %c0_i32 = arith.constant 0 : i32
    %c0_i32_0 = arith.constant 0 : i32
    %c0_i32_1 = arith.constant 0 : i32
    return %c0_i32, %c0_i32_0 : i32, i32
  }
  func.func @transform_6(%arg0: i32) -> (i32, i32, i32) {
    %c0_i32 = arith.constant 0 : i32
    %c0_i32_0 = arith.constant 0 : i32
    %c0_i32_1 = arith.constant 0 : i32
    %c0_i32_2 = arith.constant 0 : i32
    return %c0_i32, %c0_i32_0, %c0_i32_1 : i32, i32, i32
  }
  func.func @transform_7(%arg0: i32) -> (i32, i32) {
    %c0_i32 = arith.constant 0 : i32
    %c0_i32_0 = arith.constant 0 : i32
    %c0_i32_1 = arith.constant 0 : i32
    return %c0_i32, %c0_i32_0 : i32, i32
  }
  func.func @transform_8(%arg0: i32) -> (i32, i32) {
    %c0_i32 = arith.constant 0 : i32
    %c0_i32_0 = arith.constant 0 : i32
    %c0_i32_1 = arith.constant 0 : i32
    return %c0_i32, %c0_i32_0 : i32, i32
  }
  func.func @transform_9(%arg0: i32) -> (i32, i32, i32) {
    %c0_i32 = arith.constant 0 : i32
    %c0_i32_0 = arith.constant 0 : i32
    %c0_i32_1 = arith.constant 0 : i32
    return %arg0, %c0_i32, %c0_i32_0 : i32, i32, i32
  }
}

module attributes {stable_mosaic.version = 11 : i64} {
  func.func @_fc_head_kernel(%arg0: i32, %arg1: memref<2x3200xbf16, #tpu.memory_space<vmem>>, %arg2: memref<3200x128xbf16, #tpu.memory_space<vmem>>, %arg3: memref<1x128xf32, #tpu.memory_space<vmem>>, %arg4: memref<128x128xbf16, #tpu.memory_space<vmem>>, %arg5: memref<1x128xf32, #tpu.memory_space<vmem>>, %arg6: memref<128x128xbf16, #tpu.memory_space<vmem>>, %arg7: memref<1x128xf32, #tpu.memory_space<vmem>>, %arg8: memref<2x128xf32, #tpu.memory_space<vmem>>) attributes {dimension_semantics = [#tpu.dimension_semantics<parallel>], iteration_bounds = array<i64: 1>, scalar_prefetch = 0 : i64, scratch_operands = 0 : i64, tpu.core_type = #tpu.core_type<tc>, window_params = [{transform_indices = @transform_0, window_bounds = array<i64: 2, 3200>}, {pipeline_mode = #tpu.pipeline_mode<synchronous>, transform_indices = @transform_1, window_bounds = array<i64: 3200, 128>}, {pipeline_mode = #tpu.pipeline_mode<synchronous>, transform_indices = @transform_2, window_bounds = array<i64: 1, 128>}, {pipeline_mode = #tpu.pipeline_mode<synchronous>, transform_indices = @transform_3, window_bounds = array<i64: 128, 128>}, {pipeline_mode = #tpu.pipeline_mode<synchronous>, transform_indices = @transform_4, window_bounds = array<i64: 1, 128>}, {pipeline_mode = #tpu.pipeline_mode<synchronous>, transform_indices = @transform_5, window_bounds = array<i64: 128, 128>}, {pipeline_mode = #tpu.pipeline_mode<synchronous>, transform_indices = @transform_6, window_bounds = array<i64: 1, 128>}, {transform_indices = @transform_7, window_bounds = array<i64: 2, 128>}]} {
    %c0 = arith.constant 0 : index
    %c0_0 = arith.constant 0 : index
    %0 = vector.load %arg1[%c0, %c0_0] : memref<2x3200xbf16, #tpu.memory_space<vmem>>, vector<2x3200xbf16>
    %c0_1 = arith.constant 0 : index
    %c0_2 = arith.constant 0 : index
    %1 = vector.load %arg2[%c0_1, %c0_2] : memref<3200x128xbf16, #tpu.memory_space<vmem>>, vector<3200x128xbf16>
    %cst = arith.constant dense<0.000000e+00> : vector<2x128xf32>
    %2 = tpu.matmul %0, %1, %cst {dimension_numbers = #tpu.dot_dimension_numbers<[1], [0], [0], [1], [0, 0, 1, 1], [], []>} : vector<2x3200xbf16>, vector<3200x128xbf16>, vector<2x128xf32> -> vector<2x128xf32>
    %c0_3 = arith.constant 0 : index
    %c0_4 = arith.constant 0 : index
    %3 = vector.load %arg3[%c0_3, %c0_4] : memref<1x128xf32, #tpu.memory_space<vmem>>, vector<1x128xf32>
    %4 = vector.broadcast %3 : vector<1x128xf32> to vector<2x128xf32>
    %5 = arith.addf %2, %4 : vector<2x128xf32>
    %cst_5 = arith.constant 0.000000e+00 : f32
    %6 = vector.broadcast %cst_5 : f32 to vector<2x128xf32>
    %7 = arith.maximumf %5, %6 : vector<2x128xf32>
    %8 = arith.truncf %7 : vector<2x128xf32> to vector<2x128xbf16>
    %c0_6 = arith.constant 0 : index
    %c0_7 = arith.constant 0 : index
    %9 = vector.load %arg4[%c0_6, %c0_7] : memref<128x128xbf16, #tpu.memory_space<vmem>>, vector<128x128xbf16>
    %cst_8 = arith.constant dense<0.000000e+00> : vector<2x128xf32>
    %10 = tpu.matmul %8, %9, %cst_8 {dimension_numbers = #tpu.dot_dimension_numbers<[1], [0], [0], [1], [0, 0, 1, 1], [], []>} : vector<2x128xbf16>, vector<128x128xbf16>, vector<2x128xf32> -> vector<2x128xf32>
    %c0_9 = arith.constant 0 : index
    %c0_10 = arith.constant 0 : index
    %11 = vector.load %arg5[%c0_9, %c0_10] : memref<1x128xf32, #tpu.memory_space<vmem>>, vector<1x128xf32>
    %12 = vector.broadcast %11 : vector<1x128xf32> to vector<2x128xf32>
    %13 = arith.addf %10, %12 : vector<2x128xf32>
    %cst_11 = arith.constant 0.000000e+00 : f32
    %14 = vector.broadcast %cst_11 : f32 to vector<2x128xf32>
    %15 = arith.maximumf %13, %14 : vector<2x128xf32>
    %16 = arith.truncf %15 : vector<2x128xf32> to vector<2x128xbf16>
    %c0_12 = arith.constant 0 : index
    %c0_13 = arith.constant 0 : index
    %17 = vector.load %arg6[%c0_12, %c0_13] : memref<128x128xbf16, #tpu.memory_space<vmem>>, vector<128x128xbf16>
    %cst_14 = arith.constant dense<0.000000e+00> : vector<2x128xf32>
    %18 = tpu.matmul %16, %17, %cst_14 {dimension_numbers = #tpu.dot_dimension_numbers<[1], [0], [0], [1], [0, 0, 1, 1], [], []>} : vector<2x128xbf16>, vector<128x128xbf16>, vector<2x128xf32> -> vector<2x128xf32>
    %c0_15 = arith.constant 0 : index
    %c0_16 = arith.constant 0 : index
    %19 = vector.load %arg7[%c0_15, %c0_16] : memref<1x128xf32, #tpu.memory_space<vmem>>, vector<1x128xf32>
    %20 = vector.broadcast %19 : vector<1x128xf32> to vector<2x128xf32>
    %21 = arith.addf %18, %20 : vector<2x128xf32>
    %22 = tpu.iota {dimensions = array<i32: 1>} : vector<2x128xi32>
    %c43_i32 = arith.constant 43 : i32
    %23 = vector.broadcast %c43_i32 : i32 to vector<2x128xi32>
    %24 = arith.cmpi slt, %22, %23 : vector<2x128xi32>
    %cst_17 = arith.constant -1.000000e+30 : f32
    %25 = vector.broadcast %cst_17 : f32 to vector<2x128xf32>
    %26 = arith.select %24, %21, %25 : vector<2x128xi1>, vector<2x128xf32>
    %cst_18 = arith.constant dense<0xFF800000> : vector<2xf32>
    %27 = vector.multi_reduction <maximumf>, %26, %cst_18 [1] : vector<2x128xf32> to vector<2xf32>
    %28 = vector.shape_cast %27 : vector<2xf32> to vector<2x1xf32>
    %29 = vector.broadcast %28 : vector<2x1xf32> to vector<2x128xf32>
    %30 = arith.subf %26, %29 : vector<2x128xf32>
    %31 = math.exp %30 : vector<2x128xf32>
    %cst_19 = arith.constant dense<0.000000e+00> : vector<2xf32>
    %32 = vector.multi_reduction <add>, %31, %cst_19 [1] : vector<2x128xf32> to vector<2xf32>
    %33 = vector.shape_cast %32 : vector<2xf32> to vector<2x1xf32>
    %34 = math.log %33 : vector<2x1xf32>
    %35 = vector.broadcast %34 : vector<2x1xf32> to vector<2x128xf32>
    %36 = arith.subf %30, %35 : vector<2x128xf32>
    %c0_20 = arith.constant 0 : index
    %c0_21 = arith.constant 0 : index
    %37 = vector.load %arg8[%c0_20, %c0_21] : memref<2x128xf32, #tpu.memory_space<vmem>>, vector<2x128xf32>
    tpu.vector_store %arg8[%c0_20, %c0_21], %36 {strides = array<i32>} : memref<2x128xf32, #tpu.memory_space<vmem>>, vector<2x128xf32>,
    return
  }
  func.func @transform_0(%arg0: i32) -> (i32, i32) {
    %c0_i32 = arith.constant 0 : i32
    %c0_i32_0 = arith.constant 0 : i32
    return %arg0, %c0_i32 : i32, i32
  }
  func.func @transform_1(%arg0: i32) -> (i32, i32) {
    %c0_i32 = arith.constant 0 : i32
    %c0_i32_0 = arith.constant 0 : i32
    %c0_i32_1 = arith.constant 0 : i32
    return %c0_i32, %c0_i32_0 : i32, i32
  }
  func.func @transform_2(%arg0: i32) -> (i32, i32) {
    %c0_i32 = arith.constant 0 : i32
    %c0_i32_0 = arith.constant 0 : i32
    %c0_i32_1 = arith.constant 0 : i32
    return %c0_i32, %c0_i32_0 : i32, i32
  }
  func.func @transform_3(%arg0: i32) -> (i32, i32) {
    %c0_i32 = arith.constant 0 : i32
    %c0_i32_0 = arith.constant 0 : i32
    %c0_i32_1 = arith.constant 0 : i32
    return %c0_i32, %c0_i32_0 : i32, i32
  }
  func.func @transform_4(%arg0: i32) -> (i32, i32) {
    %c0_i32 = arith.constant 0 : i32
    %c0_i32_0 = arith.constant 0 : i32
    %c0_i32_1 = arith.constant 0 : i32
    return %c0_i32, %c0_i32_0 : i32, i32
  }
  func.func @transform_5(%arg0: i32) -> (i32, i32) {
    %c0_i32 = arith.constant 0 : i32
    %c0_i32_0 = arith.constant 0 : i32
    %c0_i32_1 = arith.constant 0 : i32
    return %c0_i32, %c0_i32_0 : i32, i32
  }
  func.func @transform_6(%arg0: i32) -> (i32, i32) {
    %c0_i32 = arith.constant 0 : i32
    %c0_i32_0 = arith.constant 0 : i32
    %c0_i32_1 = arith.constant 0 : i32
    return %c0_i32, %c0_i32_0 : i32, i32
  }
  func.func @transform_7(%arg0: i32) -> (i32, i32) {
    %c0_i32 = arith.constant 0 : i32
    %c0_i32_0 = arith.constant 0 : i32
    return %arg0, %c0_i32 : i32, i32
  }
}

</mosaic_0001>

<bundles_post_ra>
// kernel: nnnet_forward.3
= control target key start
LH: loop header
LB: loop body
LE: loop exit
PB: predicated region body
PF: predicated region fallthrough
CT: control target
= control target key end

     0   :  { %s4057_s0 = inlined_call_operand.vmem [shape: bf16[2,3200], index: 0, kind: input, shape index: {}]   ;;  %s4058_s1 = inlined_call_operand.vmem [shape: bf16[3200,128], index: 1, kind: input, shape index: {}]   ;;  %s4059_s2 = inlined_call_operand.vmem [shape: f32[1,128], index: 2, kind: input, shape index: {}]   ;;  %s4060_s3 = inlined_call_operand.vmem [shape: bf16[128,128], index: 3, kind: input, shape index: {}]   ;;  %s4061_s4 = inlined_call_operand.vmem [shape: f32[1,128], index: 4, kind: input, shape index: {}]   ;;  %s4062_s5 = inlined_call_operand.vmem [shape: bf16[128,128], index: 5, kind: input, shape index: {}]   ;;  %s4063_s6 = inlined_call_operand.vmem [shape: f32[1,128], index: 6, kind: input, shape index: {}]   ;;  %s4064_s7 = inlined_call_operand.hbm [shape: f32[2,128], index: 7, kind: output, shape index: {}]  }
   0x1   :  { %v3089_v0 = vld [vmem:[%s4058_s1 + $0x38] sm:$0xff]  ;;  %v3088_v4 = vld [vmem:[%s4058_s1 + $0x30] sm:$0xff]  ;;  %v3087_v8 = vld [vmem:[%s4058_s1 + $0x28] sm:$0xff] }
   0x2   :  { %v3105_v1 = vld [vmem:[%s4058_s1 + $0xb8] sm:$0xff]  ;;  %1693 = vmatpush.bf16.msra.mxu0 %v3089_v0  ;;  %v3104_v5 = vld [vmem:[%s4058_s1 + $0xb0] sm:$0xff]  ;;  %v3103_v9 = vld [vmem:[%s4058_s1 + $0xa8] sm:$0xff] }
   0x3   :  { %v3097_v2 = vld [vmem:[%s4058_s1 + $0x78] sm:$0xff]  ;;  %1719 = vmatpush.bf16.msra.mxu2 %v3105_v1  ;;  %v3096_v6 = vld [vmem:[%s4058_s1 + $0x70] sm:$0xff]  ;;  %v3095_v10 = vld [vmem:[%s4058_s1 + $0x68] sm:$0xff] }
   0x4   :  { %v3113_v3 = vld [vmem:[%s4058_s1 + $0xf8] sm:$0xff]  ;;  %1706 = vmatpush.bf16.msra.mxu1 %v3097_v2  ;;  %v3112_v7 = vld [vmem:[%s4058_s1 + $0xf0] sm:$0xff]  ;;  %v3111_v11 = vld [vmem:[%s4058_s1 + $0xe8] sm:$0xff] }
   0x5   :  { %1732 = vmatpush.bf16.msra.mxu3 %v3113_v3  ;;  %v3086_v12 = vld [vmem:[%s4058_s1 + $0x20] sm:$0xff]  ;;  %v3085_v16 = vld [vmem:[%s4058_s1 + $0x18] sm:$0xff]  ;;  %v3084_v21 = vld [vmem:[%s4058_s1 + $0x10] sm:$0xff] }
   0x6   :  { %1694 = vmatpush.bf16.msra.mxu0 %v3088_v4  ;;  %v3102_v13 = vld [vmem:[%s4058_s1 + $0xa0] sm:$0xff]  ;;  %v3101_v17 = vld [vmem:[%s4058_s1 + $0x98] sm:$0xff]  ;;  %v3100_v22 = vld [vmem:[%s4058_s1 + $0x90] sm:$0xff] }
   0x7   :  { %1720 = vmatpush.bf16.msra.mxu2 %v3104_v5  ;;  %v3094_v14 = vld [vmem:[%s4058_s1 + $0x60] sm:$0xff]  ;;  %v3093_v18 = vld [vmem:[%s4058_s1 + $0x58] sm:$0xff]  ;;  %v3092_v23 = vld [vmem:[%s4058_s1 + $0x50] sm:$0xff] }
   0x8   :  { %1707 = vmatpush.bf16.msra.mxu1 %v3096_v6  ;;  %v3110_v15 = vld [vmem:[%s4058_s1 + $0xe0] sm:$0xff]  ;;  %v3109_v19 = vld [vmem:[%s4058_s1 + $0xd8] sm:$0xff]  ;;  %v3108_v24 = vld [vmem:[%s4058_s1 + $0xd0] sm:$0xff] }
   0x9   :  { %1733 = vmatpush.bf16.msra.mxu3 %v3112_v7  ;;  %v27_v20 = vld [vmem:[%s4057_s0] sm:$0xff] }
   0xa   :  { %1695 = vmatpush.bf16.msra.mxu0 %v3087_v8  ;;  %436 = vst [vmem:[#allocation1] ss:$9 sm:$0xff] %v27_v20 }
   0xb   :  { %1721 = vmatpush.bf16.msra.mxu2 %v3103_v9 }
   0xc   :  { %1708 = vmatpush.bf16.msra.mxu1 %v3095_v10 }
   0xd   :  { %1734 = vmatpush.bf16.msra.mxu3 %v3111_v11 }
   0xe   :  { %1696 = vmatpush.bf16.msra.mxu0 %v3086_v12 }
   0xf   :  { %1722 = vmatpush.bf16.msra.mxu2 %v3102_v13 }
  0x10   :  { %1709 = vmatpush.bf16.msra.mxu1 %v3094_v14 }
  0x11   :  { %1735 = vmatpush.bf16.msra.mxu3 %v3110_v15 }
  0x12   :  { %1697 = vmatpush.bf16.msra.mxu0 %v3085_v16 }
  0x13   :  { %1723 = vmatpush.bf16.msra.mxu2 %v3101_v17 }
  0x14   :  { %1710 = vmatpush.bf16.msra.mxu1 %v3093_v18 }
  0x15   :  { %1736 = vmatpush.bf16.msra.mxu3 %v3109_v19 }
  0x16   :  { %12 = vsyncpa [#allocation3], 0  ;;  %1698 = vmatpush.bf16.msra.mxu0 %v3084_v21  ;;  %v3083_v25 = vld [vmem:[%s4058_s1 + $0x8] sm:$0xff]  ;;  %v3082_v29 = vld [vmem:[%s4058_s1] sm:$0xff]  ;;  %vm2188_vm1 = vcmask 1041408   ;;  %s2209_s24 = sshll.u32 %s4064_s7, 4  ;;  %s2210_s24 = int_to_ptr.hbm [resolvable:$true] %s2209_s24 }
  0x17   :  { %1724 = vmatpush.bf16.msra.mxu2 %v3100_v22  ;;  %v3099_v26 = vld [vmem:[%s4058_s1 + $0x88] sm:$0xff]  ;;  %v3098_v30 = vld [vmem:[%s4058_s1 + $0x80] sm:$0xff]  ;;  %v3121_v31 = vld [vmem:[%s4058_s1 + $0x138] sm:$0xff] }
  0x18   :  { %1711 = vmatpush.bf16.msra.mxu1 %v3092_v23  ;;  %v3091_v27 = vld [vmem:[%s4058_s1 + $0x48] sm:$0xff]  ;;  %v3137_v32 = vld [vmem:[%s4058_s1 + $0x1b8] sm:$0xff]  ;;  %v3090_v33 = vld [vmem:[%s4058_s1 + $0x40] sm:$0xff] }
  0x19   :  { %1737 = vmatpush.bf16.msra.mxu3 %v3108_v24  ;;  %v3107_v28 = vld [vmem:[%s4058_s1 + $0xc8] sm:$0xff]  ;;  %v3106_v34 = vld [vmem:[%s4058_s1 + $0xc0] sm:$0xff]  ;;  %v3129_v35 = vld [vmem:[%s4058_s1 + $0x178] sm:$0xff] }
  0x1a   :  { %1699 = vmatpush.bf16.msra.mxu0 %v3083_v25  ;;  %v3145_v36 = vld [vmem:[%s4058_s1 + $0x1f8] sm:$0xff]  ;;  %v3120_v37 = vld [vmem:[%s4058_s1 + $0x130] sm:$0xff]  ;;  %v437_v40 = vld [vmem:[#allocation1] sm:$0xff] }
  0x1b   :  { %1725 = vmatpush.bf16.msra.mxu2 %v3099_v26  ;;  %v3136_v38 = vld [vmem:[%s4058_s1 + $0x1b0] sm:$0xff]  ;;  %v440_v43 = vld [vmem:[#allocation1 + $0x1b] sm:$0xff]  ;;  %v3119_v45 = vld [vmem:[%s4058_s1 + $0x128] sm:$0xff] }
  0x1c   :  { %1712 = vmatpush.bf16.msra.mxu1 %v3091_v27  ;;  %v439_v39 = vld [vmem:[#allocation1 + $0x12] sm:$0xff]  ;;  %v438_v44 = vld [vmem:[#allocation1 + $0x9] sm:$0xff]  ;;  %v3506_v49 = vld [vmem:[#allocation1 + $0x3f] sm:$0xff] }
  0x1d   :  { %1738 = vmatpush.bf16.msra.mxu3 %v3107_v28  ;;  %v3128_v41 = vld [vmem:[%s4058_s1 + $0x170] sm:$0xff]  ;;  %v3135_v46 = vld [vmem:[%s4058_s1 + $0x1a8] sm:$0xff]  ;;  %v3118_v54 = vld [vmem:[%s4058_s1 + $0x120] sm:$0xff] }
  0x1e   :  { %1700 = vmatpush.bf16.msra.mxu0 %v3082_v29  ;;  %v3144_v42 = vld [vmem:[%s4058_s1 + $0x1f0] sm:$0xff]  ;;  %v3504_v48 = vld [vmem:[#allocation1 + $0x24] sm:$0xff]  ;;  %v3117_v58 = vld [vmem:[%s4058_s1 + $0x118] sm:$0xff] }
  0x1f   :  { %1726 = vmatpush.bf16.msra.mxu2 %v3098_v30  ;;  %v3502_v47 = vld [vmem:[#allocation1 + $0x36] sm:$0xff]  ;;  %v28_v50 = vld [vmem:[%s4057_s0 + $0x8] sm:$0xff]  ;;  %v3134_v55 = vld [vmem:[%s4058_s1 + $0x1a0] sm:$0xff] }
  0x20   :  { %1713 = vmatpush.bf16.msra.mxu1 %v3090_v33  ;;  %v3511_v51 = vld [vmem:[#allocation1 + $0x2d] sm:$0xff]  ;;  %v3126_v56 = vld [vmem:[%s4058_s1 + $0x160] sm:$0xff]  ;;  %v3133_v59 = vld [vmem:[%s4058_s1 + $0x198] sm:$0xff] }
  0x21   :  { %1739 = vmatpush.bf16.msra.mxu3 %v3106_v34  ;;  %1701 = vmatmul.bf16.vlgmr.msra.gmra.mxu0 %v437_v40  ;;  %v3127_v52 = vld [vmem:[%s4058_s1 + $0x168] sm:$0xff]  ;;  %446 = vst [vmem:[#allocation1] ss:$9 sm:$0xff] %v28_v50  ;;  %v3142_v57 = vld [vmem:[%s4058_s1 + $0x1e0] sm:$0xff]  ;;  %v3125_v60 = vld [vmem:[%s4058_s1 + $0x158] sm:$0xff] }
  0x22   :  { %1745 = vmatpush.bf16.msrb.mxu0 %v3121_v31  ;;  %1727 = vmatmul.bf16.vlgmr.msra.gmra.mxu2 %v439_v39  ;;  %v3143_v53 = vld [vmem:[%s4058_s1 + $0x1e8] sm:$0xff]  ;;  %v3141_v61 = vld [vmem:[%s4058_s1 + $0x1d8] sm:$0xff]  ;;  %v3116_v62 = vld [vmem:[%s4058_s1 + $0x110] sm:$0xff] }
  0x23   :  { %1771 = vmatpush.bf16.msrb.mxu2 %v3137_v32  ;;  %1714 = vmatmul.bf16.vlgmr.msra.gmra.mxu1 %v438_v44  ;;  %v3132_v63 = vld [vmem:[%s4058_s1 + $0x190] sm:$0xff]  ;;  %v3115_v2 = vld [vmem:[%s4058_s1 + $0x108] sm:$0xff]  ;;  %v3114_v6 = vld [vmem:[%s4058_s1 + $0x100] sm:$0xff] }
  0x24   :  { %1758 = vmatpush.bf16.msrb.mxu1 %v3129_v35  ;;  %1740 = vmatmul.bf16.vlgmr.msra.gmra.mxu3 %v440_v43  ;;  %v3124_v0 = vld [vmem:[%s4058_s1 + $0x150] sm:$0xff]  ;;  %v3131_v3 = vld [vmem:[%s4058_s1 + $0x188] sm:$0xff]  ;;  %v3130_v7 = vld [vmem:[%s4058_s1 + $0x180] sm:$0xff] }
  0x25   :  { %1784 = vmatpush.bf16.msrb.mxu3 %v3145_v36  ;;  %v3140_v1 = vld [vmem:[%s4058_s1 + $0x1d0] sm:$0xff]  ;;  %v3123_v4 = vld [vmem:[%s4058_s1 + $0x148] sm:$0xff]  ;;  %v3153_v8 = vld [vmem:[%s4058_s1 + $0x238] sm:$0xff] }
  0x26   :  { %1746 = vmatpush.bf16.msrb.mxu0 %v3120_v37  ;;  %v3139_v5 = vld [vmem:[%s4058_s1 + $0x1c8] sm:$0xff]  ;;  %v3169_v9 = vld [vmem:[%s4058_s1 + $0x2b8] sm:$0xff]  ;;  %v3122_v10 = vld [vmem:[%s4058_s1 + $0x140] sm:$0xff] }
  0x27   :  { %1772 = vmatpush.bf16.msrb.mxu2 %v3136_v38  ;;  %v3138_v11 = vld [vmem:[%s4058_s1 + $0x1c0] sm:$0xff]  ;;  %v3161_v12 = vld [vmem:[%s4058_s1 + $0x278] sm:$0xff]  ;;  %v3152_v14 = vld [vmem:[%s4058_s1 + $0x230] sm:$0xff] }
  0x28   :  { %1759 = vmatpush.bf16.msrb.mxu1 %v3128_v41  ;;  %v3177_v13 = vld [vmem:[%s4058_s1 + $0x2f8] sm:$0xff]  ;;  %v3168_v15 = vld [vmem:[%s4058_s1 + $0x2b0] sm:$0xff]  ;;  %v3151_v18 = vld [vmem:[%s4058_s1 + $0x228] sm:$0xff] }
  0x29   :  { %1785 = vmatpush.bf16.msrb.mxu3 %v3144_v42  ;;  %v3160_v16 = vld [vmem:[%s4058_s1 + $0x270] sm:$0xff]  ;;  %v3167_v19 = vld [vmem:[%s4058_s1 + $0x2a8] sm:$0xff]  ;;  %v3150_v22 = vld [vmem:[%s4058_s1 + $0x220] sm:$0xff] }
  0x2a   :  { %1747 = vmatpush.bf16.msrb.mxu0 %v3119_v45  ;;  %v3176_v17 = vld [vmem:[%s4058_s1 + $0x2f0] sm:$0xff]  ;;  %v3159_v20 = vld [vmem:[%s4058_s1 + $0x268] sm:$0xff]  ;;  %v3166_v23 = vld [vmem:[%s4058_s1 + $0x2a0] sm:$0xff] }
  0x2b   :  { %1773 = vmatpush.bf16.msrb.mxu2 %v3135_v46  ;;  %v3175_v21 = vld [vmem:[%s4058_s1 + $0x2e8] sm:$0xff]  ;;  %v3158_v24 = vld [vmem:[%s4058_s1 + $0x260] sm:$0xff]  ;;  %v3149_v26 = vld [vmem:[%s4058_s1 + $0x218] sm:$0xff] }
  0x2c   :  { %1760 = vmatpush.bf16.msrb.mxu1 %v3127_v52  ;;  %v3174_v25 = vld [vmem:[%s4058_s1 + $0x2e0] sm:$0xff]  ;;  %v3165_v27 = vld [vmem:[%s4058_s1 + $0x298] sm:$0xff]  ;;  %v3148_v30 = vld [vmem:[%s4058_s1 + $0x210] sm:$0xff] }
  0x2d   :  { %1786 = vmatpush.bf16.msrb.mxu3 %v3143_v53  ;;  %v3157_v28 = vld [vmem:[%s4058_s1 + $0x258] sm:$0xff]  ;;  %v3164_v31 = vld [vmem:[%s4058_s1 + $0x290] sm:$0xff]  ;;  %v3147_v34 = vld [vmem:[%s4058_s1 + $0x208] sm:$0xff] }
  0x2e   :  { %1748 = vmatpush.bf16.msrb.mxu0 %v3118_v54  ;;  %v3173_v29 = vld [vmem:[%s4058_s1 + $0x2d8] sm:$0xff]  ;;  %v3156_v32 = vld [vmem:[%s4058_s1 + $0x250] sm:$0xff]  ;;  %v3163_v35 = vld [vmem:[%s4058_s1 + $0x288] sm:$0xff] }
  0x2f   :  { %1774 = vmatpush.bf16.msrb.mxu2 %v3134_v55  ;;  %v3172_v33 = vld [vmem:[%s4058_s1 + $0x2d0] sm:$0xff]  ;;  %v3155_v36 = vld [vmem:[%s4058_s1 + $0x248] sm:$0xff]  ;;  %v3146_v38 = vld [vmem:[%s4058_s1 + $0x200] sm:$0xff] }
  0x30   :  { %1761 = vmatpush.bf16.msrb.mxu1 %v3126_v56  ;;  %v3171_v37 = vld [vmem:[%s4058_s1 + $0x2c8] sm:$0xff]  ;;  %v3162_v39 = vld [vmem:[%s4058_s1 + $0x280] sm:$0xff]  ;;  %v3185_v40 = vld [vmem:[%s4058_s1 + $0x338] sm:$0xff] }
  0x31   :  { %1787 = vmatpush.bf16.msrb.mxu3 %v3142_v57  ;;  %v3201_v41 = vld [vmem:[%s4058_s1 + $0x3b8] sm:$0xff]  ;;  %v3154_v42 = vld [vmem:[%s4058_s1 + $0x240] sm:$0xff]  ;;  %v3184_v50 = vld [vmem:[%s4058_s1 + $0x330] sm:$0xff] }
  0x32   :  { %1749 = vmatpush.bf16.msrb.mxu0 %v3117_v58  ;;  %v3170_v43 = vld [vmem:[%s4058_s1 + $0x2c0] sm:$0xff]  ;;  %v3193_v44 = vld [vmem:[%s4058_s1 + $0x378] sm:$0xff]  ;;  %v3192_v52 = vld [vmem:[%s4058_s1 + $0x370] sm:$0xff] }
  0x33   :  { %1775 = vmatpush.bf16.msrb.mxu2 %v3133_v59  ;;  %v447_v45 = vld [vmem:[#allocation1] sm:$0xff]  ;;  %v449_v46 = vld [vmem:[#allocation1 + $0x12] sm:$0xff]  ;;  %v3183_v54 = vld [vmem:[%s4058_s1 + $0x328] sm:$0xff] }
  0x34   :  { %1762 = vmatpush.bf16.msrb.mxu1 %v3125_v60  ;;  %v3208_v53 = vld [vmem:[%s4058_s1 + $0x3f0] sm:$0xff]  ;;  %v3199_v55 = vld [vmem:[%s4058_s1 + $0x3a8] sm:$0xff]  ;;  %v3182_v58 = vld [vmem:[%s4058_s1 + $0x320] sm:$0xff] }
  0x35   :  { %1788 = vmatpush.bf16.msrb.mxu3 %v3141_v61  ;;  %v3191_v56 = vld [vmem:[%s4058_s1 + $0x368] sm:$0xff]  ;;  %v3198_v59 = vld [vmem:[%s4058_s1 + $0x3a0] sm:$0xff] }
  0x36   :  { %1750 = vmatpush.bf16.msrb.mxu0 %v3116_v62  ;;  %v3207_v57 = vld [vmem:[%s4058_s1 + $0x3e8] sm:$0xff]  ;;  %v3190_v60 = vld [vmem:[%s4058_s1 + $0x360] sm:$0xff]  ;;  %v3181_v62 = vld [vmem:[%s4058_s1 + $0x318] sm:$0xff] }
  0x37   :  { %1776 = vmatpush.bf16.msrb.mxu2 %v3132_v63  ;;  %v3206_v61 = vld [vmem:[%s4058_s1 + $0x3e0] sm:$0xff]  ;;  %v3197_v63 = vld [vmem:[%s4058_s1 + $0x398] sm:$0xff] }
  0x38   :  { %1763 = vmatpush.bf16.msrb.mxu1 %v3124_v0  ;;  %v3189_v0 = vld [vmem:[%s4058_s1 + $0x358] sm:$0xff] }
  0x39   :  { %1789 = vmatpush.bf16.msrb.mxu3 %v3140_v1  ;;  %v3205_v1 = vld [vmem:[%s4058_s1 + $0x3d8] sm:$0xff] }
  0x3a   :  { %1751 = vmatpush.bf16.msrb.mxu0 %v3115_v2  ;;  %v3180_v2 = vld [vmem:[%s4058_s1 + $0x310] sm:$0xff] }
  0x3b   :  { %1777 = vmatpush.bf16.msrb.mxu2 %v3131_v3  ;;  %v3196_v3 = vld [vmem:[%s4058_s1 + $0x390] sm:$0xff] }
  0x3c   :  { %1764 = vmatpush.bf16.msrb.mxu1 %v3123_v4  ;;  %v3188_v4 = vld [vmem:[%s4058_s1 + $0x350] sm:$0xff] }
  0x3d   :  { %1790 = vmatpush.bf16.msrb.mxu3 %v3139_v5  ;;  %v3204_v5 = vld [vmem:[%s4058_s1 + $0x3d0] sm:$0xff] }
  0x3e   :  { %1752 = vmatpush.bf16.msrb.mxu0 %v3114_v6  ;;  %v3179_v6 = vld [vmem:[%s4058_s1 + $0x308] sm:$0xff] }
  0x3f   :  { %1778 = vmatpush.bf16.msrb.mxu2 %v3130_v7  ;;  %v3195_v7 = vld [vmem:[%s4058_s1 + $0x388] sm:$0xff] }
  0x40   :  { %1765 = vmatpush.bf16.msrb.mxu1 %v3122_v10  ;;  %v452_v10 = vld [vmem:[#allocation1 + $0x2d] sm:$0xff] }
  0x41   :  { %1791 = vmatpush.bf16.msrb.mxu3 %v3138_v11  ;;  %1753 = vmatmul.bf16.vlgmr.msrb.gmra.mxu0 %v3504_v48  ;;  %v448_v48 = vld [vmem:[#allocation1 + $0x9] sm:$0xff]  ;;  %v454_v11 = vld [vmem:[#allocation1 + $0x3f] sm:$0xff] }
  0x42   :  { %1797 = vmatpush.bf16.msra.mxu0 %v3153_v8  ;;  %1779 = vmatmul.bf16.vlgmr.msrb.gmra.mxu2 %v3502_v47  ;;  %v3209_v47 = vld [vmem:[%s4058_s1 + $0x3f8] sm:$0xff]  ;;  %v451_v8 = vld [vmem:[#allocation1 + $0x24] sm:$0xff] }
  0x43   :  { %1823 = vmatpush.bf16.msra.mxu2 %v3169_v9  ;;  %1766 = vmatmul.bf16.vlgmr.msrb.gmra.mxu1 %v3511_v51  ;;  %v3200_v51 = vld [vmem:[%s4058_s1 + $0x3b0] sm:$0xff] }
  0x44   :  { %1810 = vmatpush.bf16.msra.mxu1 %v3161_v12  ;;  %1792 = vmatmul.bf16.vlgmr.msrb.gmra.mxu3 %v3506_v49  ;;  %v450_v49 = vld [vmem:[#allocation1 + $0x1b] sm:$0xff]  ;;  %v29_v12 = vld [vmem:[%s4057_s0 + $0x10] sm:$0xff] }
  0x45   :  { %1836 = vmatpush.bf16.msra.mxu3 %v3177_v13  ;;  %v453_v9 = vld [vmem:[#allocation1 + $0x36] sm:$0xff]  ;;  %v3187_v13 = vld [vmem:[%s4058_s1 + $0x348] sm:$0xff] }
  0x46   :  { %1798 = vmatpush.bf16.msra.mxu0 %v3152_v14  ;;  %456 = vst [vmem:[#allocation1] ss:$9 sm:$0xff] %v29_v12  ;;  %v3203_v14 = vld [vmem:[%s4058_s1 + $0x3c8] sm:$0xff]  ;;  %v3261_v12 = vld [vmem:[%s4058_s1 + $0x598] sm:$0xff] }
  0x47   :  { %1824 = vmatpush.bf16.msra.mxu2 %v3168_v15  ;;  %v3178_v15 = vld [vmem:[%s4058_s1 + $0x300] sm:$0xff] }
  0x48   :  { %1811 = vmatpush.bf16.msra.mxu1 %v3160_v16  ;;  %v3194_v16 = vld [vmem:[%s4058_s1 + $0x380] sm:$0xff] }
  0x49   :  { %1837 = vmatpush.bf16.msra.mxu3 %v3176_v17  ;;  %v3217_v17 = vld [vmem:[%s4058_s1 + $0x438] sm:$0xff] }
  0x4a   :  { %1799 = vmatpush.bf16.msra.mxu0 %v3151_v18  ;;  %v3233_v18 = vld [vmem:[%s4058_s1 + $0x4b8] sm:$0xff] }
  0x4b   :  { %1825 = vmatpush.bf16.msra.mxu2 %v3167_v19  ;;  %v3186_v19 = vld [vmem:[%s4058_s1 + $0x340] sm:$0xff] }
  0x4c   :  { %1812 = vmatpush.bf16.msra.mxu1 %v3159_v20  ;;  %v3202_v20 = vld [vmem:[%s4058_s1 + $0x3c0] sm:$0xff] }
  0x4d   :  { %1838 = vmatpush.bf16.msra.mxu3 %v3175_v21  ;;  %v3225_v21 = vld [vmem:[%s4058_s1 + $0x478] sm:$0xff] }
  0x4e   :  { %1800 = vmatpush.bf16.msra.mxu0 %v3150_v22  ;;  %v3241_v22 = vld [vmem:[%s4058_s1 + $0x4f8] sm:$0xff] }
  0x4f   :  { %1826 = vmatpush.bf16.msra.mxu2 %v3166_v23  ;;  %v3216_v23 = vld [vmem:[%s4058_s1 + $0x430] sm:$0xff] }
  0x50   :  { %1813 = vmatpush.bf16.msra.mxu1 %v3158_v24  ;;  %v3232_v24 = vld [vmem:[%s4058_s1 + $0x4b0] sm:$0xff] }
  0x51   :  { %1839 = vmatpush.bf16.msra.mxu3 %v3174_v25  ;;  %v3224_v25 = vld [vmem:[%s4058_s1 + $0x470] sm:$0xff] }
  0x52   :  { %1801 = vmatpush.bf16.msra.mxu0 %v3149_v26  ;;  %v3240_v26 = vld [vmem:[%s4058_s1 + $0x4f0] sm:$0xff] }
  0x53   :  { %1827 = vmatpush.bf16.msra.mxu2 %v3165_v27  ;;  %v3215_v27 = vld [vmem:[%s4058_s1 + $0x428] sm:$0xff] }
  0x54   :  { %1814 = vmatpush.bf16.msra.mxu1 %v3157_v28  ;;  %v3231_v28 = vld [vmem:[%s4058_s1 + $0x4a8] sm:$0xff] }
  0x55   :  { %1840 = vmatpush.bf16.msra.mxu3 %v3173_v29  ;;  %v3223_v29 = vld [vmem:[%s4058_s1 + $0x468] sm:$0xff] }
  0x56   :  { %1802 = vmatpush.bf16.msra.mxu0 %v3148_v30  ;;  %v3239_v30 = vld [vmem:[%s4058_s1 + $0x4e8] sm:$0xff] }
  0x57   :  { %1828 = vmatpush.bf16.msra.mxu2 %v3164_v31  ;;  %v3214_v31 = vld [vmem:[%s4058_s1 + $0x420] sm:$0xff] }
  0x58   :  { %1815 = vmatpush.bf16.msra.mxu1 %v3156_v32  ;;  %v3230_v32 = vld [vmem:[%s4058_s1 + $0x4a0] sm:$0xff] }
  0x59   :  { %1841 = vmatpush.bf16.msra.mxu3 %v3172_v33  ;;  %v3222_v33 = vld [vmem:[%s4058_s1 + $0x460] sm:$0xff] }
  0x5a   :  { %1803 = vmatpush.bf16.msra.mxu0 %v3147_v34  ;;  %v3238_v34 = vld [vmem:[%s4058_s1 + $0x4e0] sm:$0xff] }
  0x5b   :  { %1829 = vmatpush.bf16.msra.mxu2 %v3163_v35  ;;  %v3213_v35 = vld [vmem:[%s4058_s1 + $0x418] sm:$0xff] }
  0x5c   :  { %1816 = vmatpush.bf16.msra.mxu1 %v3155_v36  ;;  %v3229_v36 = vld [vmem:[%s4058_s1 + $0x498] sm:$0xff] }
  0x5d   :  { %1842 = vmatpush.bf16.msra.mxu3 %v3171_v37  ;;  %v3221_v37 = vld [vmem:[%s4058_s1 + $0x458] sm:$0xff] }
  0x5e   :  { %1804 = vmatpush.bf16.msra.mxu0 %v3146_v38  ;;  %v3237_v38 = vld [vmem:[%s4058_s1 + $0x4d8] sm:$0xff] }
  0x5f   :  { %1830 = vmatpush.bf16.msra.mxu2 %v3162_v39  ;;  %v3212_v39 = vld [vmem:[%s4058_s1 + $0x410] sm:$0xff] }
  0x60   :  { %1817 = vmatpush.bf16.msra.mxu1 %v3154_v42  ;;  %v3236_v42 = vld [vmem:[%s4058_s1 + $0x4d0] sm:$0xff] }
  0x61   :  { %1843 = vmatpush.bf16.msra.mxu3 %v3170_v43  ;;  %1805 = vmatmul.bf16.vlgmr.msra.gmra.mxu0 %v447_v45  ;;  %v3211_v43 = vld [vmem:[%s4058_s1 + $0x408] sm:$0xff] }
  0x62   :  { %1849 = vmatpush.bf16.msrb.mxu0 %v3185_v40  ;;  %1831 = vmatmul.bf16.vlgmr.msra.gmra.mxu2 %v449_v46  ;;  %v3228_v40 = vld [vmem:[%s4058_s1 + $0x490] sm:$0xff]  ;;  %v3219_v45 = vld [vmem:[%s4058_s1 + $0x448] sm:$0xff] }
  0x63   :  { %1875 = vmatpush.bf16.msrb.mxu2 %v3201_v41  ;;  %1818 = vmatmul.bf16.vlgmr.msra.gmra.mxu1 %v448_v48  ;;  %v3220_v41 = vld [vmem:[%s4058_s1 + $0x450] sm:$0xff]  ;;  %v3235_v46 = vld [vmem:[%s4058_s1 + $0x4c8] sm:$0xff]  ;;  %v3226_v48 = vld [vmem:[%s4058_s1 + $0x480] sm:$0xff] }
  0x64   :  { %1862 = vmatpush.bf16.msrb.mxu1 %v3193_v44  ;;  %1844 = vmatmul.bf16.vlgmr.msra.gmra.mxu3 %v450_v49  ;;  %v3227_v44 = vld [vmem:[%s4058_s1 + $0x488] sm:$0xff]  ;;  %v3249_v49 = vld [vmem:[%s4058_s1 + $0x538] sm:$0xff] }
  0x65   :  { %1888 = vmatpush.bf16.msrb.mxu3 %v3209_v47  ;;  %v3210_v47 = vld [vmem:[%s4058_s1 + $0x400] sm:$0xff] }
  0x66   :  { %1850 = vmatpush.bf16.msrb.mxu0 %v3184_v50  ;;  %v3265_v50 = vld [vmem:[%s4058_s1 + $0x5b8] sm:$0xff] }
  0x67   :  { %1876 = vmatpush.bf16.msrb.mxu2 %v3200_v51  ;;  %v3218_v51 = vld [vmem:[%s4058_s1 + $0x440] sm:$0xff] }
  0x68   :  { %1863 = vmatpush.bf16.msrb.mxu1 %v3192_v52  ;;  %v3234_v52 = vld [vmem:[%s4058_s1 + $0x4c0] sm:$0xff] }
  0x69   :  { %1889 = vmatpush.bf16.msrb.mxu3 %v3208_v53  ;;  %v3257_v53 = vld [vmem:[%s4058_s1 + $0x578] sm:$0xff] }
  0x6a   :  { %1851 = vmatpush.bf16.msrb.mxu0 %v3183_v54  ;;  %v457_v54 = vld [vmem:[#allocation1] sm:$0xff] }
  0x6b   :  { %1877 = vmatpush.bf16.msrb.mxu2 %v3199_v55  ;;  %v459_v55 = vld [vmem:[#allocation1 + $0x12] sm:$0xff] }
  0x6c   :  { %1864 = vmatpush.bf16.msrb.mxu1 %v3191_v56  ;;  %v3273_v56 = vld [vmem:[%s4058_s1 + $0x5f8] sm:$0xff] }
  0x6d   :  { %1890 = vmatpush.bf16.msrb.mxu3 %v3207_v57  ;;  %v458_v57 = vld [vmem:[#allocation1 + $0x9] sm:$0xff] }
  0x6e   :  { %1852 = vmatpush.bf16.msrb.mxu0 %v3182_v58  ;;  %v460_v58 = vld [vmem:[#allocation1 + $0x1b] sm:$0xff] }
  0x6f   :  { %1878 = vmatpush.bf16.msrb.mxu2 %v3198_v59  ;;  %v3248_v59 = vld [vmem:[%s4058_s1 + $0x530] sm:$0xff] }
  0x70   :  { %1865 = vmatpush.bf16.msrb.mxu1 %v3190_v60  ;;  %v3264_v60 = vld [vmem:[%s4058_s1 + $0x5b0] sm:$0xff] }
  0x71   :  { %1891 = vmatpush.bf16.msrb.mxu3 %v3206_v61  ;;  %v3256_v61 = vld [vmem:[%s4058_s1 + $0x570] sm:$0xff] }
  0x72   :  { %1853 = vmatpush.bf16.msrb.mxu0 %v3181_v62  ;;  %v3272_v62 = vld [vmem:[%s4058_s1 + $0x5f0] sm:$0xff] }
  0x73   :  { %1879 = vmatpush.bf16.msrb.mxu2 %v3197_v63  ;;  %v3247_v63 = vld [vmem:[%s4058_s1 + $0x528] sm:$0xff] }
  0x74   :  { %1866 = vmatpush.bf16.msrb.mxu1 %v3189_v0  ;;  %v3263_v0 = vld [vmem:[%s4058_s1 + $0x5a8] sm:$0xff] }
  0x75   :  { %1892 = vmatpush.bf16.msrb.mxu3 %v3205_v1  ;;  %v3255_v1 = vld [vmem:[%s4058_s1 + $0x568] sm:$0xff] }
  0x76   :  { %1854 = vmatpush.bf16.msrb.mxu0 %v3180_v2  ;;  %v3271_v2 = vld [vmem:[%s4058_s1 + $0x5e8] sm:$0xff] }
  0x77   :  { %1880 = vmatpush.bf16.msrb.mxu2 %v3196_v3  ;;  %v3299_v3 = vld [vmem:[%s4059_s2] ss:$0 sm:$0xff] }
  0x78   :  { %1867 = vmatpush.bf16.msrb.mxu1 %v3188_v4  ;;  %v3246_v4 = vld [vmem:[%s4058_s1 + $0x520] sm:$0xff] }
  0x79   :  { %1893 = vmatpush.bf16.msrb.mxu3 %v3204_v5  ;;  %v3262_v5 = vld [vmem:[%s4058_s1 + $0x5a0] sm:$0xff] }
  0x7a   :  { %1855 = vmatpush.bf16.msrb.mxu0 %v3179_v6 }
  0x7b   :  { %1881 = vmatpush.bf16.msrb.mxu2 %v3195_v7  ;;  %v3254_v7 = vld [vmem:[%s4058_s1 + $0x560] sm:$0xff] }
  0x7c   :  { %1868 = vmatpush.bf16.msrb.mxu1 %v3187_v13 }
  0x7d   :  { %1894 = vmatpush.bf16.msrb.mxu3 %v3203_v14  ;;  %v3253_v14 = vld [vmem:[%s4058_s1 + $0x558] sm:$0xff] }
  0x7e   :  { %1856 = vmatpush.bf16.msrb.mxu0 %v3178_v15  ;;  %v3269_v15 = vld [vmem:[%s4058_s1 + $0x5d8] sm:$0xff] }
  0x7f   :  { %1882 = vmatpush.bf16.msrb.mxu2 %v3194_v16 }
  0x80   :  { %1869 = vmatpush.bf16.msrb.mxu1 %v3186_v19 }
  0x81   :  { %1895 = vmatpush.bf16.msrb.mxu3 %v3202_v20  ;;  %1857 = vmatmul.bf16.vlgmr.msrb.gmra.mxu0 %v451_v8  ;;  %v3270_v8 = vld [vmem:[%s4058_s1 + $0x5e0] sm:$0xff] }
  0x82   :  { %1901 = vmatpush.bf16.msra.mxu0 %v3217_v17  ;;  %1883 = vmatmul.bf16.vlgmr.msrb.gmra.mxu2 %v453_v9  ;;  %v3244_v17 = vld [vmem:[%s4058_s1 + $0x510] sm:$0xff] }
  0x83   :  { %1927 = vmatpush.bf16.msra.mxu2 %v3233_v18  ;;  %1870 = vmatmul.bf16.vlgmr.msrb.gmra.mxu1 %v452_v10  ;;  %v3260_v18 = vld [vmem:[%s4058_s1 + $0x590] sm:$0xff] }
  0x84   :  { %1914 = vmatpush.bf16.msra.mxu1 %v3225_v21  ;;  %1896 = vmatmul.bf16.vlgmr.msrb.gmra.mxu3 %v454_v11  ;;  %v3245_v11 = vld [vmem:[%s4058_s1 + $0x518] sm:$0xff] }
  0x85   :  { %1940 = vmatpush.bf16.msra.mxu3 %v3241_v22  ;;  %v3252_v22 = vld [vmem:[%s4058_s1 + $0x550] sm:$0xff] }
  0x86   :  { %1902 = vmatpush.bf16.msra.mxu0 %v3216_v23  ;;  %v3268_v23 = vld [vmem:[%s4058_s1 + $0x5d0] sm:$0xff] }
  0x87   :  { %1928 = vmatpush.bf16.msra.mxu2 %v3232_v24  ;;  %v3243_v24 = vld [vmem:[%s4058_s1 + $0x508] sm:$0xff] }
  0x88   :  { %1915 = vmatpush.bf16.msra.mxu1 %v3224_v25 }
  0x89   :  { %1941 = vmatpush.bf16.msra.mxu3 %v3240_v26  ;;  %v3259_v26 = vld [vmem:[%s4058_s1 + $0x588] sm:$0xff] }
  0x8a   :  { %1903 = vmatpush.bf16.msra.mxu0 %v3215_v27  ;;  %v461_v27 = vld [vmem:[#allocation1 + $0x24] sm:$0xff] }
  0x8b   :  { %1929 = vmatpush.bf16.msra.mxu2 %v3231_v28  ;;  %v463_v28 = vld [vmem:[#allocation1 + $0x36] sm:$0xff] }
  0x8c   :  { %1916 = vmatpush.bf16.msra.mxu1 %v3223_v29 }
  0x8d   :  { %1942 = vmatpush.bf16.msra.mxu3 %v3239_v30  ;;  %v462_v30 = vld [vmem:[#allocation1 + $0x2d] sm:$0xff] }
  0x8e   :  { %1904 = vmatpush.bf16.msra.mxu0 %v3214_v31  ;;  %v464_v31 = vld [vmem:[#allocation1 + $0x3f] sm:$0xff] }
  0x8f   :  { %1930 = vmatpush.bf16.msra.mxu2 %v3230_v32  ;;  %v30_v32 = vld [vmem:[%s4057_s0 + $0x18] sm:$0x1] }
  0x90   :  { %1917 = vmatpush.bf16.msra.mxu1 %v3222_v33  ;;  %466 = vst [vmem:[#allocation1] ss:$9 sm:$0xff] %v30_v32  ;;  %v3251_v33 = vld [vmem:[%s4058_s1 + $0x548] sm:$0xff] }
  0x91   :  { %1943 = vmatpush.bf16.msra.mxu3 %v3238_v34  ;;  %v3267_v34 = vld [vmem:[%s4058_s1 + $0x5c8] sm:$0xff] }
  0x92   :  { %1905 = vmatpush.bf16.msra.mxu0 %v3213_v35 }
  0x93   :  { %1931 = vmatpush.bf16.msra.mxu2 %v3229_v36  ;;  %v3242_v36 = vld [vmem:[%s4058_s1 + $0x500] sm:$0xff] }
  0x94   :  { %1918 = vmatpush.bf16.msra.mxu1 %v3221_v37  ;;  %v3258_v37 = vld [vmem:[%s4058_s1 + $0x580] sm:$0xff] }
  0x95   :  { %1944 = vmatpush.bf16.msra.mxu3 %v3237_v38  ;;  %v3281_v38 = vld [vmem:[%s4058_s1 + $0x638] sm:$0xff] }
  0x96   :  { %1906 = vmatpush.bf16.msra.mxu0 %v3212_v39 }
  0x97   :  { %1932 = vmatpush.bf16.msra.mxu2 %v3228_v40  ;;  %v3250_v40 = vld [vmem:[%s4058_s1 + $0x540] sm:$0xff] }
  0x98   :  { %1919 = vmatpush.bf16.msra.mxu1 %v3220_v41  ;;  %v3266_v41 = vld [vmem:[%s4058_s1 + $0x5c0] sm:$0xff] }
  0x99   :  { %1945 = vmatpush.bf16.msra.mxu3 %v3236_v42  ;;  %v3280_v42 = vld [vmem:[%s4058_s1 + $0x630] sm:$0xff] }
  0x9a   :  { %1907 = vmatpush.bf16.msra.mxu0 %v3211_v43  ;;  %v3279_v43 = vld [vmem:[%s4058_s1 + $0x628] sm:$0xff] }
  0x9b   :  { %1933 = vmatpush.bf16.msra.mxu2 %v3227_v44  ;;  %v3278_v44 = vld [vmem:[%s4058_s1 + $0x620] sm:$0xff] }
  0x9c   :  { %1920 = vmatpush.bf16.msra.mxu1 %v3219_v45 }
  0x9d   :  { %1946 = vmatpush.bf16.msra.mxu3 %v3235_v46 }
  0x9e   :  { %1908 = vmatpush.bf16.msra.mxu0 %v3210_v47  ;;  %v1702_v6 = vpop.f32.mrf.mxu0 }
  0x9f   :  { %1934 = vmatpush.bf16.msra.mxu2 %v3226_v48  ;;  %v1703_v9 = vadd.f32 %v3299_v3, %v1702_v6 }
  0xa0   :  { %1921 = vmatpush.bf16.msra.mxu1 %v3218_v51  ;;  %v1715_v10 = vpop.f32.mrf.mxu1 }
  0xa1   :  { %1947 = vmatpush.bf16.msra.mxu3 %v3234_v52  ;;  %1909 = vmatmul.bf16.vlgmr.msra.gmra.mxu0 %v457_v54  ;;  %v1716_v13 = vadd.f32 %v1715_v10, %v1703_v9  ;;  %v3276_v52 = vld [vmem:[%s4058_s1 + $0x610] sm:$0xff] }
  0xa2   :  { %1953 = vmatpush.bf16.msrb.mxu0 %v3249_v49  ;;  %1935 = vmatmul.bf16.vlgmr.msra.gmra.mxu2 %v459_v55  ;;  %v3277_v49 = vld [vmem:[%s4058_s1 + $0x618] sm:$0xff] }
  0xa3   :  { %1979 = vmatpush.bf16.msrb.mxu2 %v3265_v50  ;;  %1922 = vmatmul.bf16.vlgmr.msra.gmra.mxu1 %v458_v57  ;;  %v3275_v57 = vld [vmem:[%s4058_s1 + $0x608] sm:$0xff] }
  0xa4   :  { %1966 = vmatpush.bf16.msrb.mxu1 %v3257_v53  ;;  %1948 = vmatmul.bf16.vlgmr.msra.gmra.mxu3 %v460_v58 }
  0xa5   :  { %1992 = vmatpush.bf16.msrb.mxu3 %v3273_v56  ;;  %v1728_v16 = vpop.f32.mrf.mxu2 }
  0xa6   :  { %1954 = vmatpush.bf16.msrb.mxu0 %v3248_v59  ;;  %v1729_v19 = vadd.f32 %v1728_v16, %v1716_v13  ;;  %v1704_v21 = vpop.f32.mrf.mxu0  ;;  %v3274_v59 = vld [vmem:[%s4058_s1 + $0x600] sm:$0xff] }
  0xa7   :  { %1980 = vmatpush.bf16.msrb.mxu2 %v3264_v60  ;;  %v1741_v20 = vpop.f32.mrf.mxu3 }
  0xa8   :  { %1967 = vmatpush.bf16.msrb.mxu1 %v3256_v61  ;;  %v1742_v25 = vadd.f32 %v1741_v20, %v1729_v19  ;;  %v1717_v29 = vpop.f32.mrf.mxu1  ;;  %v467_v61 = vld [vmem:[#allocation1] sm:$0xff] }
  0xa9   :  { %1993 = vmatpush.bf16.msrb.mxu3 %v3272_v62  ;;  %v3287_v29 = vld [vmem:[%s4060_s3 + $0x28] sm:$0xff] }
  0xaa   :  { %1955 = vmatpush.bf16.msrb.mxu0 %v3247_v63 }
  0xab   :  { %1981 = vmatpush.bf16.msrb.mxu2 %v3263_v0 }
  0xac   :  { %1968 = vmatpush.bf16.msrb.mxu1 %v3255_v1 }
  0xad   :  { %1994 = vmatpush.bf16.msrb.mxu3 %v3271_v2  ;;  %v1730_v35 = vpop.f32.mrf.mxu2 }
  0xae   :  { %1956 = vmatpush.bf16.msrb.mxu0 %v3246_v4  ;;  %v3284_v35 = vld [vmem:[%s4060_s3 + $0x10] sm:$0xff] }
  0xaf   :  { %1982 = vmatpush.bf16.msrb.mxu2 %v3262_v5  ;;  %v1743_v39 = vpop.f32.mrf.mxu3 }
  0xb0   :  { %1969 = vmatpush.bf16.msrb.mxu1 %v3254_v7 }
  0xb1   :  { %1995 = vmatpush.bf16.msrb.mxu3 %v3270_v8 }
  0xb2   :  { %1957 = vmatpush.bf16.msrb.mxu0 %v3245_v11 }
  0xb3   :  { %1983 = vmatpush.bf16.msrb.mxu2 %v3261_v12 }
  0xb4   :  { %1970 = vmatpush.bf16.msrb.mxu1 %v3253_v14 }
  0xb5   :  { %1996 = vmatpush.bf16.msrb.mxu3 %v3269_v15 }
  0xb6   :  { %1958 = vmatpush.bf16.msrb.mxu0 %v3244_v17 }
  0xb7   :  { %1984 = vmatpush.bf16.msrb.mxu2 %v3260_v18 }
  0xb8   :  { %1971 = vmatpush.bf16.msrb.mxu1 %v3252_v22 }
  0xb9   :  { %1997 = vmatpush.bf16.msrb.mxu3 %v3268_v23  ;;  %v3289_v23 = vld [vmem:[%s4060_s3 + $0x38] sm:$0xff] }
  0xba   :  { %1959 = vmatpush.bf16.msrb.mxu0 %v3243_v24 }
  0xbb   :  { %1985 = vmatpush.bf16.msrb.mxu2 %v3259_v26  ;;  %v3288_v26 = vld [vmem:[%s4060_s3 + $0x30] sm:$0xff] }
  0xbc   :  { %1972 = vmatpush.bf16.msrb.mxu1 %v3251_v33 }
  0xbd   :  { %1998 = vmatpush.bf16.msrb.mxu3 %v3267_v34  ;;  %v3285_v34 = vld [vmem:[%s4060_s3 + $0x18] sm:$0xff] }
  0xbe   :  { %1960 = vmatpush.bf16.msrb.mxu0 %v3242_v36  ;;  %v1754_v45 = vpop.f32.mrf.mxu0  ;;  %v3283_v36 = vld [vmem:[%s4060_s3 + $0x8] sm:$0xff] }
  0xbf   :  { %1986 = vmatpush.bf16.msrb.mxu2 %v3258_v37  ;;  %v1755_v46 = vadd.f32 %v1754_v45, %v1742_v25  ;;  %v3296_v45 = vld [vmem:[%s4062_s5 + $0x30] sm:$0xff] }
  0xc0   :  { %1973 = vmatpush.bf16.msrb.mxu1 %v3250_v40  ;;  %v1767_v47 = vpop.f32.mrf.mxu1 }
  0xc1   :  { %1999 = vmatpush.bf16.msrb.mxu3 %v3266_v41  ;;  %1961 = vmatmul.bf16.vlgmr.msrb.gmra.mxu0 %v461_v27  ;;  %v1768_v48 = vadd.f32 %v1767_v47, %v1755_v46  ;;  %v3297_v41 = vld [vmem:[%s4062_s5 + $0x38] sm:$0xff] }
  0xc2   :  { %2005 = vmatpush.bf16.msra.mxu0 %v3281_v38  ;;  %1987 = vmatmul.bf16.vlgmr.msrb.gmra.mxu2 %v463_v28  ;;  %v3282_v38 = vld [vmem:[%s4060_s3] sm:$0xff] }
  0xc3   :  { %1974 = vmatmul.bf16.vlgmr.msrb.gmra.mxu1 %v462_v30  ;;  %2171 = vmatpush.bf16.msra.mxu2 %v3297_v41 }
  0xc4   :  { %2000 = vmatmul.bf16.vlgmr.msrb.gmra.mxu3 %v464_v31  ;;  %2088 = vmatpush.bf16.msra.mxu1 %v3289_v23  ;;  %v3286_v31 = vld [vmem:[%s4060_s3 + $0x20] sm:$0xff] }
  0xc5   :  { %v1780_v50 = vpop.f32.mrf.mxu2 }
  0xc6   :  { %2006 = vmatpush.bf16.msra.mxu0 %v3280_v42  ;;  %v1781_v51 = vadd.f32 %v1780_v50, %v1768_v48  ;;  %v1756_v54 = vpop.f32.mrf.mxu0  ;;  %v3295_v48 = vld [vmem:[%s4062_s5 + $0x28] sm:$0xff] }
  0xc7   :  { %v1793_v53 = vpop.f32.mrf.mxu3  ;;  %2172 = vmatpush.bf16.msra.mxu2 %v3296_v45 }
  0xc8   :  { %v1794_v55 = vadd.f32 %v1793_v53, %v1781_v51  ;;  %v1769_v56 = vpop.f32.mrf.mxu1  ;;  %2089 = vmatpush.bf16.msra.mxu1 %v3288_v26 }
  0xca   :  { %2007 = vmatpush.bf16.msra.mxu0 %v3279_v43 }
  0xcb   :  { %2173 = vmatpush.bf16.msra.mxu2 %v3295_v48 }
  0xcc   :  { %2090 = vmatpush.bf16.msra.mxu1 %v3287_v29 }
  0xcd   :  { %v1782_v58 = vpop.f32.mrf.mxu2 }
  0xce   :  { %2008 = vmatpush.bf16.msra.mxu0 %v3278_v44 }
  0xcf   :  { %v1795_v60 = vpop.f32.mrf.mxu3 }
  0xd0   :  { %2091 = vmatpush.bf16.msra.mxu1 %v3286_v31 }
  0xd2   :  { %2009 = vmatpush.bf16.msra.mxu0 %v3277_v49 }
  0xd4   :  { %2092 = vmatpush.bf16.msra.mxu1 %v3285_v34 }
  0xd6   :  { %2010 = vmatpush.bf16.msra.mxu0 %v3276_v52  ;;  %v3294_v52 = vld [vmem:[%s4062_s5 + $0x20] sm:$0xff] }
  0xd7   :  { %2174 = vmatpush.bf16.msra.mxu2 %v3294_v52 }
  0xd8   :  { %2093 = vmatpush.bf16.msra.mxu1 %v3284_v35 }
  0xda   :  { %2011 = vmatpush.bf16.msra.mxu0 %v3275_v57  ;;  %v3292_v57 = vld [vmem:[%s4062_s5 + $0x10] sm:$0xff] }
  0xdc   :  { %2094 = vmatpush.bf16.msra.mxu1 %v3283_v36 }
  0xde   :  { %2012 = vmatpush.bf16.msra.mxu0 %v3274_v59  ;;  %v1806_v62 = vpop.f32.mrf.mxu0 }
  0xdf   :  { %v1807_v63 = vadd.f32 %v1806_v62, %v1794_v55  ;;  %v3293_v55 = vld [vmem:[%s4062_s5 + $0x18] sm:$0xff] }
  0xe0   :  { %v1819_v0 = vpop.f32.mrf.mxu1  ;;  %2095 = vmatpush.bf16.msra.mxu1 %v3282_v38  ;;  %2175 = vmatpush.bf16.msra.mxu2 %v3293_v55 }
  0xe1   :  { %2013 = vmatmul.bf16.vlgmr.msra.gmra.mxu0 %v467_v61  ;;  %v1820_v1 = vadd.f32 %v1819_v0, %v1807_v63 }
  0xe4   :  { %2176 = vmatpush.bf16.msra.mxu2 %v3292_v57 }
  0xe5   :  { %v1832_v2 = vpop.f32.mrf.mxu2 }
  0xe6   :  { %v1833_v3 = vadd.f32 %v1832_v2, %v1820_v1  ;;  %v1808_v5 = vpop.f32.mrf.mxu0  ;;  %v3291_v1 = vld [vmem:[%s4062_s5 + $0x8] sm:$0xff]  ;;  %v3290_v2 = vld [vmem:[%s4062_s5] sm:$0xff] }
  0xe7   :  { %v1845_v4 = vpop.f32.mrf.mxu3 }
  0xe8   :  { %v1846_v6 = vadd.f32 %v1845_v4, %v1833_v3  ;;  %v1821_v7 = vpop.f32.mrf.mxu1  ;;  %2177 = vmatpush.bf16.msra.mxu2 %v3291_v1  ;;  %v3300_v3 = vld [vmem:[%s4061_s4] ss:$0 sm:$0xff]  ;;  %s3332_s4 = smov [#allocation2]  }
  0xe9   :  { %s2207_s5 = sshll.u32 %s3332_s4, 4  ;;  %s2208_s5 = int_to_ptr.vmem [resolvable:$true] %s2207_s5 }
  0xec   :  { %2178 = vmatpush.bf16.msra.mxu2 %v3290_v2 }
  0xed   :  { %v1834_v8 = vpop.f32.mrf.mxu2 }
  0xef   :  { %v1847_v9 = vpop.f32.mrf.mxu3 }
  0xf0   :  { %v2184_v9 = vlaneseq }
  0xfe   :  { %v1858_v10 = vpop.f32.mrf.mxu0 }
  0xff   :  { %v1859_v11 = vadd.f32 %v1858_v10, %v1846_v6  ;;  %v2185_v10 = vand.u32 127, %v2184_v9 }
 0x100   :  { %v1871_v12 = vpop.f32.mrf.mxu1 }
 0x101   :  { %v1872_v13 = vadd.f32 %v1871_v12, %v1859_v11  ;;  %v3301_v11 = vld [vmem:[%s4063_s6] ss:$0 sm:$0xff]  ;;  %vm2186_vm0 = vcmp.lt.s32.totalorder %v2185_v10, 43 }
 0x105   :  { %v1884_v14 = vpop.f32.mrf.mxu2 }
 0x106   :  { %v1885_v15 = vadd.f32 %v1884_v14, %v1872_v13  ;;  %v1860_v17 = vpop.f32.mrf.mxu0 }
 0x107   :  { %v1897_v16 = vpop.f32.mrf.mxu3 }
 0x108   :  { %v1898_v18 = vadd.f32 %v1897_v16, %v1885_v15  ;;  %v1873_v19 = vpop.f32.mrf.mxu1 }
 0x10d   :  { %v1886_v20 = vpop.f32.mrf.mxu2 }
 0x10f   :  { %v1899_v21 = vpop.f32.mrf.mxu3 }
 0x11e   :  { %v1910_v22 = vpop.f32.mrf.mxu0 }
 0x11f   :  { %v1911_v42 = vadd.f32 %v1910_v22, %v1898_v18 }
 0x120   :  { %v1923_v24 = vpop.f32.mrf.mxu1 }
 0x121   :  { %v1924_v47 = vadd.f32 %v1923_v24, %v1911_v42 }
 0x125   :  { %v1936_v25 = vpop.f32.mrf.mxu2 }
 0x126   :  { %v1912_v28 = vpop.f32.mrf.mxu0  ;;  %v1937_v49 = vadd.f32 %v1936_v25, %v1924_v47 }
 0x127   :  { %v1949_v27 = vpop.f32.mrf.mxu3 }
 0x128   :  { %v1925_v30 = vpop.f32.mrf.mxu1  ;;  %v1950_v53 = vadd.f32 %v1949_v27, %v1937_v49 }
 0x12d   :  { %v1938_v32 = vpop.f32.mrf.mxu2 }
 0x12f   :  { %v1951_v33 = vpop.f32.mrf.mxu3 }
 0x13e   :  { %v1962_v37 = vpop.f32.mrf.mxu0 }
 0x13f   :  { %v1963_v54 = vadd.f32 %v1962_v37, %v1950_v53 }
 0x140   :  { %v1975_v39 = vpop.f32.mrf.mxu1 }
 0x141   :  { %v1976_v56 = vadd.f32 %v1975_v39, %v1963_v54 }
 0x145   :  { %v1988_v40 = vpop.f32.mrf.mxu2 }
 0x146   :  { %v1964_v44 = vpop.f32.mrf.mxu0  ;;  %v1989_v58 = vadd.f32 %v1988_v40, %v1976_v56 }
 0x147   :  { %v2001_v43 = vpop.f32.mrf.mxu3 }
 0x148   :  { %v1977_v46 = vpop.f32.mrf.mxu1  ;;  %v2002_v59 = vadd.f32 %v2001_v43, %v1989_v58 }
 0x14d   :  { %v1990_v50 = vpop.f32.mrf.mxu2 }
 0x14f   :  { %v2003_v51 = vpop.f32.mrf.mxu3 }
 0x15e   :  { %v2014_v60 = vpop.f32.mrf.mxu0 }
 0x15f   :  { %v2015_v61 = vadd.f32 %v2014_v60, %v2002_v59 }
 0x161   :  { %v2018_v62 = vmax.f32 %v2015_v61, 0.0 }
 0x163   :  { %v2019_v63 = vpack.c.bf16 %v2018_v62, %v2018_v62 }
 0x165   :  { %2096 = vmatmul.bf16.vlgmr.msra.gmra.mxu1 %v2019_v63 }
 0x166   :  { %v2016_v0 = vpop.f32.mrf.mxu0 }
 0x1e2   :  { %v2097_v4 = vpop.f32.mrf.mxu1 }
 0x1e3   :  { %v2098_v5 = vadd.f32 %v3300_v3, %v2097_v4 }
 0x1e5   :  { %v2101_v6 = vmax.f32 %v2098_v5, 0.0 }
 0x1e7   :  { %v2102_v7 = vpack.c.bf16 %v2101_v6, %v2101_v6 }
 0x1e9   :  { %2179 = vmatmul.bf16.vlgmr.msra.gmra.mxu2 %v2102_v7 }
 0x1ea   :  { %v2099_v8 = vpop.f32.mrf.mxu1 }
 0x26c   :  { %v2180_v12 = vpop.f32.mrf.mxu2 }
 0x26d   :  { %v2181_v13 = vadd.f32 %v3301_v11, %v2180_v12 }
 0x26f   :  { %v2187_v14 = vsel %vm2186_vm0, %v2181_v13, -1e+30 }
 0x270   :  { %v2189_v15 = vsel %vm2188_vm1, %v2187_v14, -inf }
 0x271   :  { %2190 = vmax.xlane.f32.xlu0 %v2189_v15 }
 0x274   :  { %v2182_v16 = vpop.f32.mrf.mxu2 }
 0x2e4   :  { %v2191_v17 = vpop.xlane.xlu0 %2190 }
 0x2e5   :  { %v2192_v18 = vsub.f32 %v2187_v14, %v2191_v17 }
 0x2e7   :  { %v2193_v19 = vmul.f32 1.442695, %v2192_v18 }
 0x2e9   :  { %3302 = vpow2.f32 %v2193_v19 }
 0x2ef   :  { %v3303_v20 = vpop.eup %3302 }
 0x2f0   :  { %v2195_v21 = vsel %vm2188_vm1, %v3303_v20, 0.0 }
 0x2f1   :  { %2196 = vadd.xlane.f32.xlu0 %v2195_v21 }
 0x364   :  { %v2197_v22 = vpop.xlane.xlu0 %2196 }
 0x365   :  { %3304 = vlog2.f32 %v2197_v22 }
 0x36b   :  { %v3305_v23 = vpop.eup %3304 }
 0x36c   :  { %v2199_v24 = vmul.f32 0.6931472, %v3305_v23 }
 0x36e   :  { %v2200_v25 = vsub.f32 %v2192_v18, %v2199_v24 }
 0x370   :  { %2201 = vst [vmem:[#allocation2] sm:$0x3] %v2200_v25 }
 0x371   :  { %2212 = dma.vmem_to_hbm [thread:$0]  %s2208_s5, 32, %s2210_s24, [#allocation3]  }
 0x372   :  { %3330 = dma.done.wait [#allocation3], 32  }
 0x373   :  { %3331 = vsyncadd [#allocation3], 4294967264 }
 0x374   :  { %2217 = vsyncpa [#allocation3], 1 }

// kernel: nnnet_forward.2
= control target key start
LH: loop header
LB: loop body
LE: loop exit
PB: predicated region body
PF: predicated region fallthrough
CT: control target
= control target key end

     0   :  { %s6074_s30 = smov 0   ;;  %s7252_s0 = inlined_call_operand.vmem [shape: bf16[2,1024,128], index: 0, kind: input, shape index: {}]   ;;  %s7253_s1 = inlined_call_operand.vmem [shape: bf16[128,128], index: 1, kind: input, shape index: {}]   ;;  %s7254_s2 = inlined_call_operand.vmem [shape: f32[1,128], index: 2, kind: input, shape index: {}]   ;;  %s7255_s3 = inlined_call_operand.vmem [shape: bf16[9,128,128], index: 3, kind: input, shape index: {}]   ;;  %s7256_s4 = inlined_call_operand.vmem [shape: f32[1,128], index: 4, kind: input, shape index: {}]   ;;  %s7257_s5 = inlined_call_operand.vmem [shape: f32[49,205], index: 5, kind: input, shape index: {}]   ;;  %s7258_s6 = inlined_call_operand.vmem [shape: bf16[9,128,128], index: 6, kind: input, shape index: {}]   ;;  %s7259_s7 = inlined_call_operand.vmem [shape: f32[1,128], index: 7, kind: input, shape index: {}]   ;;  %s7260_s8 = inlined_call_operand.vmem [shape: f32[25,33], index: 8, kind: input, shape index: {}]   ;;  %s7261_s9 = inlined_call_operand.vmem [shape: bf16[2,25,128], index: 9, kind: output, shape index: {}]  }
   0x1 LB: > { %s4629_s10 = sadd.s32 4294967295, %s6022_s30   ;;  %p4633_p0 = scmp.ge.s32.totalorder %s6022_s30, 1  ;;  %s6022_s30 = sphi %s6074_s30, %s19_s30  }
   0x2   : > { %p287_p1 = scmp.lt.s32.totalorder %s6022_s30, 3 }
   0x4   : > { %p288_p2 = pnand %p4633_p0, %p287_p1 }
   0x6   : > { %291 = sbr.rel (%p288_p2) target bundleno = 1754 (0x6da), region = 56 }
   0xb   : > { %v5798_v0 = vld [vmem:[%s7253_s1 + $0x38] sm:$0xff]  ;;  %v5797_v1 = vld [vmem:[%s7253_s1 + $0x30] sm:$0xff]  ;;  %v5796_v2 = vld [vmem:[%s7253_s1 + $0x28] sm:$0xff]  ;;  %p323_p3 = scmp.lt.s32.totalorder %s4629_s10, 1  ;;  %vm3511_vm0 = vcmask 1044480   ;;  %vm3489_vm1 = vcmask 629760  }
   0xc   : > { %525 = vmatpush.bf16.msra.mxu0 %v5798_v0  ;;  %742 = vmatpush.bf16.msra.mxu1 %v5798_v0  ;;  %v5795_v3 = vld [vmem:[%s7253_s1 + $0x20] sm:$0xff]  ;;  %v5794_v4 = vld [vmem:[%s7253_s1 + $0x18] sm:$0xff]  ;;  %v5793_v5 = vld [vmem:[%s7253_s1 + $0x10] sm:$0xff]  ;;  %vm4524_vm2 = vcmask 1040384   ;;  %vm4511_vm3 = vcmask 269312  }
   0xd   : > { %991 = vmatpush.bf16.msra.mxu2 %v5798_v0  ;;  %1240 = vmatpush.bf16.msra.mxu3 %v5798_v0  ;;  %s7275_s10 = smov (!%p323_p3, %s4629_s10), 1  ;;  %v5792_v6 = vld [vmem:[%s7253_s1 + $0x8] sm:$0xff]  ;;  %v5791_v7 = vld [vmem:[%s7253_s1] sm:$0xff]  ;;  %v5862_v40 = vld [vmem:[%s7255_s3 + $0x78] sm:$0xff]  ;;  %vm4569_vm4 = vsmask.f32 256 }
   0xe   : > { %s5773_s25 = sshll.u32 %s7275_s10, 9  ;;  %v6160_v51 = vld [vmem:[%s7254_s2] ss:$0 sm:$0xff]  ;;  %vm4570_vm5 = vmand %vm4524_vm2, %vm4569_vm4 }
   0xf   : > { %s6116_s11 = scalar_lea.vmem %s7252_s0, %s5773_s25 }
  0x10   : > { %526 = vmatpush.bf16.msra.mxu0 %v5797_v1  ;;  %743 = vmatpush.bf16.msra.mxu1 %v5797_v1  ;;  %v5775_v8 = vld [vmem:[%s6116_s11] sm:$0xff]  ;;  %v5776_v12 = vld [vmem:[%s6116_s11 + $0x8] sm:$0xff]  ;;  %v5777_v16 = vld [vmem:[%s6116_s11 + $0x10] sm:$0xff] }
  0x11   : > { %992 = vmatpush.bf16.msra.mxu2 %v5797_v1  ;;  %1241 = vmatpush.bf16.msra.mxu3 %v5797_v1  ;;  %v5799_v9 = vld [vmem:[%s6116_s11 + $0x80] sm:$0xff]  ;;  %v5800_v13 = vld [vmem:[%s6116_s11 + $0x88] sm:$0xff]  ;;  %v5801_v17 = vld [vmem:[%s6116_s11 + $0x90] sm:$0xff] }
  0x12   : > { %v5815_v10 = vld [vmem:[%s6116_s11 + $0x100] sm:$0xff]  ;;  %v5816_v14 = vld [vmem:[%s6116_s11 + $0x108] sm:$0xff]  ;;  %v5817_v18 = vld [vmem:[%s6116_s11 + $0x110] sm:$0xff] }
  0x13   : > { %v5831_v11 = vld [vmem:[%s6116_s11 + $0x180] sm:$0xff]  ;;  %v5832_v15 = vld [vmem:[%s6116_s11 + $0x188] sm:$0xff]  ;;  %v5833_v19 = vld [vmem:[%s6116_s11 + $0x190] sm:$0xff] }
  0x14   : > { %527 = vmatpush.bf16.msra.mxu0 %v5796_v2  ;;  %744 = vmatpush.bf16.msra.mxu1 %v5796_v2  ;;  %v5778_v20 = vld [vmem:[%s6116_s11 + $0x18] sm:$0xff]  ;;  %v5779_v24 = vld [vmem:[%s6116_s11 + $0x20] sm:$0xff]  ;;  %v5780_v28 = vld [vmem:[%s6116_s11 + $0x28] sm:$0xff] }
  0x15   : > { %993 = vmatpush.bf16.msra.mxu2 %v5796_v2  ;;  %1242 = vmatpush.bf16.msra.mxu3 %v5796_v2  ;;  %v5802_v21 = vld [vmem:[%s6116_s11 + $0x98] sm:$0xff]  ;;  %v5803_v25 = vld [vmem:[%s6116_s11 + $0xa0] sm:$0xff]  ;;  %v5804_v29 = vld [vmem:[%s6116_s11 + $0xa8] sm:$0xff] }
  0x16   : > { %v5818_v22 = vld [vmem:[%s6116_s11 + $0x118] sm:$0xff]  ;;  %v5819_v26 = vld [vmem:[%s6116_s11 + $0x120] sm:$0xff]  ;;  %v5820_v30 = vld [vmem:[%s6116_s11 + $0x128] sm:$0xff] }
  0x17   : > { %v5834_v23 = vld [vmem:[%s6116_s11 + $0x198] sm:$0xff]  ;;  %v5835_v27 = vld [vmem:[%s6116_s11 + $0x1a0] sm:$0xff]  ;;  %v5836_v31 = vld [vmem:[%s6116_s11 + $0x1a8] sm:$0xff] }
  0x18   : > { %528 = vmatpush.bf16.msra.mxu0 %v5795_v3  ;;  %745 = vmatpush.bf16.msra.mxu1 %v5795_v3  ;;  %v5781_v32 = vld [vmem:[%s6116_s11 + $0x30] sm:$0xff]  ;;  %v5782_v36 = vld [vmem:[%s6116_s11 + $0x38] sm:$0xff]  ;;  %v5783_v41 = vld [vmem:[%s6116_s11 + $0x40] sm:$0xff] }
  0x19   : > { %994 = vmatpush.bf16.msra.mxu2 %v5795_v3  ;;  %1243 = vmatpush.bf16.msra.mxu3 %v5795_v3  ;;  %v5805_v33 = vld [vmem:[%s6116_s11 + $0xb0] sm:$0xff]  ;;  %v5806_v37 = vld [vmem:[%s6116_s11 + $0xb8] sm:$0xff]  ;;  %v5807_v42 = vld [vmem:[%s6116_s11 + $0xc0] sm:$0xff] }
  0x1a   : > { %v5821_v34 = vld [vmem:[%s6116_s11 + $0x130] sm:$0xff]  ;;  %v5822_v38 = vld [vmem:[%s6116_s11 + $0x138] sm:$0xff]  ;;  %v5823_v45 = vld [vmem:[%s6116_s11 + $0x140] sm:$0xff] }
  0x1b   : > { %v5837_v35 = vld [vmem:[%s6116_s11 + $0x1b0] sm:$0xff]  ;;  %v5838_v39 = vld [vmem:[%s6116_s11 + $0x1b8] sm:$0xff]  ;;  %v5839_v46 = vld [vmem:[%s6116_s11 + $0x1c0] sm:$0xff] }
  0x1c   : > { %529 = vmatpush.bf16.msra.mxu0 %v5794_v4  ;;  %746 = vmatpush.bf16.msra.mxu1 %v5794_v4  ;;  %v5784_v60 = vld [vmem:[%s6116_s11 + $0x48] sm:$0xff] }
  0x1d   : > { %995 = vmatpush.bf16.msra.mxu2 %v5794_v4  ;;  %1244 = vmatpush.bf16.msra.mxu3 %v5794_v4  ;;  %v5808_v61 = vld [vmem:[%s6116_s11 + $0xc8] sm:$0xff] }
  0x1e   : > { %v5824_v1 = vld [vmem:[%s6116_s11 + $0x148] sm:$0xff] }
  0x1f   : > { %v5840_v2 = vld [vmem:[%s6116_s11 + $0x1c8] sm:$0xff] }
  0x20   : > { %530 = vmatpush.bf16.msra.mxu0 %v5793_v5  ;;  %747 = vmatpush.bf16.msra.mxu1 %v5793_v5 }
  0x21   : > { %996 = vmatpush.bf16.msra.mxu2 %v5793_v5  ;;  %1245 = vmatpush.bf16.msra.mxu3 %v5793_v5 }
  0x24   : > { %531 = vmatpush.bf16.msra.mxu0 %v5792_v6  ;;  %748 = vmatpush.bf16.msra.mxu1 %v5792_v6 }
  0x25   : > { %997 = vmatpush.bf16.msra.mxu2 %v5792_v6  ;;  %1246 = vmatpush.bf16.msra.mxu3 %v5792_v6 }
  0x28   : > { %532 = vmatpush.bf16.msra.mxu0 %v5791_v7  ;;  %749 = vmatpush.bf16.msra.mxu1 %v5791_v7 }
  0x29   : > { %998 = vmatpush.bf16.msra.mxu2 %v5791_v7  ;;  %1247 = vmatpush.bf16.msra.mxu3 %v5791_v7 }
  0x2b   : > { %533 = vmatmul.bf16.vlgmr.msra.gmra.mxu0 %v5775_v8  ;;  %750 = vmatmul.bf16.vlgmr.msra.gmra.mxu1 %v5799_v9 }
  0x2c   : > { %999 = vmatmul.bf16.vlgmr.msra.gmra.mxu2 %v5815_v10  ;;  %1248 = vmatmul.bf16.vlgmr.msra.gmra.mxu3 %v5831_v11 }
  0x2d   : > { %1626 = vmatpush.bf16.msrb.mxu0 %v5862_v40 }
  0x3b   : > { %538 = vmatmul.bf16.gmra.mxu0 %v5776_v12  ;;  %755 = vmatmul.bf16.gmra.mxu1 %v5800_v13  ;;  %v5861_v12 = vld [vmem:[%s7255_s3 + $0x70] sm:$0xff] }
  0x3c   : > { %1004 = vmatmul.bf16.gmra.mxu2 %v5816_v14  ;;  %1253 = vmatmul.bf16.gmra.mxu3 %v5832_v15 }
  0x3d   : > { %1627 = vmatpush.bf16.msrb.mxu0 %v5861_v12  ;;  %v5854_v12 = vld [vmem:[%s7255_s3 + $0x38] sm:$0xff] }
  0x3e   : > { %1753 = vmatpush.bf16.msrb.mxu1 %v5854_v12 }
  0x4b   : > { %543 = vmatmul.bf16.gmra.mxu0 %v5777_v16  ;;  %760 = vmatmul.bf16.gmra.mxu1 %v5801_v17 }
  0x4c   : > { %1009 = vmatmul.bf16.gmra.mxu2 %v5817_v18  ;;  %1258 = vmatmul.bf16.gmra.mxu3 %v5833_v19 }
  0x5b   : > { %548 = vmatmul.bf16.gmra.mxu0 %v5778_v20  ;;  %765 = vmatmul.bf16.gmra.mxu1 %v5802_v21  ;;  %v5785_v20 = vld [vmem:[%s6116_s11 + $0x50] sm:$0xff] }
  0x5c   : > { %1014 = vmatmul.bf16.gmra.mxu2 %v5818_v22  ;;  %1263 = vmatmul.bf16.gmra.mxu3 %v5834_v23  ;;  %v5809_v21 = vld [vmem:[%s6116_s11 + $0xd0] sm:$0xff] }
  0x6b   : > { %553 = vmatmul.bf16.gmra.mxu0 %v5779_v24  ;;  %770 = vmatmul.bf16.gmra.mxu1 %v5803_v25  ;;  %v5825_v25 = vld [vmem:[%s6116_s11 + $0x150] sm:$0xff] }
  0x6c   : > { %1019 = vmatmul.bf16.gmra.mxu2 %v5819_v26  ;;  %1268 = vmatmul.bf16.gmra.mxu3 %v5835_v27  ;;  %v5841_v26 = vld [vmem:[%s6116_s11 + $0x1d0] sm:$0xff] }
  0x7b   : > { %558 = vmatmul.bf16.gmra.mxu0 %v5780_v28  ;;  %775 = vmatmul.bf16.gmra.mxu1 %v5804_v29 }
  0x7c   : > { %1024 = vmatmul.bf16.gmra.mxu2 %v5820_v30  ;;  %1273 = vmatmul.bf16.gmra.mxu3 %v5836_v31 }
  0x8b   : > { %563 = vmatmul.bf16.gmra.mxu0 %v5781_v32  ;;  %780 = vmatmul.bf16.gmra.mxu1 %v5805_v33 }
  0x8c   : > { %1029 = vmatmul.bf16.gmra.mxu2 %v5821_v34  ;;  %1278 = vmatmul.bf16.gmra.mxu3 %v5837_v35 }
  0x9b   : > { %568 = vmatmul.bf16.gmra.mxu0 %v5782_v36  ;;  %785 = vmatmul.bf16.gmra.mxu1 %v5806_v37 }
  0x9c   : > { %1034 = vmatmul.bf16.gmra.mxu2 %v5822_v38  ;;  %1283 = vmatmul.bf16.gmra.mxu3 %v5838_v39 }
  0xa8   : > { %v534_v43 = vpop.f32.mrf.mxu0  ;;  %v751_v44 = vpop.f32.mrf.mxu1 }
  0xa9   : > { %v831_v47 = vmax.f32 %v534_v43, %v751_v44  ;;  %v5786_v43 = vld [vmem:[%s6116_s11 + $0x58] sm:$0xff] }
  0xaa   : > { %v5810_v44 = vld [vmem:[%s6116_s11 + $0xd8] sm:$0xff] }
  0xab   : > { %573 = vmatmul.bf16.gmra.mxu0 %v5783_v41  ;;  %790 = vmatmul.bf16.gmra.mxu1 %v5807_v42 }
  0xac   : > { %1039 = vmatmul.bf16.gmra.mxu2 %v5823_v45  ;;  %1288 = vmatmul.bf16.gmra.mxu3 %v5839_v46 }
  0xaf   : > { %v1000_v48 = vpop.f32.mrf.mxu2  ;;  %v1249_v49 = vpop.f32.mrf.mxu3 }
  0xb0   : > { %v1080_v50 = vmax.f32 %v831_v47, %v1000_v48  ;;  %v536_v52 = vpop.f32.mrf.mxu0  ;;  %v753_v53 = vpop.f32.mrf.mxu1  ;;  %v5826_v48 = vld [vmem:[%s6116_s11 + $0x158] sm:$0xff] }
  0xb1   : > { %v832_v57 = vmax.f32 %v536_v52, %v753_v53 }
  0xb2   : > { %v1329_v54 = vmax.f32 %v1080_v50, %v1249_v49  ;;  %v5842_v49 = vld [vmem:[%s6116_s11 + $0x1d8] sm:$0xff] }
  0xb4   : > { %v1365_v55 = vadd.f32 %v6160_v51, %v1329_v54 }
  0xb6   : > { %v1397_v56 = vmax.f32 %v1365_v55, 0.0 }
  0xb7   : > { %v1002_v58 = vpop.f32.mrf.mxu2  ;;  %v1251_v59 = vpop.f32.mrf.mxu3 }
  0xb8   : > { %1429 = vst [vmem:[#allocation2] sm:$0xff] %v1397_v56  ;;  %v1081_v62 = vmax.f32 %v832_v57, %v1002_v58  ;;  %v539_v63 = vpop.f32.mrf.mxu0  ;;  %v756_v0 = vpop.f32.mrf.mxu1 }
  0xb9   : > { %v833_v6 = vmax.f32 %v539_v63, %v756_v0 }
  0xba   : > { %v1330_v3 = vmax.f32 %v1081_v62, %v1251_v59 }
  0xbb   : > { %578 = vmatmul.bf16.gmra.mxu0 %v5784_v60  ;;  %795 = vmatmul.bf16.gmra.mxu1 %v5808_v61  ;;  %v5860_v60 = vld [vmem:[%s7255_s3 + $0x68] sm:$0xff] }
  0xbc   : > { %v1366_v4 = vadd.f32 %v6160_v51, %v1330_v3  ;;  %1044 = vmatmul.bf16.gmra.mxu2 %v5824_v1  ;;  %1293 = vmatmul.bf16.gmra.mxu3 %v5840_v2 }
  0xbd   : > { %1628 = vmatpush.bf16.msrb.mxu0 %v5860_v60  ;;  %v5857_v60 = vld [vmem:[%s7255_s3 + $0x50] sm:$0xff] }
  0xbe   : > { %v1398_v5 = vmax.f32 %v1366_v4, 0.0  ;;  %v5787_v4 = vld [vmem:[%s6116_s11 + $0x60] sm:$0xff] }
  0xbf   : > { %v1005_v7 = vpop.f32.mrf.mxu2  ;;  %v1254_v8 = vpop.f32.mrf.mxu3 }
  0xc0   : > { %1430 = vst [vmem:[#allocation2 + $0x8] sm:$0xff] %v1398_v5  ;;  %v1082_v9 = vmax.f32 %v833_v6, %v1005_v7  ;;  %v541_v10 = vpop.f32.mrf.mxu0  ;;  %v758_v11 = vpop.f32.mrf.mxu1  ;;  %v6171_v13 = vpack.c.bf16 %v1398_v5, %v1397_v56  ;;  %v5811_v5 = vld [vmem:[%s6116_s11 + $0xe0] sm:$0xff] }
  0xc1   : > { %v834_v17 = vmax.f32 %v541_v10, %v758_v11  ;;  %v5843_v10 = vld [vmem:[%s6116_s11 + $0x1e0] sm:$0xff] }
  0xc2   : > { %v1331_v14 = vmax.f32 %v1082_v9, %v1254_v8  ;;  %v5827_v9 = vld [vmem:[%s6116_s11 + $0x160] sm:$0xff] }
  0xc4   : > { %v1367_v15 = vadd.f32 %v6160_v51, %v1331_v14  ;;  %v5870_v14 = vld [vmem:[%s7255_s3 + $0xb8] sm:$0xff] }
  0xc5   : > { %1939 = vmatpush.bf16.msrb.mxu2 %v5870_v14  ;;  %v5789_v14 = vld [vmem:[%s6116_s11 + $0x70] sm:$0xff] }
  0xc6   : > { %v1399_v16 = vmax.f32 %v1367_v15, 0.0 }
  0xc7   : > { %v1007_v18 = vpop.f32.mrf.mxu2  ;;  %v1256_v19 = vpop.f32.mrf.mxu3 }
  0xc8   : > { %1431 = vst [vmem:[#allocation2 + $0x10] sm:$0xff] %v1399_v16  ;;  %v1083_v22 = vmax.f32 %v834_v17, %v1007_v18  ;;  %v544_v23 = vpop.f32.mrf.mxu0  ;;  %v761_v24 = vpop.f32.mrf.mxu1 }
  0xc9   : > { %v835_v30 = vmax.f32 %v544_v23, %v761_v24  ;;  %v5877_v23 = vld [vmem:[%s7255_s3 + $0xf0] sm:$0xff] }
  0xca   : > { %v1332_v27 = vmax.f32 %v1083_v22, %v1256_v19  ;;  %v5869_v22 = vld [vmem:[%s7255_s3 + $0xb0] sm:$0xff] }
  0xcb   : > { %583 = vmatmul.bf16.gmra.mxu0 %v5785_v20  ;;  %800 = vmatmul.bf16.gmra.mxu1 %v5809_v21  ;;  %v5853_v21 = vld [vmem:[%s7255_s3 + $0x30] sm:$0xff] }
  0xcc   : > { %v1368_v28 = vadd.f32 %v6160_v51, %v1332_v27  ;;  %1049 = vmatmul.bf16.gmra.mxu2 %v5825_v25  ;;  %1298 = vmatmul.bf16.gmra.mxu3 %v5841_v26 }
  0xcd   : > { %1754 = vmatpush.bf16.msrb.mxu1 %v5853_v21  ;;  %1940 = vmatpush.bf16.msrb.mxu2 %v5869_v22 }
  0xce   : > { %v1400_v29 = vmax.f32 %v1368_v28, 0.0 }
  0xcf   : > { %v1010_v31 = vpop.f32.mrf.mxu2  ;;  %v1259_v32 = vpop.f32.mrf.mxu3 }
  0xd0   : > { %1432 = vst [vmem:[#allocation2 + $0x18] sm:$0xff] %v1400_v29  ;;  %v1084_v33 = vmax.f32 %v835_v30, %v1010_v31  ;;  %v546_v34 = vpop.f32.mrf.mxu0  ;;  %v763_v35 = vpop.f32.mrf.mxu1  ;;  %v6179_v36 = vpack.c.bf16 %v1400_v29, %v1399_v16  ;;  %v5878_v16 = vld [vmem:[%s7255_s3 + $0xf8] sm:$0xff]  ;;  %v5852_v29 = vld [vmem:[%s7255_s3 + $0x28] sm:$0xff] }
  0xd1   : > { %v836_v40 = vmax.f32 %v546_v34, %v763_v35  ;;  %2153 = vmatpush.bf16.msrb.mxu3 %v5878_v16  ;;  %v5868_v30 = vld [vmem:[%s7255_s3 + $0xa8] sm:$0xff]  ;;  %1755 = vmatpush.bf16.msrb.mxu1 %v5852_v29 }
  0xd2   : > { %v1333_v37 = vmax.f32 %v1084_v33, %v1259_v32  ;;  %v5876_v31 = vld [vmem:[%s7255_s3 + $0xe8] sm:$0xff]  ;;  %1941 = vmatpush.bf16.msrb.mxu2 %v5868_v30 }
  0xd3   : > { %v5788_v35 = vld [vmem:[%s6116_s11 + $0x68] sm:$0xff] }
  0xd4   : > { %v1369_v38 = vadd.f32 %v6160_v51, %v1333_v37  ;;  %v5812_v37 = vld [vmem:[%s6116_s11 + $0xe8] sm:$0xff] }
  0xd5   : > { %2154 = vmatpush.bf16.msrb.mxu3 %v5877_v23 }
  0xd6   : > { %v1401_v39 = vmax.f32 %v1369_v38, 0.0 }
  0xd7   : > { %v1012_v41 = vpop.f32.mrf.mxu2  ;;  %v1261_v42 = vpop.f32.mrf.mxu3 }
  0xd8   : > { %1433 = vst [vmem:[#allocation2 + $0x20] sm:$0xff] %v1401_v39  ;;  %v1085_v45 = vmax.f32 %v836_v40, %v1012_v41  ;;  %v549_v46 = vpop.f32.mrf.mxu0  ;;  %v766_v47 = vpop.f32.mrf.mxu1  ;;  %v5859_v40 = vld [vmem:[%s7255_s3 + $0x60] sm:$0xff] }
  0xd9   : > { %v837_v54 = vmax.f32 %v549_v46, %v766_v47  ;;  %2155 = vmatpush.bf16.msrb.mxu3 %v5876_v31  ;;  %v5851_v41 = vld [vmem:[%s7255_s3 + $0x20] sm:$0xff]  ;;  %v5828_v46 = vld [vmem:[%s6116_s11 + $0x168] sm:$0xff]  ;;  %1629 = vmatpush.bf16.msrb.mxu0 %v5859_v40 }
  0xda   : > { %v1334_v50 = vmax.f32 %v1085_v45, %v1261_v42  ;;  %v5867_v42 = vld [vmem:[%s7255_s3 + $0xa0] sm:$0xff]  ;;  %v5844_v47 = vld [vmem:[%s6116_s11 + $0x1e8] sm:$0xff]  ;;  %1756 = vmatpush.bf16.msrb.mxu1 %v5851_v41 }
  0xdb   : > { %588 = vmatmul.bf16.gmra.mxu0 %v5786_v43  ;;  %805 = vmatmul.bf16.gmra.mxu1 %v5810_v44 }
  0xdc   : > { %v1370_v52 = vadd.f32 %v6160_v51, %v1334_v50  ;;  %1054 = vmatmul.bf16.gmra.mxu2 %v5826_v48  ;;  %1303 = vmatmul.bf16.gmra.mxu3 %v5842_v49  ;;  %v5875_v48 = vld [vmem:[%s7255_s3 + $0xe0] sm:$0xff]  ;;  %v5858_v50 = vld [vmem:[%s7255_s3 + $0x58] sm:$0xff] }
  0xdd   : > { %1942 = vmatpush.bf16.msrb.mxu2 %v5867_v42  ;;  %2156 = vmatpush.bf16.msrb.mxu3 %v5875_v48 }
  0xde   : > { %v1402_v53 = vmax.f32 %v1370_v52, 0.0  ;;  %v5850_v52 = vld [vmem:[%s7255_s3 + $0x18] sm:$0xff]  ;;  %1630 = vmatpush.bf16.msrb.mxu0 %v5858_v50 }
  0xdf   : > { %v1015_v55 = vpop.f32.mrf.mxu2  ;;  %v1264_v56 = vpop.f32.mrf.mxu3  ;;  %1757 = vmatpush.bf16.msrb.mxu1 %v5850_v52  ;;  %v5830_v50 = vld [vmem:[%s6116_s11 + $0x178] sm:$0xff] }
  0xe0   : > { %1434 = vst [vmem:[#allocation2 + $0x28] sm:$0xff] %v1402_v53  ;;  %v1086_v57 = vmax.f32 %v837_v54, %v1015_v55  ;;  %v551_v58 = vpop.f32.mrf.mxu0  ;;  %v768_v59 = vpop.f32.mrf.mxu1  ;;  %v6190_v61 = vpack.c.bf16 %v1402_v53, %v1401_v39  ;;  %v5866_v54 = vld [vmem:[%s7255_s3 + $0x98] sm:$0xff] }
  0xe1   : > { %v838_v1 = vmax.f32 %v551_v58, %v768_v59  ;;  %v5874_v55 = vld [vmem:[%s7255_s3 + $0xd8] sm:$0xff]  ;;  %1943 = vmatpush.bf16.msrb.mxu2 %v5866_v54 }
  0xe2   : > { %v1335_v62 = vmax.f32 %v1086_v57, %v1264_v56  ;;  %2157 = vmatpush.bf16.msrb.mxu3 %v5874_v55  ;;  %1631 = vmatpush.bf16.msrb.mxu0 %v5857_v60  ;;  %v5846_v52 = vld [vmem:[%s6116_s11 + $0x1f8] sm:$0xff] }
  0xe4   : > { %v1371_v63 = vadd.f32 %v6160_v51, %v1335_v62  ;;  %v5849_v62 = vld [vmem:[%s7255_s3 + $0x10] sm:$0xff] }
  0xe5   : > { %1758 = vmatpush.bf16.msrb.mxu1 %v5849_v62 }
  0xe6   : > { %v1403_v0 = vmax.f32 %v1371_v63, 0.0  ;;  %v5865_v63 = vld [vmem:[%s7255_s3 + $0x90] sm:$0xff] }
  0xe7   : > { %v1017_v2 = vpop.f32.mrf.mxu2  ;;  %v1266_v3 = vpop.f32.mrf.mxu3  ;;  %1944 = vmatpush.bf16.msrb.mxu2 %v5865_v63 }
  0xe8   : > { %1435 = vst [vmem:[#allocation2 + $0x30] sm:$0xff] %v1403_v0  ;;  %v1087_v6 = vmax.f32 %v838_v1, %v1017_v2  ;;  %v554_v7 = vpop.f32.mrf.mxu0  ;;  %v771_v8 = vpop.f32.mrf.mxu1 }
  0xe9   : > { %v839_v18 = vmax.f32 %v554_v7, %v771_v8  ;;  %v5848_v7 = vld [vmem:[%s7255_s3 + $0x8] sm:$0xff] }
  0xea   : > { %v1336_v11 = vmax.f32 %v1087_v6, %v1266_v3  ;;  %v5873_v3 = vld [vmem:[%s7255_s3 + $0xd0] sm:$0xff]  ;;  %v5856_v6 = vld [vmem:[%s7255_s3 + $0x48] sm:$0xff]  ;;  %1759 = vmatpush.bf16.msrb.mxu1 %v5848_v7 }
  0xeb   : > { %593 = vmatmul.bf16.gmra.mxu0 %v5787_v4  ;;  %810 = vmatmul.bf16.gmra.mxu1 %v5811_v5  ;;  %v5864_v8 = vld [vmem:[%s7255_s3 + $0x88] sm:$0xff] }
  0xec   : > { %v1372_v15 = vadd.f32 %v6160_v51, %v1336_v11  ;;  %1059 = vmatmul.bf16.gmra.mxu2 %v5827_v9  ;;  %1308 = vmatmul.bf16.gmra.mxu3 %v5843_v10  ;;  %v5872_v10 = vld [vmem:[%s7255_s3 + $0xc8] sm:$0xff] }
  0xed   : > { %2158 = vmatpush.bf16.msrb.mxu3 %v5873_v3  ;;  %1632 = vmatpush.bf16.msrb.mxu0 %v5856_v6 }
  0xee   : > { %v1404_v17 = vmax.f32 %v1372_v15, 0.0  ;;  %v5813_v15 = vld [vmem:[%s6116_s11 + $0xf0] sm:$0xff]  ;;  %1945 = vmatpush.bf16.msrb.mxu2 %v5864_v8 }
  0xef   : > { %v1020_v19 = vpop.f32.mrf.mxu2  ;;  %v1269_v20 = vpop.f32.mrf.mxu3  ;;  %v1833_v8 = vld [vmem:[#allocation2 + $0xa] sm:$0xff] }
  0xf0   : > { %1436 = vst [vmem:[#allocation2 + $0x38] sm:$0xff] %v1404_v17  ;;  %v1088_v24 = vmax.f32 %v839_v18, %v1020_v19  ;;  %v556_v25 = vpop.f32.mrf.mxu0  ;;  %v773_v26 = vpop.f32.mrf.mxu1  ;;  %v6216_v27 = vpack.c.bf16 %v1404_v17, %v1403_v0  ;;  %v5855_v18 = vld [vmem:[%s7255_s3 + $0x40] sm:$0xff] }
  0xf1   : > { %v840_v34 = vmax.f32 %v556_v25, %v773_v26  ;;  %2159 = vmatpush.bf16.msrb.mxu3 %v5872_v10  ;;  %v5847_v19 = vld [vmem:[%s7255_s3] sm:$0xff]  ;;  %v5845_v25 = vld [vmem:[%s6116_s11 + $0x1f0] sm:$0xff]  ;;  %1633 = vmatpush.bf16.msrb.mxu0 %v5855_v18 }
  0xf2   : > { %v1337_v28 = vmax.f32 %v1088_v24, %v1269_v20  ;;  %v5863_v20 = vld [vmem:[%s7255_s3 + $0x80] sm:$0xff]  ;;  %v5829_v24 = vld [vmem:[%s6116_s11 + $0x170] sm:$0xff]  ;;  %1760 = vmatpush.bf16.msrb.mxu1 %v5847_v19 }
  0xf3   : > { %v5871_v26 = vld [vmem:[%s7255_s3 + $0xc0] sm:$0xff]  ;;  %1946 = vmatpush.bf16.msrb.mxu2 %v5863_v20 }
  0xf4   : > { %v1373_v32 = vadd.f32 %v6160_v51, %v1337_v28 }
  0xf5   : > { %2160 = vmatpush.bf16.msrb.mxu3 %v5871_v26 }
  0xf6   : > { %v1405_v33 = vmax.f32 %v1373_v32, 0.0 }
  0xf7   : > { %v1022_v38 = vpop.f32.mrf.mxu2  ;;  %v1271_v39 = vpop.f32.mrf.mxu3 }
  0xf8   : > { %1437 = vst [vmem:[#allocation2 + $0x40] sm:$0xff] %v1405_v33  ;;  %v1089_v43 = vmax.f32 %v840_v34, %v1022_v38  ;;  %v559_v44 = vpop.f32.mrf.mxu0  ;;  %v776_v45 = vpop.f32.mrf.mxu1 }
  0xf9   : > { %v841_v57 = vmax.f32 %v559_v44, %v776_v45  ;;  %v5790_v45 = vld [vmem:[%s6116_s11 + $0x78] sm:$0xff] }
  0xfa   : > { %v1338_v49 = vmax.f32 %v1089_v43, %v1271_v39 }
  0xfb   : > { %598 = vmatmul.bf16.gmra.mxu0 %v5788_v35  ;;  %815 = vmatmul.bf16.gmra.mxu1 %v5812_v37 }
  0xfc   : > { %v1374_v53 = vadd.f32 %v6160_v51, %v1338_v49  ;;  %1064 = vmatmul.bf16.gmra.mxu2 %v5828_v46  ;;  %1313 = vmatmul.bf16.gmra.mxu3 %v5844_v47  ;;  %v5814_v46 = vld [vmem:[%s6116_s11 + $0xf8] sm:$0xff]  ;;  %s5774_s11 = sshll.u32 %s7275_s10, 4 }
  0xfd   : > { %s332_s26 = scalar_lea.vmem %s7261_s9, %s5774_s11 }
  0xfe   : > { %v1406_v56 = vmax.f32 %v1374_v53, 0.0 }
  0xff   : > { %v1025_v58 = vpop.f32.mrf.mxu2  ;;  %v1274_v59 = vpop.f32.mrf.mxu3 }
 0x100   : > { %1438 = vst [vmem:[#allocation2 + $0x48] sm:$0xff] %v1406_v56  ;;  %v1090_v0 = vmax.f32 %v841_v57, %v1025_v58  ;;  %v561_v1 = vpop.f32.mrf.mxu0  ;;  %v778_v2 = vpop.f32.mrf.mxu1  ;;  %v6269_v4 = vpack.c.bf16 %v1406_v56, %v1405_v33 }
 0x101   : > { %v842_v12 = vmax.f32 %v561_v1, %v778_v2 }
 0x102   : > { %v1339_v5 = vmax.f32 %v1090_v0, %v1274_v59 }
 0x104   : > { %v1375_v9 = vadd.f32 %v6160_v51, %v1339_v5  ;;  %v1520_v5 = vld [vmem:[#allocation2 + $0x9] sm:$0xff] }
 0x106   : > { %v1407_v11 = vmax.f32 %v1375_v9, 0.0 }
 0x107   : > { %v1027_v16 = vpop.f32.mrf.mxu2  ;;  %v1276_v17 = vpop.f32.mrf.mxu3 }
 0x108   : > { %1439 = vst [vmem:[#allocation2 + $0x50] sm:$0xff] %v1407_v11  ;;  %v1091_v21 = vmax.f32 %v842_v12, %v1027_v16  ;;  %v564_v22 = vpop.f32.mrf.mxu0  ;;  %v781_v23 = vpop.f32.mrf.mxu1  ;;  %v1519_v12 = vld [vmem:[#allocation2 + $0x1] sm:$0xff] }
 0x109   : > { %v843_v31 = vmax.f32 %v564_v22, %v781_v23 }
 0x10a   : > { %v1340_v28 = vmax.f32 %v1091_v21, %v1276_v17 }
 0x10b   : > { %603 = vmatmul.bf16.gmra.mxu0 %v5789_v14  ;;  %820 = vmatmul.bf16.gmra.mxu1 %v5813_v15  ;;  %v1547_v14 = vpack.c.bf16 %v1520_v5, %v1519_v12  ;;  %v1832_v15 = vld [vmem:[#allocation2 + $0x2] sm:$0xff] }
 0x10c   : > { %v1376_v29 = vadd.f32 %v6160_v51, %v1340_v28  ;;  %1069 = vmatmul.bf16.gmra.mxu2 %v5829_v24  ;;  %1318 = vmatmul.bf16.gmra.mxu3 %v5845_v25  ;;  %v1860_v17 = vpack.c.bf16 %v1833_v8, %v1832_v15 }
 0x10e   : > { %v1408_v30 = vmax.f32 %v1376_v29, 0.0 }
 0x10f   : > { %v1030_v32 = vpop.f32.mrf.mxu2  ;;  %v1279_v33 = vpop.f32.mrf.mxu3 }
 0x110   : > { %1440 = vst [vmem:[#allocation2 + $0x58] sm:$0xff] %v1408_v30  ;;  %v1092_v34 = vmax.f32 %v843_v31, %v1030_v32  ;;  %v566_v35 = vpop.f32.mrf.mxu0  ;;  %v783_v37 = vpop.f32.mrf.mxu1  ;;  %v6301_v38 = vpack.c.bf16 %v1408_v30, %v1407_v11  ;;  %v1522_v31 = vld [vmem:[#allocation2 + $0x19] sm:$0xff] }
 0x111   : > { %v844_v42 = vmax.f32 %v566_v35, %v783_v37 }
 0x112   : > { %v1341_v39 = vmax.f32 %v1092_v34, %v1279_v33  ;;  %v1835_v34 = vld [vmem:[#allocation2 + $0x1a] sm:$0xff] }
 0x114   : > { %v1377_v40 = vadd.f32 %v6160_v51, %v1341_v39 }
 0x116   : > { %v1409_v41 = vmax.f32 %v1377_v40, 0.0  ;;  %v1521_v40 = vld [vmem:[#allocation2 + $0x11] sm:$0xff] }
 0x117   : > { %v1032_v43 = vpop.f32.mrf.mxu2  ;;  %v1281_v44 = vpop.f32.mrf.mxu3 }
 0x118   : > { %1441 = vst [vmem:[#allocation2 + $0x60] sm:$0xff] %v1409_v41  ;;  %v1093_v47 = vmax.f32 %v844_v42, %v1032_v43  ;;  %v569_v48 = vpop.f32.mrf.mxu0  ;;  %v786_v49 = vpop.f32.mrf.mxu1  ;;  %v1834_v42 = vld [vmem:[#allocation2 + $0x12] sm:$0xff] }
 0x119   : > { %v845_v56 = vmax.f32 %v569_v48, %v786_v49 }
 0x11a   : > { %v1342_v53 = vmax.f32 %v1093_v47, %v1281_v44  ;;  %v1861_v44 = vpack.c.bf16 %v1835_v34, %v1834_v42 }
 0x11b   : > { %608 = vmatmul.bf16.gmra.mxu0 %v5790_v45  ;;  %825 = vmatmul.bf16.gmra.mxu1 %v5814_v46 }
 0x11c   : > { %v1378_v54 = vadd.f32 %v6160_v51, %v1342_v53  ;;  %1074 = vmatmul.bf16.gmra.mxu2 %v5830_v50  ;;  %1323 = vmatmul.bf16.gmra.mxu3 %v5846_v52 }
 0x11e   : > { %v1410_v55 = vmax.f32 %v1378_v54, 0.0 }
 0x11f   : > { %v1035_v57 = vpop.f32.mrf.mxu2  ;;  %v1284_v58 = vpop.f32.mrf.mxu3 }
 0x120   : > { %1442 = vst [vmem:[#allocation2 + $0x68] sm:$0xff] %v1410_v55  ;;  %v1094_v59 = vmax.f32 %v845_v56, %v1035_v57  ;;  %v571_v60 = vpop.f32.mrf.mxu0  ;;  %v788_v62 = vpop.f32.mrf.mxu1  ;;  %v6309_v63 = vpack.c.bf16 %v1410_v55, %v1409_v41  ;;  %v1548_v41 = vpack.c.bf16 %v1522_v31, %v1521_v40 }
 0x121   : > { %v846_v3 = vmax.f32 %v571_v60, %v788_v62  ;;  %v1837_v62 = vld [vmem:[#allocation2 + $0x2a] sm:$0xff] }
 0x122   : > { %v1343_v0 = vmax.f32 %v1094_v59, %v1284_v58  ;;  %v1524_v58 = vld [vmem:[#allocation2 + $0x29] sm:$0xff] }
 0x124   : > { %v1379_v1 = vadd.f32 %v6160_v51, %v1343_v0 }
 0x126   : > { %v1411_v2 = vmax.f32 %v1379_v1, 0.0 }
 0x127   : > { %v1037_v6 = vpop.f32.mrf.mxu2  ;;  %v1286_v7 = vpop.f32.mrf.mxu3 }
 0x128   : > { %1443 = vst [vmem:[#allocation2 + $0x70] sm:$0xff] %v1411_v2  ;;  %v1095_v9 = vmax.f32 %v846_v3, %v1037_v6  ;;  %v574_v10 = vpop.f32.mrf.mxu0  ;;  %v791_v11 = vpop.f32.mrf.mxu1  ;;  %v1523_v3 = vld [vmem:[#allocation2 + $0x21] sm:$0xff] }
 0x129   : > { %v847_v20 = vmax.f32 %v574_v10, %v791_v11  ;;  %v1549_v5 = vpack.c.bf16 %v1524_v58, %v1523_v3  ;;  %v1836_v6 = vld [vmem:[#allocation2 + $0x22] sm:$0xff] }
 0x12a   : > { %v1344_v16 = vmax.f32 %v1095_v9, %v1286_v7  ;;  %v1862_v8 = vpack.c.bf16 %v1837_v62, %v1836_v6 }
 0x12b   : > { %1634 = vmatmul.bf16.vlgmr.msrb.gmra.mxu0 %v1547_v14  ;;  %1761 = vmatmul.bf16.vlgmr.msrb.gmra.mxu1 %v6171_v13 }
 0x12c   : > { %v1380_v18 = vadd.f32 %v6160_v51, %v1344_v16  ;;  %1947 = vmatmul.bf16.vlgmr.msrb.gmra.mxu2 %v1860_v17  ;;  %2161 = vmatmul.bf16.vlgmr.msrb.gmra.mxu3 %v6179_v36 }
 0x12e   : > { %v1412_v19 = vmax.f32 %v1380_v18, 0.0 }
 0x12f   : > { %v1040_v21 = vpop.f32.mrf.mxu2  ;;  %v1289_v22 = vpop.f32.mrf.mxu3 }
 0x130   : > { %1444 = vst [vmem:[#allocation2 + $0x78] sm:$0xff] %v1412_v19  ;;  %v1096_v23 = vmax.f32 %v847_v20, %v1040_v21  ;;  %v576_v24 = vpop.f32.mrf.mxu0  ;;  %v793_v25 = vpop.f32.mrf.mxu1  ;;  %v6315_v26 = vpack.c.bf16 %v1412_v19, %v1411_v2 }
 0x131   : > { %v848_v13 = vmax.f32 %v576_v24, %v793_v25  ;;  %v1839_v25 = vld [vmem:[#allocation2 + $0x3a] sm:$0xff] }
 0x132   : > { %v1345_v28 = vmax.f32 %v1096_v23, %v1289_v22  ;;  %v1526_v22 = vld [vmem:[#allocation2 + $0x39] sm:$0xff] }
 0x134   : > { %v1381_v29 = vadd.f32 %v6160_v51, %v1345_v28 }
 0x136   : > { %v1413_v30 = vmax.f32 %v1381_v29, 0.0 }
 0x137   : > { %v1042_v32 = vpop.f32.mrf.mxu2  ;;  %v1291_v33 = vpop.f32.mrf.mxu3 }
 0x138   : > { %1445 = vst [vmem:[#allocation2 + $0x80] sm:$0xff] %v1413_v30  ;;  %v1097_v35 = vmax.f32 %v848_v13, %v1042_v32  ;;  %v579_v37 = vpop.f32.mrf.mxu0  ;;  %v796_v39 = vpop.f32.mrf.mxu1  ;;  %v1525_v13 = vld [vmem:[#allocation2 + $0x31] sm:$0xff] }
 0x139   : > { %v849_v47 = vmax.f32 %v579_v37, %v796_v39  ;;  %v1550_v31 = vpack.c.bf16 %v1526_v22, %v1525_v13  ;;  %v1838_v32 = vld [vmem:[#allocation2 + $0x32] sm:$0xff] }
 0x13a   : > { %v1346_v43 = vmax.f32 %v1097_v35, %v1291_v33  ;;  %v1863_v34 = vpack.c.bf16 %v1839_v25, %v1838_v32 }
 0x13b   : > { %1639 = vmatmul.bf16.gmra.mxu0 %v1548_v41  ;;  %1766 = vmatmul.bf16.gmra.mxu1 %v6179_v36 }
 0x13c   : > { %v1382_v45 = vadd.f32 %v6160_v51, %v1346_v43  ;;  %1952 = vmatmul.bf16.gmra.mxu2 %v1861_v44  ;;  %2166 = vmatmul.bf16.gmra.mxu3 %v6190_v61 }
 0x13e   : > { %v1414_v46 = vmax.f32 %v1382_v45, 0.0 }
 0x13f   : > { %v1045_v48 = vpop.f32.mrf.mxu2  ;;  %v1294_v49 = vpop.f32.mrf.mxu3 }
 0x140   : > { %1446 = vst [vmem:[#allocation2 + $0x88] sm:$0xff] %v1414_v46  ;;  %v1098_v50 = vmax.f32 %v849_v47, %v1045_v48  ;;  %v581_v52 = vpop.f32.mrf.mxu0  ;;  %v798_v53 = vpop.f32.mrf.mxu1  ;;  %v6321_v54 = vpack.c.bf16 %v1414_v46, %v1413_v30 }
 0x141   : > { %v850_v36 = vmax.f32 %v581_v52, %v798_v53  ;;  %v1841_v53 = vld [vmem:[#allocation2 + $0x4a] sm:$0xff] }
 0x142   : > { %v1347_v55 = vmax.f32 %v1098_v50, %v1294_v49  ;;  %v1528_v49 = vld [vmem:[#allocation2 + $0x49] sm:$0xff] }
 0x144   : > { %v1383_v56 = vadd.f32 %v6160_v51, %v1347_v55 }
 0x146   : > { %v1415_v57 = vmax.f32 %v1383_v56, 0.0 }
 0x147   : > { %v1047_v59 = vpop.f32.mrf.mxu2  ;;  %v1296_v60 = vpop.f32.mrf.mxu3 }
 0x148   : > { %1447 = vst [vmem:[#allocation2 + $0x90] sm:$0xff] %v1415_v57  ;;  %v1099_v0 = vmax.f32 %v850_v36, %v1047_v59  ;;  %v584_v1 = vpop.f32.mrf.mxu0  ;;  %v801_v2 = vpop.f32.mrf.mxu1  ;;  %v1527_v36 = vld [vmem:[#allocation2 + $0x41] sm:$0xff] }
 0x149   : > { %v851_v11 = vmax.f32 %v584_v1, %v801_v2  ;;  %v1551_v58 = vpack.c.bf16 %v1528_v49, %v1527_v36  ;;  %v1840_v59 = vld [vmem:[#allocation2 + $0x42] sm:$0xff] }
 0x14a   : > { %v1348_v7 = vmax.f32 %v1099_v0, %v1296_v60  ;;  %v1864_v62 = vpack.c.bf16 %v1841_v53, %v1840_v59 }
 0x14b   : > { %1644 = vmatmul.bf16.gmra.mxu0 %v1549_v5  ;;  %1771 = vmatmul.bf16.gmra.mxu1 %v6190_v61 }
 0x14c   : > { %v1384_v9 = vadd.f32 %v6160_v51, %v1348_v7  ;;  %1957 = vmatmul.bf16.gmra.mxu2 %v1862_v8  ;;  %2171 = vmatmul.bf16.gmra.mxu3 %v6216_v27 }
 0x14e   : > { %v1416_v10 = vmax.f32 %v1384_v9, 0.0 }
 0x14f   : > { %v1050_v12 = vpop.f32.mrf.mxu2  ;;  %v1299_v14 = vpop.f32.mrf.mxu3 }
 0x150   : > { %1448 = vst [vmem:[#allocation2 + $0x98] sm:$0xff] %v1416_v10  ;;  %v1100_v15 = vmax.f32 %v851_v11, %v1050_v12  ;;  %v586_v16 = vpop.f32.mrf.mxu0  ;;  %v803_v17 = vpop.f32.mrf.mxu1  ;;  %v6327_v18 = vpack.c.bf16 %v1416_v10, %v1415_v57 }
 0x151   : > { %v852_v61 = vmax.f32 %v586_v16, %v803_v17  ;;  %v1843_v17 = vld [vmem:[#allocation2 + $0x5a] sm:$0xff] }
 0x152   : > { %v1349_v19 = vmax.f32 %v1100_v15, %v1299_v14  ;;  %v1530_v14 = vld [vmem:[#allocation2 + $0x59] sm:$0xff] }
 0x154   : > { %v1385_v20 = vadd.f32 %v6160_v51, %v1349_v19 }
 0x156   : > { %v1417_v21 = vmax.f32 %v1385_v20, 0.0 }
 0x157   : > { %v1052_v23 = vpop.f32.mrf.mxu2  ;;  %v1301_v24 = vpop.f32.mrf.mxu3 }
 0x158   : > { %1449 = vst [vmem:[#allocation2 + $0xa0] sm:$0xff] %v1417_v21  ;;  %v1101_v28 = vmax.f32 %v852_v61, %v1052_v23  ;;  %v589_v29 = vpop.f32.mrf.mxu0  ;;  %v806_v30 = vpop.f32.mrf.mxu1  ;;  %v1529_v61 = vld [vmem:[#allocation2 + $0x51] sm:$0xff] }
 0x159   : > { %v853_v39 = vmax.f32 %v589_v29, %v806_v30  ;;  %v1552_v22 = vpack.c.bf16 %v1530_v14, %v1529_v61  ;;  %v1842_v23 = vld [vmem:[#allocation2 + $0x52] sm:$0xff] }
 0x15a   : > { %v1350_v33 = vmax.f32 %v1101_v28, %v1301_v24  ;;  %v1865_v25 = vpack.c.bf16 %v1843_v17, %v1842_v23 }
 0x15b   : > { %1649 = vmatmul.bf16.gmra.mxu0 %v1550_v31  ;;  %1776 = vmatmul.bf16.gmra.mxu1 %v6216_v27 }
 0x15c   : > { %v1386_v35 = vadd.f32 %v6160_v51, %v1350_v33  ;;  %1962 = vmatmul.bf16.gmra.mxu2 %v1863_v34  ;;  %2176 = vmatmul.bf16.gmra.mxu3 %v6269_v4 }
 0x15e   : > { %v1418_v37 = vmax.f32 %v1386_v35, 0.0 }
 0x15f   : > { %v1055_v40 = vpop.f32.mrf.mxu2  ;;  %v1304_v41 = vpop.f32.mrf.mxu3 }
 0x160   : > { %1450 = vst [vmem:[#allocation2 + $0xa8] sm:$0xff] %v1418_v37  ;;  %v1102_v42 = vmax.f32 %v853_v39, %v1055_v40  ;;  %v591_v43 = vpop.f32.mrf.mxu0  ;;  %v808_v44 = vpop.f32.mrf.mxu1  ;;  %v6333_v45 = vpack.c.bf16 %v1418_v37, %v1417_v21 }
 0x161   : > { %v854_v27 = vmax.f32 %v591_v43, %v808_v44  ;;  %v1845_v44 = vld [vmem:[#allocation2 + $0x6a] sm:$0xff] }
 0x162   : > { %v1351_v46 = vmax.f32 %v1102_v42, %v1304_v41  ;;  %v1532_v41 = vld [vmem:[#allocation2 + $0x69] sm:$0xff] }
 0x164   : > { %v1387_v47 = vadd.f32 %v6160_v51, %v1351_v46 }
 0x166   : > { %v1419_v48 = vmax.f32 %v1387_v47, 0.0 }
 0x167   : > { %v1057_v50 = vpop.f32.mrf.mxu2  ;;  %v1306_v52 = vpop.f32.mrf.mxu3 }
 0x168   : > { %1451 = vst [vmem:[#allocation2 + $0xb0] sm:$0xff] %v1419_v48  ;;  %v1103_v55 = vmax.f32 %v854_v27, %v1057_v50  ;;  %v594_v56 = vpop.f32.mrf.mxu0  ;;  %v811_v57 = vpop.f32.mrf.mxu1  ;;  %v1531_v27 = vld [vmem:[#allocation2 + $0x61] sm:$0xff] }
 0x169   : > { %v855_v2 = vmax.f32 %v594_v56, %v811_v57  ;;  %v6351_v49 = vpack.c.bf16 %v1532_v41, %v1531_v27  ;;  %v1844_v50 = vld [vmem:[#allocation2 + $0x62] sm:$0xff] }
 0x16a   : > { %v1352_v60 = vmax.f32 %v1103_v55, %v1306_v52  ;;  %v1866_v53 = vpack.c.bf16 %v1845_v44, %v1844_v50  ;;  %v1535_v41 = vld [vmem:[#allocation2 + $0x81] sm:$0xff] }
 0x16b   : > { %1654 = vmatmul.bf16.gmra.mxu0 %v1551_v58  ;;  %1781 = vmatmul.bf16.gmra.mxu1 %v6269_v4  ;;  %v1848_v44 = vld [vmem:[#allocation2 + $0x82] sm:$0xff] }
 0x16c   : > { %v1388_v0 = vadd.f32 %v6160_v51, %v1352_v60  ;;  %1967 = vmatmul.bf16.gmra.mxu2 %v1864_v62  ;;  %2181 = vmatmul.bf16.gmra.mxu3 %v6301_v38 }
 0x16e   : > { %v1420_v1 = vmax.f32 %v1388_v0, 0.0 }
 0x16f   : > { %v1060_v3 = vpop.f32.mrf.mxu2  ;;  %v1309_v5 = vpop.f32.mrf.mxu3 }
 0x170   : > { %1452 = vst [vmem:[#allocation2 + $0xb8] sm:$0xff] %v1420_v1  ;;  %v1104_v6 = vmax.f32 %v855_v2, %v1060_v3  ;;  %v596_v7 = vpop.f32.mrf.mxu0  ;;  %v813_v8 = vpop.f32.mrf.mxu1  ;;  %v6339_v9 = vpack.c.bf16 %v1420_v1, %v1419_v48 }
 0x171   : > { %v856_v4 = vmax.f32 %v596_v7, %v813_v8  ;;  %v1847_v8 = vld [vmem:[#allocation2 + $0x7a] sm:$0xff] }
 0x172   : > { %v1353_v10 = vmax.f32 %v1104_v6, %v1309_v5  ;;  %v1534_v5 = vld [vmem:[#allocation2 + $0x79] sm:$0xff] }
 0x174   : > { %v1389_v11 = vadd.f32 %v6160_v51, %v1353_v10 }
 0x176   : > { %v1421_v12 = vmax.f32 %v1389_v11, 0.0 }
 0x177   : > { %v1062_v15 = vpop.f32.mrf.mxu2  ;;  %v1311_v16 = vpop.f32.mrf.mxu3 }
 0x178   : > { %1453 = vst [vmem:[#allocation2 + $0xc0] sm:$0xff] %v1421_v12  ;;  %v1105_v19 = vmax.f32 %v856_v4, %v1062_v15  ;;  %v599_v20 = vpop.f32.mrf.mxu0  ;;  %v816_v21 = vpop.f32.mrf.mxu1  ;;  %v1533_v4 = vld [vmem:[#allocation2 + $0x71] sm:$0xff] }
 0x179   : > { %v857_v30 = vmax.f32 %v599_v20, %v816_v21  ;;  %v6366_v14 = vpack.c.bf16 %v1534_v5, %v1533_v4  ;;  %v1846_v15 = vld [vmem:[#allocation2 + $0x72] sm:$0xff] }
 0x17a   : > { %v1354_v24 = vmax.f32 %v1105_v19, %v1311_v16  ;;  %v1867_v17 = vpack.c.bf16 %v1847_v8, %v1846_v15  ;;  %v5886_v20 = vld [vmem:[%s7255_s3 + $0x138] sm:$0xff] }
 0x17b   : > { %1659 = vmatmul.bf16.gmra.mxu0 %v1552_v22  ;;  %1786 = vmatmul.bf16.gmra.mxu1 %v6301_v38  ;;  %v1537_v5 = vld [vmem:[#allocation2 + $0x91] sm:$0xff] }
 0x17c   : > { %v1390_v28 = vadd.f32 %v6160_v51, %v1354_v24  ;;  %1972 = vmatmul.bf16.gmra.mxu2 %v1865_v25  ;;  %2186 = vmatmul.bf16.gmra.mxu3 %v6309_v63  ;;  %v1850_v8 = vld [vmem:[#allocation2 + $0x92] sm:$0xff] }
 0x17d   : > { %2367 = vmatpush.bf16.msra.mxu0 %v5886_v20 }
 0x17e   : > { %v1422_v29 = vmax.f32 %v1390_v28, 0.0 }
 0x17f   : > { %v1065_v13 = vpop.f32.mrf.mxu2  ;;  %v1314_v31 = vpop.f32.mrf.mxu3 }
 0x180   : > { %1454 = vst [vmem:[#allocation2 + $0xc8] sm:$0xff] %v1422_v29  ;;  %v1106_v32 = vmax.f32 %v857_v30, %v1065_v13  ;;  %v601_v33 = vpop.f32.mrf.mxu0  ;;  %v818_v34 = vpop.f32.mrf.mxu1  ;;  %v6345_v35 = vpack.c.bf16 %v1422_v29, %v1421_v12 }
 0x181   : > { %v858_v38 = vmax.f32 %v601_v33, %v818_v34  ;;  %v1849_v34 = vld [vmem:[#allocation2 + $0x8a] sm:$0xff] }
 0x182   : > { %v1355_v37 = vmax.f32 %v1106_v32, %v1314_v31  ;;  %v1536_v31 = vld [vmem:[#allocation2 + $0x89] sm:$0xff] }
 0x184   : > { %v1391_v39 = vadd.f32 %v6160_v51, %v1355_v37 }
 0x186   : > { %v6348_v40 = vmax.f32 %v1391_v39, 0.0 }
 0x187   : > { %v1067_v42 = vpop.f32.mrf.mxu2  ;;  %v1316_v43 = vpop.f32.mrf.mxu3 }
 0x188   : > { %1455 = vst [vmem:[#allocation2 + $0xd0] sm:$0xff] %v6348_v40  ;;  %v1107_v46 = vmax.f32 %v858_v38, %v1067_v42  ;;  %v604_v47 = vpop.f32.mrf.mxu0  ;;  %v821_v48 = vpop.f32.mrf.mxu1 }
 0x189   : > { %v859_v57 = vmax.f32 %v604_v47, %v821_v48  ;;  %v1868_v47 = vpack.c.bf16 %v1849_v34, %v1848_v44  ;;  %v5910_v34 = vld [vmem:[%s7255_s3 + $0x1f8] sm:$0xff]  ;;  %v5901_v44 = vld [vmem:[%s7255_s3 + $0x1b0] sm:$0xff] }
 0x18a   : > { %v1356_v52 = vmax.f32 %v1107_v46, %v1316_v43  ;;  %v6378_v43 = vpack.c.bf16 %v1536_v31, %v1535_v41  ;;  %3009 = vmatpush.bf16.msra.mxu3 %v5910_v34  ;;  %v5904_v34 = vld [vmem:[%s7255_s3 + $0x1c8] sm:$0xff] }
 0x18b   : > { %1664 = vmatmul.bf16.gmra.mxu0 %v6351_v49  ;;  %1791 = vmatmul.bf16.gmra.mxu1 %v6309_v63 }
 0x18c   : > { %v1392_v55 = vadd.f32 %v6160_v51, %v1356_v52  ;;  %1977 = vmatmul.bf16.gmra.mxu2 %v1866_v53  ;;  %2191 = vmatmul.bf16.gmra.mxu3 %v6315_v26 }
 0x18e   : > { %v1424_v56 = vmax.f32 %v1392_v55, 0.0 }
 0x18f   : > { %v1070_v36 = vpop.f32.mrf.mxu2  ;;  %v1319_v58 = vpop.f32.mrf.mxu3 }
 0x190   : > { %1456 = vst [vmem:[#allocation2 + $0xd8] sm:$0xff] %v1424_v56  ;;  %v1108_v59 = vmax.f32 %v859_v57, %v1070_v36  ;;  %v606_v60 = vpop.f32.mrf.mxu0  ;;  %v823_v62 = vpop.f32.mrf.mxu1  ;;  %v6358_v0 = vpack.c.bf16 %v1424_v56, %v6348_v40 }
 0x191   : > { %v860_v3 = vmax.f32 %v606_v60, %v823_v62  ;;  %v1851_v62 = vld [vmem:[#allocation2 + $0x9a] sm:$0xff] }
 0x192   : > { %v1357_v1 = vmax.f32 %v1108_v59, %v1319_v58  ;;  %v1538_v58 = vld [vmem:[#allocation2 + $0x99] sm:$0xff] }
 0x194   : > { %v6361_v2 = vadd.f32 %v6160_v51, %v1357_v1 }
 0x196   : > { %v1425_v63 = vmax.f32 %v6361_v2, 0.0 }
 0x197   : > { %v1072_v6 = vpop.f32.mrf.mxu2  ;;  %v1321_v7 = vpop.f32.mrf.mxu3 }
 0x198   : > { %1457 = vst [vmem:[#allocation2 + $0xe0] sm:$0xff] %v1425_v63  ;;  %v1109_v10 = vmax.f32 %v860_v3, %v1072_v6  ;;  %v609_v11 = vpop.f32.mrf.mxu0  ;;  %v826_v12 = vpop.f32.mrf.mxu1 }
 0x199   : > { %v861_v61 = vmax.f32 %v609_v11, %v826_v12  ;;  %v1869_v11 = vpack.c.bf16 %v1851_v62, %v1850_v8  ;;  %v5885_v12 = vld [vmem:[%s7255_s3 + $0x130] sm:$0xff] }
 0x19a   : > { %v1358_v16 = vmax.f32 %v1109_v10, %v1321_v7  ;;  %v6385_v7 = vpack.c.bf16 %v1538_v58, %v1537_v5  ;;  %2368 = vmatpush.bf16.msra.mxu0 %v5885_v12  ;;  %v1855_v58 = vld [vmem:[#allocation2 + $0xba] sm:$0xff]  ;;  %v1854_v8 = vld [vmem:[#allocation2 + $0xb2] sm:$0xff] }
 0x19b   : > { %1669 = vmatmul.bf16.gmra.mxu0 %v6366_v14  ;;  %1796 = vmatmul.bf16.gmra.mxu1 %v6315_v26  ;;  %v5907_v12 = vld [vmem:[%s7255_s3 + $0x1e0] sm:$0xff] }
 0x19c   : > { %v1394_v19 = vadd.f32 %v6160_v51, %v1358_v16  ;;  %1982 = vmatmul.bf16.gmra.mxu2 %v1867_v17  ;;  %2196 = vmatmul.bf16.gmra.mxu3 %v6321_v54  ;;  %v6015_v51 = vld [vmem:[%s7254_s2] ss:$0 sm:$0xff] }
 0x19e   : > { %v1426_v21 = vmax.f32 %v1394_v19, 0.0 }
 0x19f   : > { %v1075_v22 = vpop.f32.mrf.mxu2  ;;  %v1324_v23 = vpop.f32.mrf.mxu3 }
 0x1a0   : > { %1458 = vst [vmem:[#allocation2 + $0xe8] sm:$0xff] %v1426_v21  ;;  %v1110_v24 = vmax.f32 %v861_v61, %v1075_v22  ;;  %v611_v25 = vpop.f32.mrf.mxu0  ;;  %v828_v28 = vpop.f32.mrf.mxu1  ;;  %v1540_v61 = vld [vmem:[#allocation2 + $0xa9] sm:$0xff] }
 0x1a1   : > { %v862_v13 = vmax.f32 %v611_v25, %v828_v28 }
 0x1a2   : > { %v1359_v29 = vmax.f32 %v1110_v24, %v1324_v23  ;;  %v1853_v24 = vld [vmem:[#allocation2 + $0xaa] sm:$0xff] }
 0x1a4   : > { %v1395_v26 = vadd.f32 %v6015_v51, %v1359_v29 }
 0x1a6   : > { %v1427_v30 = vmax.f32 %v1395_v26, 0.0 }
 0x1a7   : > { %v1077_v32 = vpop.f32.mrf.mxu2  ;;  %v1326_v33 = vpop.f32.mrf.mxu3 }
 0x1a8   : > { %1459 = vst [vmem:[#allocation2 + $0xf0] sm:$0xff] %v1427_v30  ;;  %v1111_v37 = vmax.f32 %v862_v13, %v1077_v32  ;;  %v1635_v39 = vpop.f32.mrf.mxu0  ;;  %v1762_v38 = vpop.f32.mrf.mxu1  ;;  %v1852_v30 = vld [vmem:[#allocation2 + $0xa2] sm:$0xff]  ;;  %v5894_v32 = vld [vmem:[%s7255_s3 + $0x178] sm:$0xff] }
 0x1a9   : > { %v1763_v42 = vadd.f32 %v1762_v38, %v1635_v39  ;;  %v1870_v31 = vpack.c.bf16 %v1853_v24, %v1852_v30  ;;  %2581 = vmatpush.bf16.msra.mxu1 %v5894_v32  ;;  %v5888_v32 = vld [vmem:[%s7255_s3 + $0x148] sm:$0xff] }
 0x1aa   : > { %v1360_v46 = vmax.f32 %v1111_v37, %v1326_v33  ;;  %v5902_v33 = vld [vmem:[%s7255_s3 + $0x1b8] sm:$0xff] }
 0x1ab   : > { %1674 = vmatmul.bf16.gmra.mxu0 %v6378_v43  ;;  %1801 = vmatmul.bf16.gmra.mxu1 %v6321_v54 }
 0x1ac   : > { %v1396_v48 = vadd.f32 %v6015_v51, %v1360_v46  ;;  %1987 = vmatmul.bf16.gmra.mxu2 %v1868_v47  ;;  %2201 = vmatmul.bf16.gmra.mxu3 %v6327_v18  ;;  %v5909_v46 = vld [vmem:[%s7255_s3 + $0x1f0] sm:$0xff] }
 0x1ad   : > { %2795 = vmatpush.bf16.msra.mxu2 %v5902_v33  ;;  %3010 = vmatpush.bf16.msra.mxu3 %v5909_v46  ;;  %v5896_v33 = vld [vmem:[%s7255_s3 + $0x188] sm:$0xff] }
 0x1ae   : > { %v1428_v27 = vmax.f32 %v1396_v48, 0.0  ;;  %v1543_v46 = vld [vmem:[#allocation2 + $0xc1] sm:$0xff] }
 0x1af   : > { %v1948_v50 = vpop.f32.mrf.mxu2  ;;  %v2162_v52 = vpop.f32.mrf.mxu3 }
 0x1b0   : > { %1460 = vst [vmem:[#allocation2 + $0xf8] sm:$0xff] %v1428_v27  ;;  %v2018_v53 = vadd.f32 %v1948_v50, %v1763_v42  ;;  %v1637_v55 = vpop.f32.mrf.mxu0  ;;  %v1764_v56 = vpop.f32.mrf.mxu1  ;;  %v5893_v42 = vld [vmem:[%s7255_s3 + $0x170] sm:$0xff]  ;;  %v5884_v27 = vld [vmem:[%s7255_s3 + $0x128] sm:$0xff] }
 0x1b1   : > { %v1765_v57 = vadd.f32 %v1764_v56, %v1637_v55  ;;  %2582 = vmatpush.bf16.msra.mxu1 %v5893_v42  ;;  %2796 = vmatpush.bf16.msra.mxu2 %v5901_v44  ;;  %v5892_v50 = vld [vmem:[%s7255_s3 + $0x168] sm:$0xff]  ;;  %v1542_v55 = vld [vmem:[#allocation2 + $0xb9] sm:$0xff] }
 0x1b2   : > { %v6383_v36 = vadd.f32 %v2162_v52, %v2018_v53  ;;  %v5900_v52 = vld [vmem:[%s7255_s3 + $0x1a8] sm:$0xff]  ;;  %2369 = vmatpush.bf16.msra.mxu0 %v5884_v27  ;;  %v5887_v27 = vld [vmem:[%s7255_s3 + $0x140] sm:$0xff] }
 0x1b3   : > { %v5908_v53 = vld [vmem:[%s7255_s3 + $0x1e8] sm:$0xff] }
 0x1b4   : > { %3011 = vmatpush.bf16.msra.mxu3 %v5908_v53  ;;  %v1856_v53 = vld [vmem:[#allocation2 + $0xc2] sm:$0xff] }
 0x1b5   : > { %2583 = vmatpush.bf16.msra.mxu1 %v5892_v50  ;;  %2797 = vmatpush.bf16.msra.mxu2 %v5900_v52 }
 0x1b7   : > { %v1950_v59 = vpop.f32.mrf.mxu2  ;;  %v2164_v60 = vpop.f32.mrf.mxu3 }
 0x1b8   : > { %v2019_v1 = vadd.f32 %v1950_v59, %v1765_v57  ;;  %v1640_v54 = vpop.f32.mrf.mxu0  ;;  %v1767_v3 = vpop.f32.mrf.mxu1  ;;  %3012 = vmatpush.bf16.msra.mxu3 %v5907_v12  ;;  %v1488_v12 = vld [vmem:[#allocation2 + $0xd8] sm:$0x3f] }
 0x1b9   : > { %v1768_v6 = vadd.f32 %v1767_v3, %v1640_v54  ;;  %v5883_v54 = vld [vmem:[%s7255_s3 + $0x120] sm:$0xff] }
 0x1ba   : > { %v6387_v10 = vadd.f32 %v2164_v60, %v2019_v1  ;;  %v1541_v1 = vld [vmem:[#allocation2 + $0xb1] sm:$0xff]  ;;  %v5891_v3 = vld [vmem:[%s7255_s3 + $0x160] sm:$0xff]  ;;  %2370 = vmatpush.bf16.msra.mxu0 %v5883_v54 }
 0x1bb   : > { %1679 = vmatmul.bf16.gmra.mxu0 %v6385_v7  ;;  %1806 = vmatmul.bf16.gmra.mxu1 %v6327_v18  ;;  %v1539_v18 = vld [vmem:[#allocation2 + $0xa1] sm:$0xff] }
 0x1bc   : > { %1992 = vmatmul.bf16.gmra.mxu2 %v1869_v11  ;;  %2206 = vmatmul.bf16.gmra.mxu3 %v6333_v45  ;;  %v6397_v26 = vpack.c.bf16 %v1540_v61, %v1539_v18  ;;  %v5899_v11 = vld [vmem:[%s7255_s3 + $0x1a0] sm:$0xff]  ;;  %v5897_v18 = vld [vmem:[%s7255_s3 + $0x190] sm:$0xff] }
 0x1bd   : > { %2584 = vmatpush.bf16.msra.mxu1 %v5891_v3  ;;  %2798 = vmatpush.bf16.msra.mxu2 %v5899_v11  ;;  %v1546_v11 = vld [vmem:[#allocation2 + $0xd9] sm:$0x3f] }
 0x1bf   : > { %v1953_v4 = vpop.f32.mrf.mxu2  ;;  %v2167_v15 = vpop.f32.mrf.mxu3 }
 0x1c0   : > { %v2020_v16 = vadd.f32 %v1953_v4, %v1768_v6  ;;  %v1642_v17 = vpop.f32.mrf.mxu0  ;;  %v1769_v19 = vpop.f32.mrf.mxu1  ;;  %v6442_v6 = vpack.c.bf16 %v1542_v55, %v1541_v1  ;;  %v5895_v55 = vld [vmem:[%s7255_s3 + $0x180] sm:$0xff] }
 0x1c1   : > { %v1770_v20 = vadd.f32 %v1769_v19, %v1642_v17  ;;  %v5890_v17 = vld [vmem:[%s7255_s3 + $0x158] sm:$0xff] }
 0x1c2   : > { %v6395_v21 = vadd.f32 %v2167_v15, %v2020_v16  ;;  %v1871_v15 = vpack.c.bf16 %v1855_v58, %v1854_v8  ;;  %v5882_v16 = vld [vmem:[%s7255_s3 + $0x118] sm:$0xff]  ;;  %2585 = vmatpush.bf16.msra.mxu1 %v5890_v17 }
 0x1c3   : > { %v5898_v19 = vld [vmem:[%s7255_s3 + $0x198] sm:$0xff]  ;;  %2371 = vmatpush.bf16.msra.mxu0 %v5882_v16 }
 0x1c4   : > { %2799 = vmatpush.bf16.msra.mxu2 %v5898_v19  ;;  %v6514_v8 = vld [vmem:[#allocation2 + $0xd1] sm:$0xff]  ;;  %v1859_v17 = vld [vmem:[#allocation2 + $0xda] sm:$0x3f] }
 0x1c7   : > { %v1955_v22 = vpop.f32.mrf.mxu2  ;;  %v2169_v23 = vpop.f32.mrf.mxu3 }
 0x1c8   : > { %v2021_v25 = vadd.f32 %v1955_v22, %v1770_v20  ;;  %v1645_v28 = vpop.f32.mrf.mxu0  ;;  %v1772_v29 = vpop.f32.mrf.mxu1  ;;  %2800 = vmatpush.bf16.msra.mxu2 %v5897_v18 }
 0x1c9   : > { %v1773_v51 = vadd.f32 %v1772_v29, %v1645_v28  ;;  %v5889_v28 = vld [vmem:[%s7255_s3 + $0x150] sm:$0xff] }
 0x1ca   : > { %v6399_v13 = vadd.f32 %v2169_v23, %v2021_v25  ;;  %v5881_v25 = vld [vmem:[%s7255_s3 + $0x110] sm:$0xff]  ;;  %2586 = vmatpush.bf16.msra.mxu1 %v5889_v28 }
 0x1cb   : > { %1684 = vmatmul.bf16.gmra.mxu0 %v6397_v26  ;;  %1811 = vmatmul.bf16.gmra.mxu1 %v6333_v45 }
 0x1cc   : > { %1997 = vmatmul.bf16.gmra.mxu2 %v1870_v31  ;;  %2211 = vmatmul.bf16.gmra.mxu3 %v6339_v9  ;;  %v5880_v31 = vld [vmem:[%s7255_s3 + $0x108] sm:$0xff] }
 0x1cd   : > { %2372 = vmatpush.bf16.msra.mxu0 %v5881_v25  ;;  %2801 = vmatpush.bf16.msra.mxu2 %v5896_v33 }
 0x1ce   : > { %2587 = vmatpush.bf16.msra.mxu1 %v5888_v32 }
 0x1cf   : > { %v1958_v37 = vpop.f32.mrf.mxu2  ;;  %v2172_v39 = vpop.f32.mrf.mxu3 }
 0x1d0   : > { %v2022_v45 = vadd.f32 %v1958_v37, %v1773_v51  ;;  %v1647_v38 = vpop.f32.mrf.mxu0  ;;  %v1774_v41 = vpop.f32.mrf.mxu1  ;;  %v5905_v51 = vld [vmem:[%s7255_s3 + $0x1d0] sm:$0xff] }
 0x1d1   : > { %v1775_v47 = vadd.f32 %v1774_v41, %v1647_v38  ;;  %v1544_v37 = vld [vmem:[#allocation2 + $0xc9] sm:$0xff]  ;;  %2373 = vmatpush.bf16.msra.mxu0 %v5880_v31  ;;  %2802 = vmatpush.bf16.msra.mxu2 %v5895_v55  ;;  %v2902_v55 = vld [vmem:[#allocation2 + $0x21] sm:$0xff] }
 0x1d2   : > { %v6422_v48 = vadd.f32 %v2172_v39, %v2022_v45  ;;  %v1857_v38 = vld [vmem:[#allocation2 + $0xca] sm:$0xff]  ;;  %v6499_v52 = vpack.c.bf16 %v1544_v37, %v1543_v46  ;;  %2588 = vmatpush.bf16.msra.mxu1 %v5887_v27  ;;  %v2475_v37 = vld [vmem:[#allocation2 + $0x1a] sm:$0xff]  ;;  %v2474_v46 = vld [vmem:[#allocation2 + $0x12] sm:$0xff] }
 0x1d3   : > { %v1872_v58 = vpack.c.bf16 %v1857_v38, %v1856_v53  ;;  %v2689_v38 = vld [vmem:[#allocation2 + $0x28] sm:$0xff]  ;;  %v2688_v53 = vld [vmem:[#allocation2 + $0x20] sm:$0xff] }
 0x1d7   : > { %v1960_v56 = vpop.f32.mrf.mxu2  ;;  %v2174_v57 = vpop.f32.mrf.mxu3 }
 0x1d8   : > { %v2023_v59 = vadd.f32 %v1960_v56, %v1775_v47  ;;  %v1650_v60 = vpop.f32.mrf.mxu0  ;;  %v1777_v62 = vpop.f32.mrf.mxu1  ;;  %v5879_v47 = vld [vmem:[%s7255_s3 + $0x100] sm:$0xff] }
 0x1d9   : > { %v1778_v5 = vadd.f32 %v1777_v62, %v1650_v60  ;;  %v5903_v56 = vld [vmem:[%s7255_s3 + $0x1c0] sm:$0xff]  ;;  %2374 = vmatpush.bf16.msra.mxu0 %v5879_v47 }
 0x1da   : > { %v6450_v4 = vadd.f32 %v2174_v57, %v2023_v59 }
 0x1db   : > { %1689 = vmatmul.bf16.gmra.mxu0 %v6442_v6  ;;  %1816 = vmatmul.bf16.gmra.mxu1 %v6339_v9  ;;  %v5906_v9 = vld [vmem:[%s7255_s3 + $0x1d8] sm:$0xff] }
 0x1dc   : > { %2002 = vmatmul.bf16.gmra.mxu2 %v1871_v15  ;;  %2216 = vmatmul.bf16.gmra.mxu3 %v6345_v35 }
 0x1dd   : > { %3013 = vmatpush.bf16.msra.mxu3 %v5906_v9 }
 0x1df   : > { %v1963_v20 = vpop.f32.mrf.mxu2  ;;  %v2177_v61 = vpop.f32.mrf.mxu3 }
 0x1e0   : > { %v2024_v22 = vadd.f32 %v1963_v20, %v1778_v5  ;;  %v1652_v23 = vpop.f32.mrf.mxu0  ;;  %v1779_v24 = vpop.f32.mrf.mxu1 }
 0x1e1   : > { %v1780_v29 = vadd.f32 %v1779_v24, %v1652_v23  ;;  %3014 = vmatpush.bf16.msra.mxu3 %v5905_v51  ;;  %v1502_v23 = vpack.c.bf16 %v1488_v12, %v6348_v40  ;;  %v2261_v40 = vld [vmem:[#allocation2 + $0x19] sm:$0xff] }
 0x1e2   : > { %v6479_v30 = vadd.f32 %v2177_v61, %v2024_v22  ;;  %v1560_v22 = vpack.c.bf16 %v1546_v11, %v6514_v8 }
 0x1e5   : > { %3015 = vmatpush.bf16.msra.mxu3 %v5904_v34 }
 0x1e7   : > { %v1965_v39 = vpop.f32.mrf.mxu2  ;;  %v2179_v45 = vpop.f32.mrf.mxu3 }
 0x1e8   : > { %v2025_v41 = vadd.f32 %v1965_v39, %v1780_v29  ;;  %v1655_v42 = vpop.f32.mrf.mxu0  ;;  %v1782_v44 = vpop.f32.mrf.mxu1 }
 0x1e9   : > { %v1783_v50 = vadd.f32 %v1782_v44, %v1655_v42  ;;  %3016 = vmatpush.bf16.msra.mxu3 %v5903_v56  ;;  %v2260_v44 = vld [vmem:[#allocation2 + $0x11] sm:$0xff] }
 0x1ea   : > { %v6507_v57 = vadd.f32 %v2179_v45, %v2025_v41  ;;  %v2903_v41 = vld [vmem:[#allocation2 + $0x29] sm:$0xff]  ;;  %v2288_v27 = vpack.c.bf16 %v2261_v40, %v2260_v44 }
 0x1eb   : > { %1694 = vmatmul.bf16.gmra.mxu0 %v6499_v52  ;;  %1821 = vmatmul.bf16.gmra.mxu1 %v6345_v35  ;;  %v6516_v35 = vld [vmem:[#allocation2 + $0xd2] sm:$0xff]  ;;  %v2907_v44 = vld [vmem:[#allocation2 + $0x49] sm:$0xff] }
 0x1ec   : > { %2007 = vmatmul.bf16.gmra.mxu2 %v1872_v58  ;;  %2221 = vmatmul.bf16.gmra.mxu3 %v6358_v0  ;;  %v2073_v0 = vld [vmem:[#allocation2 + $0xe8] sm:$0x3f]  ;;  %v1873_v25 = vpack.c.bf16 %v1859_v17, %v6516_v35  ;;  %v2716_v58 = vpack.c.bf16 %v2689_v38, %v2688_v53 }
 0x1ed   : > { %v2087_v28 = vpack.c.bf16 %v2073_v0, %v1425_v63  ;;  %v2691_v0 = vld [vmem:[#allocation2 + $0x38] sm:$0xff] }
 0x1ef   : > { %v1968_v59 = vpop.f32.mrf.mxu2  ;;  %v2182_v60 = vpop.f32.mrf.mxu3 }
 0x1f0   : > { %v2026_v62 = vadd.f32 %v1968_v59, %v1783_v50  ;;  %v1657_v1 = vpop.f32.mrf.mxu0  ;;  %v1784_v54 = vpop.f32.mrf.mxu1  ;;  %v2502_v50 = vpack.c.bf16 %v2475_v37, %v2474_v46  ;;  %v2930_v59 = vpack.c.bf16 %v2903_v41, %v2902_v55  ;;  %v2479_v41 = vld [vmem:[#allocation2 + $0x3a] sm:$0xff] }
 0x1f1   : > { %v1785_v3 = vadd.f32 %v1784_v54, %v1657_v1 }
 0x1f2   : > { %v6512_v5 = vadd.f32 %v2182_v60, %v2026_v62 }
 0x1f7   : > { %v1970_v15 = vpop.f32.mrf.mxu2  ;;  %v2184_v16 = vpop.f32.mrf.mxu3 }
 0x1f8   : > { %v2027_v19 = vadd.f32 %v1970_v15, %v1785_v3  ;;  %v1660_v9 = vpop.f32.mrf.mxu0  ;;  %v1787_v20 = vpop.f32.mrf.mxu1  ;;  %v2477_v15 = vld [vmem:[#allocation2 + $0x2a] sm:$0xff] }
 0x1f9   : > { %v1788_v61 = vadd.f32 %v1787_v20, %v1660_v9 }
 0x1fa   : > { %v6520_v24 = vadd.f32 %v2184_v16, %v2027_v19  ;;  %v2905_v19 = vld [vmem:[#allocation2 + $0x39] sm:$0xff] }
 0x1fb   : > { %1699 = vmatmul.bf16.gmra.mxu0 %v1560_v22  ;;  %1826 = vmatmul.bf16.gmra.mxu1 %v1502_v23  ;;  %v2476_v22 = vld [vmem:[#allocation2 + $0x22] sm:$0xff] }
 0x1fc   : > { %2012 = vmatmul.bf16.gmra.mxu2 %v1873_v25  ;;  %2226 = vmatmul.bf16.gmra.mxu3 %v2087_v28  ;;  %v6531_v25 = vpack.c.bf16 %v2477_v15, %v2476_v22  ;;  %v2690_v28 = vld [vmem:[#allocation2 + $0x30] sm:$0xff]  ;;  %v2909_v22 = vld [vmem:[#allocation2 + $0x59] sm:$0xff] }
 0x1ff   : > { %v1973_v29 = vpop.f32.mrf.mxu2  ;;  %v2187_v18 = vpop.f32.mrf.mxu3 }
 0x200   : > { %v2028_v51 = vadd.f32 %v1973_v29, %v1788_v61  ;;  %v1662_v31 = vpop.f32.mrf.mxu0  ;;  %v1789_v32 = vpop.f32.mrf.mxu1  ;;  %v2904_v29 = vld [vmem:[#allocation2 + $0x31] sm:$0xff] }
 0x201   : > { %v1790_v33 = vadd.f32 %v1789_v32, %v1662_v31  ;;  %v2931_v31 = vpack.c.bf16 %v2905_v19, %v2904_v29  ;;  %v2481_v19 = vld [vmem:[#allocation2 + $0x4a] sm:$0xff] }
 0x202   : > { %v6525_v34 = vadd.f32 %v2187_v18, %v2028_v51  ;;  %v2717_v51 = vpack.c.bf16 %v2691_v0, %v2690_v28 }
 0x207   : > { %v1975_v39 = vpop.f32.mrf.mxu2  ;;  %v2189_v45 = vpop.f32.mrf.mxu3 }
 0x208   : > { %v2029_v2 = vadd.f32 %v1975_v39, %v1790_v33  ;;  %v1665_v63 = vpop.f32.mrf.mxu0  ;;  %v1792_v42 = vpop.f32.mrf.mxu1 }
 0x209   : > { %v1793_v47 = vadd.f32 %v1792_v42, %v1665_v63  ;;  %v2693_v42 = vld [vmem:[#allocation2 + $0x48] sm:$0xff] }
 0x20a   : > { %v6527_v56 = vadd.f32 %v2189_v45, %v2029_v2 }
 0x20b   : > { %2375 = vmatmul.bf16.vlgmr.msra.gmra.mxu0 %v2288_v27  ;;  %2589 = vmatmul.bf16.vlgmr.msra.gmra.mxu1 %v2502_v50  ;;  %v2478_v50 = vld [vmem:[#allocation2 + $0x32] sm:$0xff] }
 0x20c   : > { %2803 = vmatmul.bf16.vlgmr.msra.gmra.mxu2 %v2716_v58  ;;  %3017 = vmatmul.bf16.vlgmr.msra.gmra.mxu3 %v2930_v59  ;;  %v6538_v55 = vpack.c.bf16 %v2479_v41, %v2478_v50  ;;  %v2692_v58 = vld [vmem:[#allocation2 + $0x40] sm:$0xff] }
 0x20f   : > { %v1978_v60 = vpop.f32.mrf.mxu2  ;;  %v2192_v62 = vpop.f32.mrf.mxu3 }
 0x210   : > { %v2030_v1 = vadd.f32 %v1978_v60, %v1793_v47  ;;  %v1667_v54 = vpop.f32.mrf.mxu0  ;;  %v1794_v3 = vpop.f32.mrf.mxu1 }
 0x211   : > { %v1795_v11 = vadd.f32 %v1794_v3, %v1667_v54 }
 0x212   : > { %v6529_v12 = vadd.f32 %v2192_v62, %v2030_v1  ;;  %v2718_v62 = vpack.c.bf16 %v2693_v42, %v2692_v58  ;;  %v2697_v58 = vld [vmem:[#allocation2 + $0x68] sm:$0xff] }
 0x217   : > { %v1980_v16 = vpop.f32.mrf.mxu2  ;;  %v2194_v17 = vpop.f32.mrf.mxu3 }
 0x218   : > { %v2031_v9 = vadd.f32 %v1980_v16, %v1795_v11  ;;  %v1670_v20 = vpop.f32.mrf.mxu0  ;;  %v1797_v61 = vpop.f32.mrf.mxu1 }
 0x219   : > { %v1798_v23 = vadd.f32 %v1797_v61, %v1670_v20  ;;  %v2695_v61 = vld [vmem:[#allocation2 + $0x58] sm:$0xff] }
 0x21a   : > { %v6533_v18 = vadd.f32 %v2194_v17, %v2031_v9 }
 0x21b   : > { %2380 = vmatmul.bf16.gmra.mxu0 %v2930_v59  ;;  %2594 = vmatmul.bf16.gmra.mxu1 %v6531_v25  ;;  %v2906_v59 = vld [vmem:[#allocation2 + $0x41] sm:$0xff] }
 0x21c   : > { %2808 = vmatmul.bf16.gmra.mxu2 %v2717_v51  ;;  %3022 = vmatmul.bf16.gmra.mxu3 %v2931_v31  ;;  %v2932_v1 = vpack.c.bf16 %v2907_v44, %v2906_v59  ;;  %v2480_v51 = vld [vmem:[#allocation2 + $0x42] sm:$0xff] }
 0x21f   : > { %v1983_v32 = vpop.f32.mrf.mxu2  ;;  %v2197_v33 = vpop.f32.mrf.mxu3 }
 0x220   : > { %v2032_v40 = vadd.f32 %v1983_v32, %v1798_v23  ;;  %v1672_v37 = vpop.f32.mrf.mxu0  ;;  %v1799_v39 = vpop.f32.mrf.mxu1  ;;  %v6545_v32 = vpack.c.bf16 %v2481_v19, %v2480_v51  ;;  %v2485_v51 = vld [vmem:[#allocation2 + $0x6a] sm:$0xff] }
 0x221   : > { %v1800_v45 = vadd.f32 %v1799_v39, %v1672_v37 }
 0x222   : > { %v6536_v38 = vadd.f32 %v2197_v33, %v2032_v40  ;;  %v2694_v33 = vld [vmem:[#allocation2 + $0x50] sm:$0xff] }
 0x223   : > { %v2908_v40 = vld [vmem:[#allocation2 + $0x51] sm:$0xff]  ;;  %v2719_v39 = vpack.c.bf16 %v2695_v61, %v2694_v33 }
 0x227   : > { %v1985_v2 = vpop.f32.mrf.mxu2  ;;  %v2199_v63 = vpop.f32.mrf.mxu3 }
 0x228   : > { %v2033_v46 = vadd.f32 %v1985_v2, %v1800_v45  ;;  %v1675_v47 = vpop.f32.mrf.mxu0  ;;  %v1802_v27 = vpop.f32.mrf.mxu1  ;;  %v2933_v45 = vpack.c.bf16 %v2909_v22, %v2908_v40  ;;  %v2699_v40 = vld [vmem:[#allocation2 + $0x78] sm:$0xff] }
 0x229   : > { %v1803_v53 = vadd.f32 %v1802_v27, %v1675_v47  ;;  %v2483_v27 = vld [vmem:[#allocation2 + $0x5a] sm:$0xff] }
 0x22a   : > { %v6540_v60 = vadd.f32 %v2199_v63, %v2033_v46 }
 0x22b   : > { %2385 = vmatmul.bf16.gmra.mxu0 %v2931_v31  ;;  %2599 = vmatmul.bf16.gmra.mxu1 %v6538_v55 }
 0x22c   : > { %2813 = vmatmul.bf16.gmra.mxu2 %v2718_v62  ;;  %3027 = vmatmul.bf16.gmra.mxu3 %v2932_v1 }
 0x22f   : > { %v1988_v54 = vpop.f32.mrf.mxu2  ;;  %v2202_v3 = vpop.f32.mrf.mxu3 }
 0x230   : > { %v2034_v11 = vadd.f32 %v1988_v54, %v1803_v53  ;;  %v1677_v15 = vpop.f32.mrf.mxu0  ;;  %v1804_v16 = vpop.f32.mrf.mxu1 }
 0x231   : > { %v1805_v17 = vadd.f32 %v1804_v16, %v1677_v15  ;;  %v2696_v15 = vld [vmem:[#allocation2 + $0x60] sm:$0xff] }
 0x232   : > { %v6543_v0 = vadd.f32 %v2202_v3, %v2034_v11 }
 0x237   : > { %v1990_v9 = vpop.f32.mrf.mxu2  ;;  %v2204_v20 = vpop.f32.mrf.mxu3 }
 0x238   : > { %v2035_v23 = vadd.f32 %v1990_v9, %v1805_v17  ;;  %v1680_v28 = vpop.f32.mrf.mxu0  ;;  %v1807_v29 = vpop.f32.mrf.mxu1  ;;  %v2720_v17 = vpack.c.bf16 %v2697_v58, %v2696_v15  ;;  %v2273_v15 = vld [vmem:[#allocation2 + $0x79] sm:$0xff] }
 0x239   : > { %v1808_v31 = vadd.f32 %v1807_v29, %v1680_v28  ;;  %v2271_v29 = vld [vmem:[#allocation2 + $0x69] sm:$0xff] }
 0x23a   : > { %v6547_v37 = vadd.f32 %v2204_v20, %v2035_v23 }
 0x23b   : > { %2390 = vmatmul.bf16.gmra.mxu0 %v2932_v1  ;;  %2604 = vmatmul.bf16.gmra.mxu1 %v6545_v32  ;;  %v2482_v1 = vld [vmem:[#allocation2 + $0x52] sm:$0xff] }
 0x23c   : > { %2818 = vmatmul.bf16.gmra.mxu2 %v2719_v39  ;;  %3032 = vmatmul.bf16.gmra.mxu3 %v2933_v45  ;;  %v6552_v11 = vpack.c.bf16 %v2483_v27, %v2482_v1 }
 0x23f   : > { %v1993_v41 = vpop.f32.mrf.mxu2  ;;  %v2207_v2 = vpop.f32.mrf.mxu3 }
 0x240   : > { %v2036_v63 = vadd.f32 %v1993_v41, %v1808_v31  ;;  %v1682_v42 = vpop.f32.mrf.mxu0  ;;  %v1809_v44 = vpop.f32.mrf.mxu1 }
 0x241   : > { %v1810_v46 = vadd.f32 %v1809_v44, %v1682_v42 }
 0x242   : > { %v6550_v47 = vadd.f32 %v2207_v2, %v2036_v63  ;;  %v2270_v2 = vld [vmem:[#allocation2 + $0x61] sm:$0xff] }
 0x243   : > { %v2484_v63 = vld [vmem:[#allocation2 + $0x62] sm:$0xff] }
 0x244   : > { %v6560_v44 = vpack.c.bf16 %v2485_v51, %v2484_v63  ;;  %v2486_v51 = vld [vmem:[#allocation2 + $0x72] sm:$0xff] }
 0x247   : > { %v1995_v50 = vpop.f32.mrf.mxu2  ;;  %v2209_v53 = vpop.f32.mrf.mxu3 }
 0x248   : > { %v2037_v59 = vadd.f32 %v1995_v50, %v1810_v46  ;;  %v1685_v62 = vpop.f32.mrf.mxu0  ;;  %v1812_v54 = vpop.f32.mrf.mxu1  ;;  %v2698_v46 = vld [vmem:[#allocation2 + $0x70] sm:$0xff] }
 0x249   : > { %v1813_v3 = vadd.f32 %v1812_v54, %v1685_v62  ;;  %v2721_v50 = vpack.c.bf16 %v2699_v40, %v2698_v46  ;;  %v2700_v40 = vld [vmem:[#allocation2 + $0x80] sm:$0xff] }
 0x24a   : > { %v6554_v16 = vadd.f32 %v2209_v53, %v2037_v59 }
 0x24b   : > { %2395 = vmatmul.bf16.gmra.mxu0 %v2933_v45  ;;  %2609 = vmatmul.bf16.gmra.mxu1 %v6552_v11 }
 0x24c   : > { %2823 = vmatmul.bf16.gmra.mxu2 %v2720_v17  ;;  %3037 = vmatmul.bf16.gmra.mxu3 %v6351_v49  ;;  %v2293_v49 = vpack.c.bf16 %v2271_v29, %v2270_v2  ;;  %v2487_v17 = vld [vmem:[#allocation2 + $0x7a] sm:$0xff]  ;;  %v2272_v29 = vld [vmem:[#allocation2 + $0x71] sm:$0xff] }
 0x24f   : > { %v1998_v19 = vpop.f32.mrf.mxu2  ;;  %v2212_v9 = vpop.f32.mrf.mxu3 }
 0x250   : > { %v2038_v20 = vadd.f32 %v1998_v19, %v1813_v3  ;;  %v1687_v61 = vpop.f32.mrf.mxu0  ;;  %v1814_v22 = vpop.f32.mrf.mxu1 }
 0x251   : > { %v1815_v23 = vadd.f32 %v1814_v22, %v1687_v61 }
 0x252   : > { %v6558_v28 = vadd.f32 %v2212_v9, %v2038_v20  ;;  %v2701_v20 = vld [vmem:[#allocation2 + $0x88] sm:$0xff] }
 0x257   : > { %v2000_v31 = vpop.f32.mrf.mxu2  ;;  %v2214_v33 = vpop.f32.mrf.mxu3 }
 0x258   : > { %v2039_v39 = vadd.f32 %v2000_v31, %v1815_v23  ;;  %v1690_v45 = vpop.f32.mrf.mxu0  ;;  %v1817_v41 = vpop.f32.mrf.mxu1 }
 0x259   : > { %v1818_v42 = vadd.f32 %v1817_v41, %v1690_v45  ;;  %v2722_v45 = vpack.c.bf16 %v2701_v20, %v2700_v40 }
 0x25a   : > { %v6562_v27 = vadd.f32 %v2214_v33, %v2039_v39  ;;  %v6568_v33 = vpack.c.bf16 %v2487_v17, %v2486_v51  ;;  %v5918_v51 = vld [vmem:[%s7255_s3 + $0x238] sm:$0xff] }
 0x25b   : > { %2400 = vmatmul.bf16.gmra.mxu0 %v2293_v49  ;;  %2614 = vmatmul.bf16.gmra.mxu1 %v6560_v44 }
 0x25c   : > { %2828 = vmatmul.bf16.gmra.mxu2 %v2721_v50  ;;  %3042 = vmatmul.bf16.gmra.mxu3 %v6366_v14  ;;  %v2294_v14 = vpack.c.bf16 %v2273_v15, %v2272_v29 }
 0x25d   : > { %3223 = vmatpush.bf16.msrb.mxu0 %v5918_v51  ;;  %5996 = vmatpush.bf16.msrb.mxu2 %v5918_v51 }
 0x25f   : > { %v2003_v53 = vpop.f32.mrf.mxu2  ;;  %v2217_v58 = vpop.f32.mrf.mxu3 }
 0x260   : > { %v2040_v59 = vadd.f32 %v2003_v53, %v1818_v42  ;;  %v1692_v62 = vpop.f32.mrf.mxu0  ;;  %v1819_v54 = vpop.f32.mrf.mxu1  ;;  %v2275_v53 = vld [vmem:[#allocation2 + $0x89] sm:$0xff] }
 0x261   : > { %v1820_v1 = vadd.f32 %v1819_v54, %v1692_v62  ;;  %v2703_v54 = vld [vmem:[#allocation2 + $0x98] sm:$0xff] }
 0x262   : > { %v6566_v3 = vadd.f32 %v2217_v58, %v2040_v59  ;;  %v2489_v58 = vld [vmem:[#allocation2 + $0x8a] sm:$0xff] }
 0x267   : > { %v2005_v19 = vpop.f32.mrf.mxu2  ;;  %v2219_v9 = vpop.f32.mrf.mxu3 }
 0x268   : > { %v2041_v61 = vadd.f32 %v2005_v19, %v1820_v1  ;;  %v1695_v22 = vpop.f32.mrf.mxu0  ;;  %v1822_v23 = vpop.f32.mrf.mxu1  ;;  %v2274_v19 = vld [vmem:[#allocation2 + $0x81] sm:$0xff] }
 0x269   : > { %v1823_v31 = vadd.f32 %v1822_v23, %v1695_v22  ;;  %v2702_v22 = vld [vmem:[#allocation2 + $0x90] sm:$0xff] }
 0x26a   : > { %v6570_v39 = vadd.f32 %v2219_v9, %v2041_v61  ;;  %v2488_v9 = vld [vmem:[#allocation2 + $0x82] sm:$0xff]  ;;  %v2723_v29 = vpack.c.bf16 %v2703_v54, %v2702_v22  ;;  %v2276_v54 = vld [vmem:[#allocation2 + $0x91] sm:$0xff] }
 0x26b   : > { %2405 = vmatmul.bf16.gmra.mxu0 %v2294_v14  ;;  %2619 = vmatmul.bf16.gmra.mxu1 %v6568_v33  ;;  %v6576_v61 = vpack.c.bf16 %v2489_v58, %v2488_v9  ;;  %v2705_v58 = vld [vmem:[#allocation2 + $0xa8] sm:$0xff]  ;;  %v2704_v9 = vld [vmem:[#allocation2 + $0xa0] sm:$0xff] }
 0x26c   : > { %2833 = vmatmul.bf16.gmra.mxu2 %v2722_v45  ;;  %3047 = vmatmul.bf16.gmra.mxu3 %v6378_v43  ;;  %v2295_v43 = vpack.c.bf16 %v2275_v53, %v2274_v19 }
 0x26f   : > { %v2008_v41 = vpop.f32.mrf.mxu2  ;;  %v2222_v2 = vpop.f32.mrf.mxu3 }
 0x270   : > { %v2042_v63 = vadd.f32 %v2008_v41, %v1823_v31  ;;  %v1697_v42 = vpop.f32.mrf.mxu0  ;;  %v1824_v49 = vpop.f32.mrf.mxu1 }
 0x271   : > { %v1825_v46 = vadd.f32 %v1824_v49, %v1697_v42  ;;  %v2277_v42 = vld [vmem:[#allocation2 + $0x99] sm:$0xff] }
 0x272   : > { %v6574_v50 = vadd.f32 %v2222_v2, %v2042_v63  ;;  %v2491_v49 = vld [vmem:[#allocation2 + $0x9a] sm:$0xff] }
 0x277   : > { %v2010_v59 = vpop.f32.mrf.mxu2  ;;  %v2224_v62 = vpop.f32.mrf.mxu3 }
 0x278   : > { %v2043_v1 = vadd.f32 %v2010_v59, %v1825_v46  ;;  %v1700_v15 = vpop.f32.mrf.mxu0  ;;  %v1827_v17 = vpop.f32.mrf.mxu1 }
 0x279   : > { %v1828_v20 = vadd.f32 %v1827_v17, %v1700_v15  ;;  %v2296_v17 = vpack.c.bf16 %v2277_v42, %v2276_v54  ;;  %v2493_v42 = vld [vmem:[#allocation2 + $0xaa] sm:$0xff] }
 0x27a   : > { %v6578_v23 = vadd.f32 %v2224_v62, %v2043_v1  ;;  %v2490_v1 = vld [vmem:[#allocation2 + $0x92] sm:$0xff] }
 0x27b   : > { %2410 = vmatmul.bf16.gmra.mxu0 %v2295_v43  ;;  %2624 = vmatmul.bf16.gmra.mxu1 %v6576_v61  ;;  %v6588_v19 = vpack.c.bf16 %v2491_v49, %v2490_v1  ;;  %v2724_v43 = vpack.c.bf16 %v2705_v58, %v2704_v9 }
 0x27c   : > { %2838 = vmatmul.bf16.gmra.mxu2 %v2723_v29  ;;  %3052 = vmatmul.bf16.gmra.mxu3 %v6385_v7 }
 0x27f   : > { %v2013_v31 = vpop.f32.mrf.mxu2  ;;  %v2227_v14 = vpop.f32.mrf.mxu3 }
 0x280   : > { %v2044_v40 = vadd.f32 %v2013_v31, %v1828_v20  ;;  %v1702_v45 = vpop.f32.mrf.mxu0  ;;  %v1829_v41 = vpop.f32.mrf.mxu1 }
 0x281   : > { %v1830_v2 = vadd.f32 %v1829_v41, %v1702_v45 }
 0x282   : > { %v6585_v63 = vadd.f32 %v2227_v14, %v2044_v40 }
 0x287   : > { %v2015_v46 = vpop.f32.mrf.mxu2  ;;  %v2229_v53 = vpop.f32.mrf.mxu3 }
 0x288   : > { %v2045_v7 = vadd.f32 %v2015_v46, %v1830_v2  ;;  %v2376_v59 = vpop.f32.mrf.mxu0  ;;  %v2590_v62 = vpop.f32.mrf.mxu1  ;;  %v2279_v2 = vld [vmem:[#allocation2 + $0xa9] sm:$0xff] }
 0x289   : > { %v2446_v15 = vadd.f32 %v2376_v59, %v6383_v36 }
 0x28a   : > { %v6590_v20 = vadd.f32 %v2229_v53, %v2045_v7  ;;  %v2707_v53 = vld [vmem:[#allocation2 + $0xb8] sm:$0xff] }
 0x28b   : > { %v2660_v22 = vadd.f32 %v2590_v62, %v2446_v15  ;;  %2415 = vmatmul.bf16.gmra.mxu0 %v2296_v17  ;;  %2629 = vmatmul.bf16.gmra.mxu1 %v6588_v19  ;;  %v2278_v62 = vld [vmem:[#allocation2 + $0xa1] sm:$0xff]  ;;  %v2706_v17 = vld [vmem:[#allocation2 + $0xb0] sm:$0xff] }
 0x28c   : > { %2843 = vmatmul.bf16.gmra.mxu2 %v2724_v43  ;;  %3057 = vmatmul.bf16.gmra.mxu3 %v6397_v26  ;;  %v2492_v26 = vld [vmem:[#allocation2 + $0xa2] sm:$0xff]  ;;  %v2297_v1 = vpack.c.bf16 %v2279_v2, %v2278_v62  ;;  %v2725_v9 = vpack.c.bf16 %v2707_v53, %v2706_v17  ;;  %v2281_v2 = vld [vmem:[#allocation2 + $0xb9] sm:$0xff] }
 0x28d   : > { %v6598_v15 = vpack.c.bf16 %v2493_v42, %v2492_v26  ;;  %v2495_v42 = vld [vmem:[#allocation2 + $0xba] sm:$0xff]  ;;  %v2709_v53 = vld [vmem:[#allocation2 + $0xc8] sm:$0xff]  ;;  %v2494_v62 = vld [vmem:[#allocation2 + $0xb2] sm:$0xff] }
 0x28e   : > { %v2708_v17 = vld [vmem:[#allocation2 + $0xc0] sm:$0xff] }
 0x28f   : > { %v2804_v29 = vpop.f32.mrf.mxu2  ;;  %v3018_v51 = vpop.f32.mrf.mxu3 }
 0x290   : > { %v2874_v31 = vadd.f32 %v2804_v29, %v2660_v22  ;;  %v2378_v14 = vpop.f32.mrf.mxu0  ;;  %v2592_v40 = vpop.f32.mrf.mxu1  ;;  %v5917_v22 = vld [vmem:[%s7255_s3 + $0x230] sm:$0xff] }
 0x291   : > { %v2447_v36 = vadd.f32 %v2378_v14, %v6387_v10  ;;  %3224 = vmatpush.bf16.msrb.mxu0 %v5917_v22  ;;  %5997 = vmatpush.bf16.msrb.mxu2 %v5917_v22 }
 0x292   : > { %v6595_v45 = vadd.f32 %v3018_v51, %v2874_v31 }
 0x293   : > { %v2661_v41 = vadd.f32 %v2592_v40, %v2447_v36 }
 0x297   : > { %v2806_v49 = vpop.f32.mrf.mxu2  ;;  %v3020_v46 = vpop.f32.mrf.mxu3 }
 0x298   : > { %v2875_v58 = vadd.f32 %v2806_v49, %v2661_v41  ;;  %v2381_v7 = vpop.f32.mrf.mxu0  ;;  %v2595_v59 = vpop.f32.mrf.mxu1 }
 0x299   : > { %v2448_v54 = vadd.f32 %v2381_v7, %v6395_v21 }
 0x29a   : > { %v6600_v10 = vadd.f32 %v3020_v46, %v2875_v58 }
 0x29b   : > { %v2662_v43 = vadd.f32 %v2595_v59, %v2448_v54  ;;  %2420 = vmatmul.bf16.gmra.mxu0 %v2297_v1  ;;  %2634 = vmatmul.bf16.gmra.mxu1 %v6598_v15  ;;  %v2280_v59 = vld [vmem:[#allocation2 + $0xb1] sm:$0xff]  ;;  %v6611_v1 = vpack.c.bf16 %v2495_v42, %v2494_v62 }
 0x29c   : > { %2848 = vmatmul.bf16.gmra.mxu2 %v2725_v9  ;;  %3062 = vmatmul.bf16.gmra.mxu3 %v6442_v6  ;;  %v2298_v54 = vpack.c.bf16 %v2281_v2, %v2280_v59  ;;  %v2726_v9 = vpack.c.bf16 %v2709_v53, %v2708_v17  ;;  %v2283_v2 = vld [vmem:[#allocation2 + $0xc9] sm:$0xff]  ;;  %v2925_v53 = vld [vmem:[#allocation2 + $0xd9] sm:$0xff] }
 0x29d   : > { %v2497_v42 = vld [vmem:[#allocation2 + $0xca] sm:$0xff]  ;;  %v2496_v59 = vld [vmem:[#allocation2 + $0xc2] sm:$0xff] }
 0x29e   : > { %v2710_v17 = vld [vmem:[#allocation2 + $0xd0] sm:$0xff] }
 0x29f   : > { %v2809_v21 = vpop.f32.mrf.mxu2  ;;  %v3023_v29 = vpop.f32.mrf.mxu3 }
 0x2a0   : > { %v2876_v51 = vadd.f32 %v2809_v21, %v2662_v43  ;;  %v2383_v31 = vpop.f32.mrf.mxu0  ;;  %v2597_v14 = vpop.f32.mrf.mxu1 }
 0x2a1   : > { %v2449_v40 = vadd.f32 %v2383_v31, %v6399_v13 }
 0x2a2   : > { %v6608_v36 = vadd.f32 %v3023_v29, %v2876_v51 }
 0x2a3   : > { %v2663_v41 = vadd.f32 %v2597_v14, %v2449_v40  ;;  %v5916_v40 = vld [vmem:[%s7255_s3 + $0x228] sm:$0xff] }
 0x2a4   : > { %3225 = vmatpush.bf16.msrb.mxu0 %v5916_v40  ;;  %5998 = vmatpush.bf16.msrb.mxu2 %v5916_v40 }
 0x2a7   : > { %v2811_v49 = vpop.f32.mrf.mxu2  ;;  %v3025_v46 = vpop.f32.mrf.mxu3 }
 0x2a8   : > { %v2877_v58 = vadd.f32 %v2811_v49, %v2663_v41  ;;  %v2386_v7 = vpop.f32.mrf.mxu0  ;;  %v2600_v6 = vpop.f32.mrf.mxu1 }
 0x2a9   : > { %v2450_v26 = vadd.f32 %v2386_v7, %v6422_v48 }
 0x2aa   : > { %v6613_v13 = vadd.f32 %v3025_v46, %v2877_v58  ;;  %v2711_v46 = vld [vmem:[#allocation2 + $0xd8] sm:$0xff] }
 0x2ab   : > { %2425 = vmatmul.bf16.gmra.mxu0 %v2298_v54  ;;  %2639 = vmatmul.bf16.gmra.mxu1 %v6611_v1  ;;  %v2664_v43 = vadd.f32 %v2600_v6, %v2450_v26  ;;  %v2282_v6 = vld [vmem:[#allocation2 + $0xc1] sm:$0xff]  ;;  %v6628_v54 = vpack.c.bf16 %v2497_v42, %v2496_v59 }
 0x2ac   : > { %2853 = vmatmul.bf16.gmra.mxu2 %v2726_v9  ;;  %3067 = vmatmul.bf16.gmra.mxu3 %v6499_v52  ;;  %v2299_v26 = vpack.c.bf16 %v2283_v2, %v2282_v6  ;;  %v5915_v9 = vld [vmem:[%s7255_s3 + $0x220] sm:$0xff]  ;;  %v5912_v42 = vld [vmem:[%s7255_s3 + $0x208] sm:$0xff] }
 0x2ad   : > { %3226 = vmatpush.bf16.msrb.mxu0 %v5915_v9  ;;  %5999 = vmatpush.bf16.msrb.mxu2 %v5915_v9  ;;  %v5911_v9 = vld [vmem:[%s7255_s3 + $0x200] sm:$0xff] }
 0x2af   : > { %v2814_v22 = vpop.f32.mrf.mxu2  ;;  %v3028_v21 = vpop.f32.mrf.mxu3 }
 0x2b0   : > { %v2878_v29 = vadd.f32 %v2814_v22, %v2664_v43  ;;  %v2388_v51 = vpop.f32.mrf.mxu0  ;;  %v2602_v31 = vpop.f32.mrf.mxu1  ;;  %v2727_v43 = vpack.c.bf16 %v2711_v46, %v2710_v17  ;;  %v2941_v22 = vpack.c.bf16 %v2925_v53, %v6514_v8  ;;  %v2713_v53 = vld [vmem:[#allocation2 + $0xe8] sm:$0xff] }
 0x2b1   : > { %v2451_v48 = vadd.f32 %v2388_v51, %v6450_v4  ;;  %v2926_v17 = vld [vmem:[#allocation2 + $0xe1] sm:$0xff] }
 0x2b2   : > { %v6618_v14 = vadd.f32 %v3028_v21, %v2878_v29 }
 0x2b3   : > { %v2665_v41 = vadd.f32 %v2602_v31, %v2451_v48 }
 0x2b7   : > { %v2816_v52 = vpop.f32.mrf.mxu2  ;;  %v6623_v49 = vpop.f32.mrf.mxu3 }
 0x2b8   : > { %v6625_v58 = vadd.f32 %v2816_v52, %v2665_v41  ;;  %v2391_v7 = vpop.f32.mrf.mxu0  ;;  %v2605_v4 = vpop.f32.mrf.mxu1  ;;  %v5913_v41 = vld [vmem:[%s7255_s3 + $0x210] sm:$0xff]  ;;  %v6651_v52 = vld [vmem:[#allocation2 + $0xda] sm:$0xff] }
 0x2b9   : > { %v2452_v62 = vadd.f32 %v2391_v7, %v6479_v30  ;;  %v5914_v30 = vld [vmem:[%s7255_s3 + $0x218] sm:$0xff]  ;;  %v2927_v7 = vld [vmem:[#allocation2 + $0xe9] sm:$0xff] }
 0x2ba   : > { %3227 = vmatpush.bf16.msrb.mxu0 %v5914_v30  ;;  %6000 = vmatpush.bf16.msrb.mxu2 %v5914_v30  ;;  %v2942_v30 = vpack.c.bf16 %v2927_v7, %v2926_v17 }
 0x2bb   : > { %2430 = vmatmul.bf16.gmra.mxu0 %v2299_v26  ;;  %2644 = vmatmul.bf16.gmra.mxu1 %v6628_v54  ;;  %v2666_v21 = vadd.f32 %v2605_v4, %v2452_v62  ;;  %v2514_v62 = vpack.c.bf16 %v6651_v52, %v6516_v35  ;;  %v2712_v26 = vld [vmem:[#allocation2 + $0xe0] sm:$0xff] }
 0x2bc   : > { %2858 = vmatmul.bf16.gmra.mxu2 %v2727_v43  ;;  %3072 = vmatmul.bf16.gmra.mxu3 %v2941_v22  ;;  %v2728_v43 = vpack.c.bf16 %v2713_v53, %v2712_v26  ;;  %v6670_v53 = vld [vmem:[#allocation2 + $0xe2] sm:$0xff] }
 0x2be   : > { %3228 = vmatpush.bf16.msrb.mxu0 %v5913_v41  ;;  %6001 = vmatpush.bf16.msrb.mxu2 %v5913_v41 }
 0x2bf   : > { %v2819_v29 = vpop.f32.mrf.mxu2  ;;  %v3033_v51 = vpop.f32.mrf.mxu3 }
 0x2c0   : > { %v2880_v31 = vadd.f32 %v2819_v29, %v2666_v21  ;;  %v2393_v48 = vpop.f32.mrf.mxu0  ;;  %v6638_v40 = vpop.f32.mrf.mxu1 }
 0x2c1   : > { %v6641_v8 = vadd.f32 %v2393_v48, %v6507_v57 }
 0x2c2   : > { %v6646_v2 = vadd.f32 %v3033_v51, %v2880_v31  ;;  %3229 = vmatpush.bf16.msrb.mxu0 %v5912_v42  ;;  %6002 = vmatpush.bf16.msrb.mxu2 %v5912_v42  ;;  %v2287_v42 = vld [vmem:[#allocation2 + $0xe9] sm:$0x3f] }
 0x2c6   : > { %3230 = vmatpush.bf16.msrb.mxu0 %v5911_v9  ;;  %6003 = vmatpush.bf16.msrb.mxu2 %v5911_v9 }
 0x2c7   : > { %v6653_v46 = vpop.f32.mrf.mxu2  ;;  %v6655_v57 = vpop.f32.mrf.mxu3 }
 0x2c8   : > { %7262 = vst [vmem:[#allocation5_spill] sm:$0xff] %v6655_v57  ;;  %v2396_v4 = vpop.f32.mrf.mxu0  ;;  %v2610_v6 = vpop.f32.mrf.mxu1 }
 0x2c9   : > { %v2454_v59 = vadd.f32 %v2396_v4, %v6512_v5 }
 0x2cb   : > { %2435 = vmatmul.bf16.gmra.mxu0 %v2941_v22  ;;  %2649 = vmatmul.bf16.gmra.mxu1 %v2514_v62  ;;  %v2668_v5 = vadd.f32 %v2610_v6, %v2454_v59  ;;  %v2501_v22 = vld [vmem:[#allocation2 + $0xea] sm:$0x3f]  ;;  %v2715_v6 = vld [vmem:[#allocation2 + $0xf8] sm:$0x3f] }
 0x2cc   : > { %2863 = vmatmul.bf16.gmra.mxu2 %v2728_v43  ;;  %3077 = vmatmul.bf16.gmra.mxu3 %v2942_v30  ;;  %v2928_v59 = vld [vmem:[#allocation2 + $0xf1] sm:$0xff]  ;;  %v2929_v62 = vld [vmem:[#allocation2 + $0xf9] sm:$0x3f]  ;;  %v2301_v30 = vpack.c.bf16 %v2287_v42, %v2926_v17 }
 0x2cf   : > { %v2824_v21 = vpop.f32.mrf.mxu2  ;;  %v3038_v29 = vpop.f32.mrf.mxu3 }
 0x2d0   : > { %v2882_v35 = vadd.f32 %v2824_v21, %v2668_v5  ;;  %v2398_v51 = vpop.f32.mrf.mxu0  ;;  %v6663_v31 = vpop.f32.mrf.mxu1  ;;  %v2714_v5 = vld [vmem:[#allocation2 + $0xf0] sm:$0xff] }
 0x2d1   : > { %7263 = vst [vmem:[#allocation6_spill] sm:$0xff] %v6663_v31  ;;  %v6666_v48 = vadd.f32 %v2398_v51, %v6520_v24  ;;  %v2515_v24 = vpack.c.bf16 %v2501_v22, %v6670_v53  ;;  %v2729_v21 = vpack.c.bf16 %v2715_v6, %v2714_v5  ;;  %v3142_v22 = vld [vmem:[#allocation2 + $0xf2] sm:$0xff]  ;;  %v3143_v6 = vld [vmem:[#allocation2 + $0xfa] sm:$0x3f] }
 0x2d2   : > { %v6668_v41 = vadd.f32 %v3038_v29, %v2882_v35  ;;  %v2943_v29 = vpack.c.bf16 %v2929_v62, %v2928_v59 }
 0x2d3   : > { %7264 = vst [vmem:[#allocation7_spill] sm:$0xff] %v6666_v48 }
 0x2d4   : > { %7265 = vst [vmem:[#allocation8_spill] sm:$0xff] %v6668_v41 }
 0x2d7   : > { %v6672_v7 = vpop.f32.mrf.mxu2  ;;  %v6674_v4 = vpop.f32.mrf.mxu3 }
 0x2d8   : > { %7266 = vst [vmem:[#allocation9_spill] sm:$0xff] %v6672_v7  ;;  %v2401_v26 = vpop.f32.mrf.mxu0  ;;  %v2615_v9 = vpop.f32.mrf.mxu1 }
 0x2d9   : > { %7267 = vst [vmem:[#allocation10_spill] sm:$0xff] %v6674_v4  ;;  %v2456_v43 = vadd.f32 %v2401_v26, %v6525_v34 }
 0x2db   : > { %2440 = vmatmul.bf16.gmra.mxu0 %v2301_v30  ;;  %2654 = vmatmul.bf16.gmra.mxu1 %v2515_v24  ;;  %v2670_v35 = vadd.f32 %v2615_v9, %v2456_v43  ;;  %v3157_v9 = vpack.c.bf16 %v3143_v6, %v3142_v22 }
 0x2dc   : > { %2868 = vmatmul.bf16.gmra.mxu2 %v2729_v21  ;;  %3082 = vmatmul.bf16.gmra.mxu3 %v2943_v29 }
 0x2df   : > { %v2829_v51 = vpop.f32.mrf.mxu2  ;;  %v3043_v4 = vpop.f32.mrf.mxu3 }
 0x2e0   : > { %v2884_v7 = vadd.f32 %v2829_v51, %v2670_v35  ;;  %v2403_v41 = vpop.f32.mrf.mxu0  ;;  %v2617_v31 = vpop.f32.mrf.mxu1 }
 0x2e1   : > { %v2457_v48 = vadd.f32 %v2403_v41, %v6527_v56 }
 0x2e2   : > { %v6679_v57 = vadd.f32 %v3043_v4, %v2884_v7 }
 0x2e3   : > { %v6681_v34 = vadd.f32 %v2617_v31, %v2457_v48 }
 0x2e7   : > { %v6683_v17 = vpop.f32.mrf.mxu2  ;;  %v6685_v42 = vpop.f32.mrf.mxu3 }
 0x2e8   : > { %v2406_v59 = vpop.f32.mrf.mxu0  ;;  %v2620_v62 = vpop.f32.mrf.mxu1 }
 0x2e9   : > { %v2458_v26 = vadd.f32 %v2406_v59, %v6529_v12 }
 0x2eb   : > { %3231 = vmatmul.bf16.vlgmr.msrb.gmra.mxu0 %v6531_v25  ;;  %v2672_v43 = vadd.f32 %v2620_v62, %v2458_v26 }
 0x2ec   : > { %3296 = vmatmul.bf16.vlgmr.msrb.gmra.mxu2 %v3157_v9 }
 0x2ef   : > { %v2834_v56 = vpop.f32.mrf.mxu2  ;;  %v3048_v41 = vpop.f32.mrf.mxu3 }
 0x2f0   : > { %v2886_v7 = vadd.f32 %v2834_v56, %v2672_v43  ;;  %v2408_v31 = vpop.f32.mrf.mxu0  ;;  %v2622_v48 = vpop.f32.mrf.mxu1 }
 0x2f1   : > { %v2459_v4 = vadd.f32 %v2408_v31, %v6533_v18 }
 0x2f2   : > { %v6690_v30 = vadd.f32 %v3048_v41, %v2886_v7 }
 0x2f3   : > { %v2673_v24 = vadd.f32 %v2622_v48, %v2459_v4 }
 0x2f7   : > { %v2836_v5 = vpop.f32.mrf.mxu2  ;;  %v6692_v21 = vpop.f32.mrf.mxu3 }
 0x2f8   : > { %v6694_v29 = vadd.f32 %v2836_v5, %v2673_v24  ;;  %v2411_v12 = vpop.f32.mrf.mxu0  ;;  %v2625_v35 = vpop.f32.mrf.mxu1 }
 0x2f9   : > { %v2460_v25 = vadd.f32 %v2411_v12, %v6536_v38 }
 0x2fb   : > { %3236 = vmatmul.bf16.gmra.mxu0 %v6538_v55  ;;  %v2674_v51 = vadd.f32 %v2625_v35, %v2460_v25 }
 0x2ff   : > { %v2839_v22 = vpop.f32.mrf.mxu2  ;;  %v3053_v6 = vpop.f32.mrf.mxu3 }
 0x300   : > { %v2888_v59 = vadd.f32 %v2839_v22, %v2674_v51  ;;  %v2413_v62 = vpop.f32.mrf.mxu0  ;;  %v2627_v18 = vpop.f32.mrf.mxu1 }
 0x301   : > { %v2461_v26 = vadd.f32 %v2413_v62, %v6540_v60 }
 0x302   : > { %v6699_v9 = vadd.f32 %v3053_v6, %v2888_v59 }
 0x303   : > { %v2675_v43 = vadd.f32 %v2627_v18, %v2461_v26 }
 0x307   : > { %v2841_v56 = vpop.f32.mrf.mxu2  ;;  %v6701_v41 = vpop.f32.mrf.mxu3 }
 0x308   : > { %v6703_v7 = vadd.f32 %v2841_v56, %v2675_v43  ;;  %v2416_v31 = vpop.f32.mrf.mxu0  ;;  %v2630_v38 = vpop.f32.mrf.mxu1 }
 0x309   : > { %v2462_v55 = vadd.f32 %v2416_v31, %v6543_v0 }
 0x30b   : > { %3241 = vmatmul.bf16.gmra.mxu0 %v6545_v32  ;;  %v2676_v48 = vadd.f32 %v2630_v38, %v2462_v55 }
 0x30f   : > { %v2844_v4 = vpop.f32.mrf.mxu2  ;;  %v3058_v24 = vpop.f32.mrf.mxu3 }
 0x310   : > { %v2890_v5 = vadd.f32 %v2844_v4, %v2676_v48  ;;  %v2418_v12 = vpop.f32.mrf.mxu0  ;;  %v2632_v60 = vpop.f32.mrf.mxu1 }
 0x311   : > { %v2463_v35 = vadd.f32 %v2418_v12, %v6547_v37 }
 0x312   : > { %v6708_v25 = vadd.f32 %v3058_v24, %v2890_v5 }
 0x313   : > { %v2677_v51 = vadd.f32 %v2632_v60, %v2463_v35 }
 0x317   : > { %v2846_v22 = vpop.f32.mrf.mxu2  ;;  %v6710_v6 = vpop.f32.mrf.mxu3 }
 0x318   : > { %v6712_v59 = vadd.f32 %v2846_v22, %v2677_v51  ;;  %v2421_v62 = vpop.f32.mrf.mxu0  ;;  %v2635_v0 = vpop.f32.mrf.mxu1 }
 0x319   : > { %v2464_v32 = vadd.f32 %v2421_v62, %v6550_v47 }
 0x31b   : > { %3246 = vmatmul.bf16.gmra.mxu0 %v6552_v11  ;;  %v2678_v18 = vadd.f32 %v2635_v0, %v2464_v32 }
 0x31f   : > { %v2849_v26 = vpop.f32.mrf.mxu2  ;;  %v3063_v43 = vpop.f32.mrf.mxu3 }
 0x320   : > { %v2892_v56 = vadd.f32 %v2849_v26, %v2678_v18  ;;  %v2423_v31 = vpop.f32.mrf.mxu0  ;;  %v2637_v37 = vpop.f32.mrf.mxu1 }
 0x321   : > { %v2465_v38 = vadd.f32 %v2423_v31, %v6554_v16 }
 0x322   : > { %v6717_v55 = vadd.f32 %v3063_v43, %v2892_v56 }
 0x323   : > { %v2679_v48 = vadd.f32 %v2637_v37, %v2465_v38 }
 0x327   : > { %v2851_v4 = vpop.f32.mrf.mxu2  ;;  %v6719_v24 = vpop.f32.mrf.mxu3 }
 0x328   : > { %v6721_v5 = vadd.f32 %v2851_v4, %v2679_v48  ;;  %v2426_v12 = vpop.f32.mrf.mxu0  ;;  %v2640_v47 = vpop.f32.mrf.mxu1 }
 0x329   : > { %v2466_v11 = vadd.f32 %v2426_v12, %v6558_v28 }
 0x32b   : > { %3251 = vmatmul.bf16.gmra.mxu0 %v6560_v44  ;;  %v2680_v60 = vadd.f32 %v2640_v47, %v2466_v11 }
 0x32f   : > { %v2854_v35 = vpop.f32.mrf.mxu2  ;;  %v3068_v51 = vpop.f32.mrf.mxu3 }
 0x330   : > { %v2894_v22 = vadd.f32 %v2854_v35, %v2680_v60  ;;  %v2428_v62 = vpop.f32.mrf.mxu0  ;;  %v2642_v16 = vpop.f32.mrf.mxu1 }
 0x331   : > { %v2467_v0 = vadd.f32 %v2428_v62, %v6562_v27 }
 0x332   : > { %v6726_v32 = vadd.f32 %v3068_v51, %v2894_v22 }
 0x333   : > { %v2681_v18 = vadd.f32 %v2642_v16, %v2467_v0 }
 0x337   : > { %v2856_v26 = vpop.f32.mrf.mxu2  ;;  %v6728_v43 = vpop.f32.mrf.mxu3 }
 0x338   : > { %v6730_v56 = vadd.f32 %v2856_v26, %v2681_v18  ;;  %v2431_v31 = vpop.f32.mrf.mxu0  ;;  %v2645_v28 = vpop.f32.mrf.mxu1 }
 0x339   : > { %v2468_v44 = vadd.f32 %v2431_v31, %v6566_v3 }
 0x33b   : > { %3256 = vmatmul.bf16.gmra.mxu0 %v6568_v33  ;;  %v2682_v37 = vadd.f32 %v2645_v28, %v2468_v44 }
 0x33f   : > { %v2859_v38 = vpop.f32.mrf.mxu2  ;;  %v3073_v48 = vpop.f32.mrf.mxu3 }
 0x340   : > { %v2896_v4 = vadd.f32 %v2859_v38, %v2682_v37  ;;  %v2433_v12 = vpop.f32.mrf.mxu0  ;;  %v2647_v27 = vpop.f32.mrf.mxu1 }
 0x341   : > { %v2469_v47 = vadd.f32 %v2433_v12, %v6570_v39 }
 0x342   : > { %v6735_v11 = vadd.f32 %v3073_v48, %v2896_v4 }
 0x343   : > { %v2683_v60 = vadd.f32 %v2647_v27, %v2469_v47 }
 0x347   : > { %v2861_v35 = vpop.f32.mrf.mxu2  ;;  %v6737_v51 = vpop.f32.mrf.mxu3 }
 0x348   : > { %v6739_v22 = vadd.f32 %v2861_v35, %v2683_v60  ;;  %v2436_v62 = vpop.f32.mrf.mxu0  ;;  %v2650_v3 = vpop.f32.mrf.mxu1 }
 0x349   : > { %v2470_v33 = vadd.f32 %v2436_v62, %v6574_v50 }
 0x34b   : > { %3261 = vmatmul.bf16.gmra.mxu0 %v6576_v61  ;;  %v2684_v16 = vadd.f32 %v2650_v3, %v2470_v33 }
 0x34f   : > { %v2864_v0 = vpop.f32.mrf.mxu2  ;;  %v3078_v31 = vpop.f32.mrf.mxu3 }
 0x350   : > { %v2898_v18 = vadd.f32 %v2864_v0, %v2684_v16  ;;  %v2438_v26 = vpop.f32.mrf.mxu0  ;;  %v2652_v44 = vpop.f32.mrf.mxu1 }
 0x351   : > { %v2471_v39 = vadd.f32 %v2438_v26, %v6578_v23 }
 0x352   : > { %v6744_v28 = vadd.f32 %v3078_v31, %v2898_v18 }
 0x353   : > { %v6746_v37 = vadd.f32 %v2652_v44, %v2471_v39 }
 0x357   : > { %v6748_v38 = vpop.f32.mrf.mxu2  ;;  %v6751_v61 = vpop.f32.mrf.mxu3 }
 0x358   : > { %v2441_v48 = vpop.f32.mrf.mxu0  ;;  %v2655_v27 = vpop.f32.mrf.mxu1 }
 0x359   : > { %v2472_v12 = vadd.f32 %v2441_v48, %v6585_v63 }
 0x35b   : > { %3266 = vmatmul.bf16.gmra.mxu0 %v6588_v19  ;;  %v2686_v60 = vadd.f32 %v2655_v27, %v2472_v12 }
 0x35f   : > { %v2869_v50 = vpop.f32.mrf.mxu2  ;;  %v3083_v3 = vpop.f32.mrf.mxu3 }
 0x360   : > { %v2443_v4 = vpop.f32.mrf.mxu0  ;;  %v2900_v62 = vadd.f32 %v2869_v50, %v2686_v60  ;;  %v2657_v16 = vpop.f32.mrf.mxu1 }
 0x361   : > { %v2473_v33 = vadd.f32 %v2443_v4, %v6590_v20 }
 0x362   : > { %v3114_v19 = vadd.f32 %v3083_v3, %v2900_v62 }
 0x363   : > { %v2687_v18 = vadd.f32 %v2657_v16, %v2473_v33 }
 0x367   : > { %v2871_v47 = vpop.f32.mrf.mxu2 }
 0x368   : > { %v3232_v23 = vpop.f32.mrf.mxu0  ;;  %v2901_v39 = vadd.f32 %v2871_v47, %v2687_v18  ;;  %v3138_v18 = vld [vmem:[#allocation2 + $0xd2] sm:$0xff] }
 0x369   : > { %v3302_v35 = vadd.f32 %v3232_v23, %v6595_v45  ;;  %v3085_v45 = vpop.f32.mrf.mxu3 }
 0x36a   : > { %v3115_v44 = vadd.f32 %v3085_v45, %v2901_v39 }
 0x36b   : > { %3330 = vst [vmem:[#allocation3] sm:$0xff] %v3302_v35  ;;  %3271 = vmatmul.bf16.gmra.mxu0 %v6598_v15 }
 0x36f   : > { %v3297_v0 = vpop.f32.mrf.mxu2 }
 0x370   : > { %v6757_v26 = vadd.f32 %v3297_v0, %v3114_v19  ;;  %v3234_v63 = vpop.f32.mrf.mxu0 }
 0x371   : > { %v3303_v31 = vadd.f32 %v3234_v63, %v6600_v10 }
 0x372   : > { %3356 = vst [vmem:[#allocation3 + $0xd0] sm:$0xff] %v6757_v26 }
 0x373   : > { %3331 = vst [vmem:[#allocation3 + $0x8] sm:$0xff] %v3303_v31 }
 0x377   : > { %v3299_v48 = vpop.f32.mrf.mxu2 }
 0x378   : > { %v3329_v50 = vadd.f32 %v3299_v48, %v3115_v44  ;;  %v3237_v15 = vpop.f32.mrf.mxu0  ;;  %v7268_v44 = vld [vmem:[#allocation5_spill] sm:$0xff] }
 0x379   : > { %v3304_v20 = vadd.f32 %v3237_v15, %v6608_v36 }
 0x37a   : > { %3357 = vst [vmem:[#allocation3 + $0xd8] sm:$0x3f] %v3329_v50  ;;  %v3384_v27 = vld [vmem:[#allocation3 + $0x1] sm:$0xff] }
 0x37b   : > { %3332 = vst [vmem:[#allocation3 + $0x10] sm:$0xff] %v3304_v20  ;;  %3276 = vmatmul.bf16.gmra.mxu0 %v6611_v1  ;;  %v3410_v62 = vmax.f32 %v3302_v35, %v3384_v27  ;;  %v3093_v1 = vadd.f32 %v6623_v49, %v6625_v58  ;;  %v2667_v35 = vadd.f32 %v6638_v40, %v6641_v8 }
 0x37c   : > { %v3155_v49 = vpack.c.bf16 %v6651_v52, %v3138_v18 }
 0x37d   : > { %v2881_v39 = vadd.f32 %v6653_v46, %v2667_v35  ;;  %v7269_v46 = vld [vmem:[#allocation7_spill] sm:$0xff] }
 0x37f   : > { %v3095_v48 = vadd.f32 %v7268_v44, %v2881_v39 }
 0x380   : > { %v3239_v4 = vpop.f32.mrf.mxu0 }
 0x381   : > { %v3305_v12 = vadd.f32 %v3239_v4, %v6613_v13  ;;  %v7270_v4 = vld [vmem:[#allocation6_spill] sm:$0xff] }
 0x382   : > { %v3385_v13 = vld [vmem:[#allocation3 + $0x9] sm:$0xff] }
 0x383   : > { %3333 = vst [vmem:[#allocation3 + $0x18] sm:$0xff] %v3305_v12 }
 0x388   : > { %v3242_v10 = vpop.f32.mrf.mxu0 }
 0x389   : > { %v3306_v47 = vadd.f32 %v3242_v10, %v6618_v14  ;;  %v3411_v14 = vmax.f32 %v3303_v31, %v3385_v13  ;;  %v7271_v10 = vld [vmem:[#allocation8_spill] sm:$0xff] }
 0x38a   : > { %v3386_v60 = vld [vmem:[#allocation3 + $0x11] sm:$0xff] }
 0x38b   : > { %3334 = vst [vmem:[#allocation3 + $0x20] sm:$0xff] %v3306_v47  ;;  %3281 = vmatmul.bf16.gmra.mxu0 %v6628_v54  ;;  %v6766_v23 = vmax.f32 %v3304_v20, %v3386_v60 }
 0x38d   : > { %v6769_v36 = vmax.f32 %v3410_v62, %v6766_v23  ;;  %v7272_v62 = vld [vmem:[#allocation9_spill] sm:$0xff] }
 0x390   : > { %v3244_v3 = vpop.f32.mrf.mxu0 }
 0x391   : > { %v3307_v33 = vadd.f32 %v3244_v3, %v3093_v1 }
 0x392   : > { %v3387_v19 = vld [vmem:[#allocation3 + $0x19] sm:$0xff] }
 0x393   : > { %3335 = vst [vmem:[#allocation3 + $0x28] sm:$0xff] %v3307_v33  ;;  %v6773_v16 = vmax.f32 %v3305_v12, %v3387_v19  ;;  %v2669_v12 = vadd.f32 %v7270_v4, %v7269_v46 }
 0x395   : > { %v6776_v0 = vmax.f32 %v3411_v14, %v6773_v16  ;;  %v2883_v1 = vadd.f32 %v7272_v62, %v2669_v12 }
 0x398   : > { %v3247_v54 = vpop.f32.mrf.mxu0 }
 0x399   : > { %v3308_v63 = vadd.f32 %v3247_v54, %v6646_v2  ;;  %v3141_v2 = vld [vmem:[#allocation2 + $0xea] sm:$0xff] }
 0x39a   : > { %v3388_v58 = vld [vmem:[#allocation3 + $0x21] sm:$0xff] }
 0x39b   : > { %3336 = vst [vmem:[#allocation3 + $0x30] sm:$0xff] %v3308_v63  ;;  %3286 = vmatmul.bf16.gmra.mxu0 %v3155_v49  ;;  %v6783_v45 = vmax.f32 %v3306_v47, %v3388_v58  ;;  %v3156_v47 = vpack.c.bf16 %v3141_v2, %v6670_v53 }
 0x39d   : > { %v3447_v31 = vmax.f32 %v6766_v23, %v6783_v45 }
 0x3a0   : > { %v3249_v50 = vpop.f32.mrf.mxu0 }
 0x3a1   : > { %v3309_v15 = vadd.f32 %v3249_v50, %v3095_v48 }
 0x3a2   : > { %v3389_v20 = vld [vmem:[#allocation3 + $0x29] sm:$0xff] }
 0x3a3   : > { %3337 = vst [vmem:[#allocation3 + $0x38] sm:$0xff] %v3309_v15  ;;  %v6788_v40 = vmax.f32 %v3307_v33, %v3389_v20  ;;  %v7273_v33 = vld [vmem:[#allocation10_spill] sm:$0xff] }
 0x3a4   : > { %v3097_v19 = vadd.f32 %v7273_v33, %v2883_v1 }
 0x3a5   : > { %v3448_v8 = vmax.f32 %v6773_v16, %v6788_v40 }
 0x3a8   : > { %v3252_v52 = vpop.f32.mrf.mxu0 }
 0x3a9   : > { %v3310_v27 = vadd.f32 %v3252_v52, %v7271_v10 }
 0x3aa   : > { %v3390_v60 = vld [vmem:[#allocation3 + $0x31] sm:$0xff] }
 0x3ab   : > { %3338 = vst [vmem:[#allocation3 + $0x40] sm:$0xff] %v3310_v27  ;;  %3291 = vmatmul.bf16.gmra.mxu0 %v3156_v47  ;;  %v6797_v3 = vmax.f32 %v3308_v63, %v3390_v60  ;;  %v2885_v63 = vadd.f32 %v6683_v17, %v6681_v34 }
 0x3ad   : > { %v3449_v13 = vmax.f32 %v6783_v45, %v6797_v3  ;;  %v3099_v50 = vadd.f32 %v6685_v42, %v2885_v63  ;;  %v3101_v42 = vadd.f32 %v6692_v21, %v6694_v29 }
 0x3b0   : > { %v3254_v14 = vpop.f32.mrf.mxu0 }
 0x3b1   : > { %v3311_v54 = vadd.f32 %v3254_v14, %v3097_v19 }
 0x3b2   : > { %v3391_v18 = vld [vmem:[#allocation3 + $0x39] sm:$0xff] }
 0x3b3   : > { %3339 = vst [vmem:[#allocation3 + $0x48] sm:$0xff] %v3311_v54  ;;  %v6802_v35 = vmax.f32 %v3309_v15, %v3391_v18 }
 0x3b5   : > { %v3450_v53 = vmax.f32 %v6788_v40, %v6802_v35  ;;  %v2899_v40 = vadd.f32 %v6748_v38, %v6746_v37 }
 0x3b7   : > { %v3113_v45 = vadd.f32 %v6751_v61, %v2899_v40  ;;  %v5927_v40 = vld [vmem:[%s7258_s6 + $0x40] sm:$0xff] }
 0x3b8   : > { %v3257_v49 = vpop.f32.mrf.mxu0 }
 0x3b9   : > { %v3312_v58 = vadd.f32 %v3257_v49, %v6679_v57 }
 0x3ba   : > { %v3392_v39 = vld [vmem:[#allocation3 + $0x41] sm:$0xff] }
 0x3bb   : > { %3340 = vst [vmem:[#allocation3 + $0x50] sm:$0xff] %v3312_v58  ;;  %v6809_v44 = vmax.f32 %v3310_v27, %v3392_v39 }
 0x3bd   : > { %v3451_v48 = vmax.f32 %v6797_v3, %v6809_v44 }
 0x3c0   : > { %v3259_v15 = vpop.f32.mrf.mxu0 }
 0x3c1   : > { %v3313_v20 = vadd.f32 %v3259_v15, %v3099_v50 }
 0x3c2   : > { %v3393_v2 = vld [vmem:[#allocation3 + $0x49] sm:$0xff] }
 0x3c3   : > { %3341 = vst [vmem:[#allocation3 + $0x58] sm:$0xff] %v3313_v20  ;;  %v6814_v52 = vmax.f32 %v3311_v54, %v3393_v2  ;;  %v3103_v54 = vadd.f32 %v6701_v41, %v6703_v7 }
 0x3c5   : > { %v3452_v57 = vmax.f32 %v6802_v35, %v6814_v52 }
 0x3c8   : > { %v3262_v46 = vpop.f32.mrf.mxu0 }
 0x3c9   : > { %v3314_v34 = vadd.f32 %v3262_v46, %v6690_v30 }
 0x3ca   : > { %v3394_v17 = vld [vmem:[#allocation3 + $0x51] sm:$0xff] }
 0x3cb   : > { %3342 = vst [vmem:[#allocation3 + $0x60] sm:$0xff] %v3314_v34  ;;  %v6819_v4 = vmax.f32 %v3312_v58, %v3394_v17 }
 0x3cd   : > { %v3453_v12 = vmax.f32 %v6809_v44, %v6819_v4 }
 0x3d0   : > { %v3264_v10 = vpop.f32.mrf.mxu0 }
 0x3d1   : > { %v3315_v27 = vadd.f32 %v3264_v10, %v3101_v42 }
 0x3d2   : > { %v3395_v47 = vld [vmem:[#allocation3 + $0x59] sm:$0xff] }
 0x3d3   : > { %3343 = vst [vmem:[#allocation3 + $0x68] sm:$0xff] %v3315_v27  ;;  %v3421_v60 = vmax.f32 %v3313_v20, %v3395_v47  ;;  %v3105_v20 = vadd.f32 %v6710_v6, %v6712_v59  ;;  %v3107_v47 = vadd.f32 %v6719_v24, %v6721_v5  ;;  %v3109_v5 = vadd.f32 %v6728_v43, %v6730_v56 }
 0x3d5   : > { %v3454_v62 = vmax.f32 %v6814_v52, %v3421_v60 }
 0x3d8   : > { %v3267_v1 = vpop.f32.mrf.mxu0 }
 0x3d9   : > { %v3316_v30 = vadd.f32 %v3267_v1, %v6699_v9 }
 0x3da   : > { %v3396_v33 = vld [vmem:[#allocation3 + $0x61] sm:$0xff] }
 0x3db   : > { %3344 = vst [vmem:[#allocation3 + $0x70] sm:$0xff] %v3316_v30  ;;  %v3422_v19 = vmax.f32 %v3314_v34, %v3396_v33 }
 0x3dd   : > { %v3455_v14 = vmax.f32 %v6819_v4, %v3422_v19 }
 0x3e0   : > { %v3269_v18 = vpop.f32.mrf.mxu0 }
 0x3e1   : > { %v3317_v21 = vadd.f32 %v3269_v18, %v3103_v54 }
 0x3e2   : > { %v3397_v29 = vld [vmem:[#allocation3 + $0x69] sm:$0xff] }
 0x3e3   : > { %3345 = vst [vmem:[#allocation3 + $0x78] sm:$0xff] %v3317_v21  ;;  %v3423_v49 = vmax.f32 %v3315_v27, %v3397_v29 }
 0x3e5   : > { %v3456_v58 = vmax.f32 %v3421_v60, %v3423_v49 }
 0x3e8   : > { %v3272_v39 = vpop.f32.mrf.mxu0 }
 0x3e9   : > { %v3318_v63 = vadd.f32 %v3272_v39, %v6708_v25 }
 0x3ea   : > { %v3398_v50 = vld [vmem:[#allocation3 + $0x71] sm:$0xff] }
 0x3eb   : > { %3346 = vst [vmem:[#allocation3 + $0x80] sm:$0xff] %v3318_v63  ;;  %v3424_v9 = vmax.f32 %v3316_v30, %v3398_v50 }
 0x3ed   : > { %v3457_v15 = vmax.f32 %v3422_v19, %v3424_v9 }
 0x3f0   : > { %v3274_v2 = vpop.f32.mrf.mxu0 }
 0x3f1   : > { %v3319_v46 = vadd.f32 %v3274_v2, %v3105_v20  ;;  %v3473_v20 = vld [vmem:[%s7257_s5 + $0x10] sm:$0xff] }
 0x3f2   : > { %v3399_v34 = vld [vmem:[#allocation3 + $0x79] sm:$0xff] }
 0x3f3   : > { %3347 = vst [vmem:[#allocation3 + $0x88] sm:$0xff] %v3319_v46  ;;  %v3425_v41 = vmax.f32 %v3317_v21, %v3399_v34 }
 0x3f5   : > { %v3458_v7 = vmax.f32 %v3423_v49, %v3425_v41 }
 0x3f8   : > { %v3277_v17 = vpop.f32.mrf.mxu0 }
 0x3f9   : > { %v3320_v42 = vadd.f32 %v3277_v17, %v6717_v55  ;;  %v3475_v17 = vld [vmem:[%s7257_s5 + $0x20] sm:$0xff] }
 0x3fa   : > { %v3400_v10 = vld [vmem:[#allocation3 + $0x81] sm:$0xff] }
 0x3fb   : > { %3348 = vst [vmem:[#allocation3 + $0x90] sm:$0xff] %v3320_v42  ;;  %v6834_v27 = vmax.f32 %v3318_v63, %v3400_v10  ;;  %v3479_v10 = vld [vmem:[%s7257_s5 + $0x40] sm:$0xff] }
 0x3fd   : > { %v3459_v25 = vmax.f32 %v3424_v9, %v6834_v27 }
 0x400   : > { %v3279_v60 = vpop.f32.mrf.mxu0 }
 0x401   : > { %v3321_v6 = vadd.f32 %v3279_v60, %v3107_v47  ;;  %v5934_v47 = vld [vmem:[%s7258_s6 + $0x78] sm:$0xff]  ;;  %v5933_v60 = vld [vmem:[%s7258_s6 + $0x70] sm:$0xff] }
 0x402   : > { %v3401_v59 = vld [vmem:[#allocation3 + $0x89] sm:$0xff]  ;;  %3702 = vmatpush.bf16.msrb.mxu3 %v5934_v47 }
 0x403   : > { %3349 = vst [vmem:[#allocation3 + $0x98] sm:$0xff] %v3321_v6  ;;  %v6839_v1 = vmax.f32 %v3319_v46, %v3401_v59  ;;  %v3478_v59 = vld [vmem:[%s7257_s5 + $0x38] sm:$0xff]  ;;  %v5972_v47 = vld [vmem:[%s7258_s6 + $0x1a8] sm:$0xff] }
 0x405   : > { %v3460_v30 = vmax.f32 %v3425_v41, %v6839_v1 }
 0x406   : > { %3703 = vmatpush.bf16.msrb.mxu3 %v5933_v60 }
 0x407   : > { %3515 = vmatpush.msrb.mxu1 %v3460_v30  ;;  %v3482_v30 = vld [vmem:[%s7257_s5 + $0x58] sm:$0xff] }
 0x408   : > { %v3282_v33 = vpop.f32.mrf.mxu0 }
 0x409   : > { %v3322_v55 = vadd.f32 %v3282_v33, %v6726_v32  ;;  %3516 = vmatpush.msrb.mxu1 %v3459_v25  ;;  %v3474_v25 = vld [vmem:[%s7257_s5 + $0x18] sm:$0xff] }
 0x40a   : > { %v3402_v19 = vld [vmem:[#allocation3 + $0x91] sm:$0xff] }
 0x40b   : > { %3350 = vst [vmem:[#allocation3 + $0xa0] sm:$0xff] %v3322_v55  ;;  %3517 = vmatpush.msrb.mxu1 %v3458_v7  ;;  %v6843_v54 = vmax.f32 %v3320_v42, %v3402_v19  ;;  %v3472_v42 = vld [vmem:[%s7257_s5 + $0x8] sm:$0xff]  ;;  %v5942_v33 = vld [vmem:[%s7258_s6 + $0xb8] sm:$0xff]  ;;  %v5941_v19 = vld [vmem:[%s7258_s6 + $0xb0] sm:$0xff] }
 0x40d   : > { %3518 = vmatpush.msrb.mxu1 %v3457_v15  ;;  %v3461_v24 = vmax.f32 %v6834_v27, %v6843_v54  ;;  %v3481_v27 = vld [vmem:[%s7257_s5 + $0x50] sm:$0xff] }
 0x40f   : > { %3519 = vmatpush.msrb.mxu1 %v3456_v58  ;;  %v3440_v58 = vld [vmem:[#allocation3 + $0xd1] sm:$0xff] }
 0x410   : > { %v3284_v18 = vpop.f32.mrf.mxu0  ;;  %v3443_v9 = vmax.f32 %v6757_v26, %v3440_v58  ;;  %v3477_v26 = vld [vmem:[%s7257_s5 + $0x30] sm:$0xff] }
 0x411   : > { %v3323_v21 = vadd.f32 %v3284_v18, %v3109_v5  ;;  %3520 = vmatpush.msrb.mxu1 %v3455_v14  ;;  %v3441_v14 = vld [vmem:[#allocation3 + $0xd9] sm:$0x1f]  ;;  %v5940_v5 = vld [vmem:[%s7258_s6 + $0xa8] sm:$0xff] }
 0x412   : > { %v3403_v29 = vld [vmem:[#allocation3 + $0x99] sm:$0xff]  ;;  %v5948_v18 = vld [vmem:[%s7258_s6 + $0xe8] sm:$0xff] }
 0x413   : > { %3351 = vst [vmem:[#allocation3 + $0xa8] sm:$0xff] %v3323_v21  ;;  %3521 = vmatpush.msrb.mxu1 %v3454_v62  ;;  %v6849_v32 = vmax.f32 %v3321_v6, %v3403_v29  ;;  %v3476_v6 = vld [vmem:[%s7257_s5 + $0x28] sm:$0xff]  ;;  %v5939_v29 = vld [vmem:[%s7258_s6 + $0xa0] sm:$0xff] }
 0x415   : > { %3522 = vmatpush.msrb.mxu1 %v3453_v12  ;;  %v3462_v49 = vmax.f32 %v6839_v1, %v6849_v32  ;;  %v3438_v12 = vld [vmem:[#allocation3 + $0xd8] sm:$0x1f]  ;;  %v3480_v1 = vld [vmem:[%s7257_s5 + $0x48] sm:$0xff] }
 0x416   : > { %v3444_v50 = vmax.f32 %v3438_v12, %v3441_v14 }
 0x417   : > { %3523 = vmatpush.msrb.mxu1 %v3452_v57 }
 0x418   : > { %v3287_v43 = vpop.f32.mrf.mxu0 }
 0x419   : > { %v3324_v56 = vadd.f32 %v3287_v43, %v6735_v11  ;;  %3524 = vmatpush.msrb.mxu1 %v3451_v48  ;;  %v3111_v11 = vadd.f32 %v6737_v51, %v6739_v22  ;;  %v5930_v43 = vld [vmem:[%s7258_s6 + $0x58] sm:$0xff] }
 0x41a   : > { %v3404_v62 = vld [vmem:[#allocation3 + $0xa1] sm:$0xff] }
 0x41b   : > { %3352 = vst [vmem:[#allocation3 + $0xb0] sm:$0xff] %v3324_v56  ;;  %3525 = vmatpush.msrb.mxu1 %v3450_v53  ;;  %v3430_v4 = vmax.f32 %v3322_v55, %v3404_v62  ;;  %v5950_v55 = vld [vmem:[%s7258_s6 + $0xf8] sm:$0xff] }
 0x41c   : > { %v5946_v62 = vld [vmem:[%s7258_s6 + $0xd8] sm:$0xff] }
 0x41d   : > { %3526 = vmatpush.msrb.mxu1 %v3449_v13  ;;  %v3463_v52 = vmax.f32 %v6843_v54, %v3430_v4  ;;  %v5949_v54 = vld [vmem:[%s7258_s6 + $0xf0] sm:$0xff] }
 0x41f   : > { %3527 = vmatpush.msrb.mxu1 %v3448_v8 }
 0x420   : > { %v3289_v44 = vpop.f32.mrf.mxu0 }
 0x421   : > { %v3325_v48 = vadd.f32 %v3289_v44, %v3111_v11  ;;  %3528 = vmatpush.msrb.mxu1 %v3447_v31  ;;  %v5945_v11 = vld [vmem:[%s7258_s6 + $0xd0] sm:$0xff]  ;;  %v6991_v44 = vld [vmem:[%s7256_s4] ss:$0 sm:$0xff] }
 0x422   : > { %v3405_v35 = vld [vmem:[#allocation3 + $0xa9] sm:$0xff] }
 0x423   : > { %3353 = vst [vmem:[#allocation3 + $0xb8] sm:$0xff] %v3325_v48  ;;  %3529 = vmatpush.msrb.mxu1 %v6776_v0  ;;  %v3431_v3 = vmax.f32 %v3323_v21, %v3405_v35  ;;  %v5931_v21 = vld [vmem:[%s7258_s6 + $0x60] sm:$0xff] }
 0x424   : > { %v3483_v35 = vld [vmem:[%s7257_s5 + $0x60] sm:$0x1] }
 0x425   : > { %3530 = vmatpush.msrb.mxu1 %v6769_v36  ;;  %v3464_v13 = vmax.f32 %v6849_v32, %v3431_v3  ;;  %v3471_v36 = vld [vmem:[%s7257_s5] sm:$0xff] }
 0x426   : > { %3531 = vmatmul.f32.vlgmr.msrb.gmra.mxu1 %v3471_v36  ;;  %v5947_v32 = vld [vmem:[%s7258_s6 + $0xe0] sm:$0xff] }
 0x427   : > { %3869 = vmatpush.bf16.msra.mxu1 %v5942_v33 }
 0x428   : > { %v3292_v51 = vpop.f32.mrf.mxu0 }
 0x429   : > { %v3326_v22 = vadd.f32 %v3292_v51, %v6744_v28  ;;  %v3484_v51 = vld [vmem:[%s7257_s5 + $0x68] sm:$0x1] }
 0x42a   : > { %v3406_v16 = vld [vmem:[#allocation3 + $0xb1] sm:$0xff] }
 0x42b   : > { %3354 = vst [vmem:[#allocation3 + $0xc0] sm:$0xff] %v3326_v22  ;;  %v3432_v8 = vmax.f32 %v3324_v56, %v3406_v16  ;;  %3870 = vmatpush.bf16.msra.mxu1 %v5941_v19  ;;  %v5938_v56 = vld [vmem:[%s7258_s6 + $0x98] sm:$0xff] }
 0x42d   : > { %v3465_v23 = vmax.f32 %v3430_v4, %v3432_v8  ;;  %v5929_v4 = vld [vmem:[%s7258_s6 + $0x50] sm:$0xff] }
 0x42e   : > { %3534 = vmatmul.f32.gmra.mxu1 %v3473_v20 }
 0x42f   : > { %3871 = vmatpush.bf16.msra.mxu1 %v5940_v5 }
 0x430   : > { %v3294_v31 = vpop.f32.mrf.mxu0 }
 0x431   : > { %v3327_v53 = vadd.f32 %v3294_v31, %v3113_v45 }
 0x432   : > { %v3407_v0 = vld [vmem:[#allocation3 + $0xb9] sm:$0xff] }
 0x433   : > { %3355 = vst [vmem:[#allocation3 + $0xc8] sm:$0xff] %v3327_v53  ;;  %v3433_v57 = vmax.f32 %v3325_v48, %v3407_v0  ;;  %3872 = vmatpush.bf16.msra.mxu1 %v5939_v29  ;;  %v5928_v48 = vld [vmem:[%s7258_s6 + $0x48] sm:$0xff]  ;;  %v5962_v29 = vld [vmem:[%s7258_s6 + $0x158] sm:$0xff] }
 0x435   : > { %v3466_v28 = vmax.f32 %v3431_v3, %v3433_v57  ;;  %v5936_v3 = vld [vmem:[%s7258_s6 + $0x88] sm:$0xff] }
 0x436   : > { %3537 = vmatmul.f32.gmra.mxu1 %v3475_v17 }
 0x437   : > { %3873 = vmatpush.bf16.msra.mxu1 %v5938_v56  ;;  %v5961_v56 = vld [vmem:[%s7258_s6 + $0x150] sm:$0xff] }
 0x43a   : > { %v3383_v37 = vld [vmem:[#allocation3 + $0xc8] sm:$0x1f] }
 0x43b   : > { %v3409_v38 = vld [vmem:[#allocation3 + $0xc9] sm:$0x1f]  ;;  %v3408_v39 = vld [vmem:[#allocation3 + $0xc1] sm:$0xff] }
 0x43c   : > { %v3435_v63 = vmax.f32 %v3383_v37, %v3409_v38  ;;  %v3434_v61 = vmax.f32 %v3326_v22, %v3408_v39  ;;  %v3439_v15 = vld [vmem:[#allocation3 + $0xc9] sm:$0xff]  ;;  %v5926_v38 = vld [vmem:[%s7258_s6 + $0x38] sm:$0xff] }
 0x43d   : > { %v3442_v2 = vmax.f32 %v3327_v53, %v3439_v15  ;;  %v5944_v22 = vld [vmem:[%s7258_s6 + $0xc8] sm:$0xff]  ;;  %v5966_v39 = vld [vmem:[%s7258_s6 + $0x178] sm:$0xff] }
 0x43e   : > { %v3470_v46 = vmax.f32 %v3435_v63, %v3444_v50  ;;  %v3469_v34 = vmax.f32 %v3434_v61, %v3443_v9  ;;  %v3467_v41 = vmax.f32 %v3432_v8, %v3434_v61  ;;  %3540 = vmatmul.f32.gmra.mxu1 %v3477_v26  ;;  %v5935_v8 = vld [vmem:[%s7258_s6 + $0x80] sm:$0xff]  ;;  %v5925_v61 = vld [vmem:[%s7258_s6 + $0x30] sm:$0xff]  ;;  %v5974_v15 = vld [vmem:[%s7258_s6 + $0x1b8] sm:$0xff] }
 0x43f   : > { %v3468_v7 = vmax.f32 %v3433_v57, %v3442_v2  ;;  %v5965_v9 = vld [vmem:[%s7258_s6 + $0x170] sm:$0xff] }
 0x440   : > { %5342 = vmatpush.msk.msra.mxu2 %vm3511_vm0, %v3470_v46  ;;  %v5924_v46 = vld [vmem:[%s7258_s6 + $0x28] sm:$0xff] }
 0x442   : > { %3560 = vmatpush.msra.mxu2 %v3469_v34  ;;  %v5964_v34 = vld [vmem:[%s7258_s6 + $0x168] sm:$0xff] }
 0x444   : > { %3561 = vmatpush.msra.mxu2 %v3468_v7 }
 0x446   : > { %3562 = vmatpush.msra.mxu2 %v3467_v41  ;;  %3543 = vmatmul.f32.gmra.mxu1 %v3479_v10  ;;  %v5973_v41 = vld [vmem:[%s7258_s6 + $0x1b0] sm:$0xff]  ;;  %v5923_v10 = vld [vmem:[%s7258_s6 + $0x20] sm:$0xff] }
 0x448   : > { %3563 = vmatpush.msra.mxu2 %v3466_v28 }
 0x44a   : > { %3564 = vmatpush.msra.mxu2 %v3465_v23  ;;  %v5943_v23 = vld [vmem:[%s7258_s6 + $0xc0] sm:$0xff] }
 0x44c   : > { %3565 = vmatpush.msra.mxu2 %v3464_v13 }
 0x44e   : > { %3566 = vmatpush.msra.mxu2 %v3463_v52  ;;  %3546 = vmatmul.f32.gmra.mxu1 %v3481_v27  ;;  %v5937_v52 = vld [vmem:[%s7258_s6 + $0x90] sm:$0xff] }
 0x44f   : > { %3874 = vmatpush.bf16.msra.mxu1 %v5937_v52 }
 0x450   : > { %3567 = vmatpush.msra.mxu2 %v3462_v49 }
 0x452   : > { %3568 = vmatpush.msra.mxu2 %v3461_v24  ;;  %v5932_v24 = vld [vmem:[%s7258_s6 + $0x68] sm:$0xff] }
 0x453   : > { %5343 = vmatmul.msk.f32.vlgmr.msra.gmra.mxu2 %vm3489_vm1, %v3472_v42  ;;  %3704 = vmatpush.bf16.msrb.mxu3 %v5932_v24 }
 0x454   : > { %3970 = vmatpush.bf16.msrb.mxu2 %v5950_v55  ;;  %3875 = vmatpush.bf16.msra.mxu1 %v5936_v3 }
 0x456   : > { %3549 = vmatmul.f32.gmra.mxu1 %v3483_v35  ;;  %v5960_v35 = vld [vmem:[%s7258_s6 + $0x148] sm:$0xff] }
 0x457   : > { %3705 = vmatpush.bf16.msrb.mxu3 %v5931_v21  ;;  %v5922_v21 = vld [vmem:[%s7258_s6 + $0x18] sm:$0xff] }
 0x458   : > { %3971 = vmatpush.bf16.msrb.mxu2 %v5949_v54  ;;  %3876 = vmatpush.bf16.msra.mxu1 %v5935_v8  ;;  %v5959_v8 = vld [vmem:[%s7258_s6 + $0x140] sm:$0xff] }
 0x45b   : > { %5344 = vmatmul.msk.f32.gmra.mxu2 %vm3489_vm1, %v3474_v25  ;;  %3706 = vmatpush.bf16.msrb.mxu3 %v5930_v43  ;;  %v5963_v25 = vld [vmem:[%s7258_s6 + $0x160] sm:$0xff]  ;;  %v5921_v43 = vld [vmem:[%s7258_s6 + $0x10] sm:$0xff] }
 0x45c   : > { %3972 = vmatpush.bf16.msrb.mxu2 %v5948_v18  ;;  %4172 = vmatpush.bf16.msrb.mxu1 %v5966_v39  ;;  %v5971_v18 = vld [vmem:[%s7258_s6 + $0x1a0] sm:$0xff] }
 0x45d   : > { %v5967_v39 = vld [vmem:[%s7258_s6 + $0x180] sm:$0xff] }
 0x45f   : > { %3707 = vmatpush.bf16.msrb.mxu3 %v5929_v4  ;;  %v5970_v4 = vld [vmem:[%s7258_s6 + $0x198] sm:$0xff] }
 0x460   : > { %3973 = vmatpush.bf16.msrb.mxu2 %v5947_v32  ;;  %4173 = vmatpush.bf16.msrb.mxu1 %v5965_v9 }
 0x463   : > { %5345 = vmatmul.msk.f32.gmra.mxu2 %vm3489_vm1, %v3476_v6  ;;  %3708 = vmatpush.bf16.msrb.mxu3 %v5928_v48  ;;  %v5920_v48 = vld [vmem:[%s7258_s6 + $0x8] sm:$0xff] }
 0x464   : > { %3974 = vmatpush.bf16.msrb.mxu2 %v5946_v62  ;;  %4174 = vmatpush.bf16.msrb.mxu1 %v5964_v34  ;;  %v5958_v34 = vld [vmem:[%s7258_s6 + $0x138] sm:$0xff] }
 0x467   : > { %3709 = vmatpush.bf16.msrb.mxu3 %v5927_v40  ;;  %v5919_v40 = vld [vmem:[%s7258_s6] sm:$0xff] }
 0x468   : > { %3975 = vmatpush.bf16.msrb.mxu2 %v5945_v11  ;;  %4175 = vmatpush.bf16.msrb.mxu1 %v5963_v25  ;;  %v5955_v25 = vld [vmem:[%s7258_s6 + $0x120] sm:$0xff] }
 0x46b   : > { %5346 = vmatmul.msk.f32.gmra.mxu2 %vm3489_vm1, %v3478_v59  ;;  %3773 = vmatpush.bf16.msra.mxu3 %v5926_v38 }
 0x46c   : > { %3976 = vmatpush.bf16.msrb.mxu2 %v5944_v22  ;;  %4176 = vmatpush.bf16.msrb.mxu1 %v5962_v29  ;;  %v5969_v22 = vld [vmem:[%s7258_s6 + $0x190] sm:$0xff] }
 0x46f   : > { %3774 = vmatpush.bf16.msra.mxu3 %v5925_v61 }
 0x470   : > { %3977 = vmatpush.bf16.msrb.mxu2 %v5943_v23  ;;  %4177 = vmatpush.bf16.msrb.mxu1 %v5961_v56 }
 0x473   : > { %5347 = vmatmul.msk.f32.gmra.mxu2 %vm3489_vm1, %v3480_v1  ;;  %3775 = vmatpush.bf16.msra.mxu3 %v5924_v46 }
 0x474   : > { %4273 = vmatpush.bf16.msra.mxu2 %v5974_v15  ;;  %4178 = vmatpush.bf16.msrb.mxu1 %v5960_v35 }
 0x477   : > { %3776 = vmatpush.bf16.msra.mxu3 %v5923_v10  ;;  %v5988_v10 = vld [vmem:[%s7258_s6 + $0x228] sm:$0xff] }
 0x478   : > { %4274 = vmatpush.bf16.msra.mxu2 %v5973_v41  ;;  %4179 = vmatpush.bf16.msrb.mxu1 %v5959_v8  ;;  %v5990_v41 = vld [vmem:[%s7258_s6 + $0x238] sm:$0xff]  ;;  %v5980_v8 = vld [vmem:[%s7258_s6 + $0x1e8] sm:$0xff] }
 0x47b   : > { %5348 = vmatmul.msk.f32.gmra.mxu2 %vm3489_vm1, %v3482_v30  ;;  %3777 = vmatpush.bf16.msra.mxu3 %v5922_v21  ;;  %v5983_v21 = vld [vmem:[%s7258_s6 + $0x200] sm:$0xff] }
 0x47c   : > { %4275 = vmatpush.bf16.msra.mxu2 %v5972_v47  ;;  %v5987_v47 = vld [vmem:[%s7258_s6 + $0x220] sm:$0xff] }
 0x47f   : > { %3778 = vmatpush.bf16.msra.mxu3 %v5921_v43 }
 0x480   : > { %4276 = vmatpush.bf16.msra.mxu2 %v5971_v18  ;;  %v5951_v18 = vld [vmem:[%s7258_s6 + $0x100] sm:$0xff] }
 0x483   : > { %5349 = vmatmul.msk.f32.gmra.mxu2 %vm3489_vm1, %v3484_v51  ;;  %3779 = vmatpush.bf16.msra.mxu3 %v5920_v48 }
 0x484   : > { %4277 = vmatpush.bf16.msra.mxu2 %v5970_v4 }
 0x487   : > { %3780 = vmatpush.bf16.msra.mxu3 %v5919_v40 }
 0x488   : > { %4278 = vmatpush.bf16.msra.mxu2 %v5969_v22 }
 0x4a3   : > { %v3532_v49 = vpop.f32.mrf.mxu1 }
 0x4a4   : > { %v3533_v16 = vadd.f32 %v6991_v44, %v3532_v49 }
 0x4ab   : > { %v3535_v13 = vpop.f32.mrf.mxu1 }
 0x4ac   : > { %v3536_v36 = vadd.f32 %v6991_v44, %v3535_v13 }
 0x4b3   : > { %v3538_v0 = vpop.f32.mrf.mxu1 }
 0x4b4   : > { %v3539_v14 = vadd.f32 %v6991_v44, %v3538_v0 }
 0x4bb   : > { %v3541_v37 = vpop.f32.mrf.mxu1 }
 0x4bc   : > { %v3542_v2 = vadd.f32 %v6991_v44, %v3541_v37 }
 0x4c3   : > { %v3544_v26 = vpop.f32.mrf.mxu1 }
 0x4c4   : > { %v3545_v1 = vadd.f32 %v6991_v44, %v3544_v26  ;;  %v5989_v26 = vld [vmem:[%s7258_s6 + $0x230] sm:$0xff] }
 0x4cb   : > { %v3547_v62 = vpop.f32.mrf.mxu1 }
 0x4cc   : > { %v3548_v3 = vadd.f32 %v6991_v44, %v3547_v62 }
 0x4d6   : > { %v3570_v45 = vpop.f32.mrf.mxu2 }
 0x4d7   : > { %v3571_v31 = vadd.f32 %v3570_v45, %v3533_v16  ;;  %v5968_v45 = vld [vmem:[%s7258_s6 + $0x188] sm:$0xff] }
 0x4d8   : > { %4279 = vmatpush.bf16.msra.mxu2 %v5968_v45  ;;  %v5978_v45 = vld [vmem:[%s7258_s6 + $0x1d8] sm:$0xff] }
 0x4d9   : > { %v3591_v53 = vmax.f32 %v3571_v31, 0.0 }
 0x4db   : > { %3598 = vst [vmem:[#allocation4] sm:$0xff] %v3591_v53 }
 0x4dc   : > { %4280 = vmatpush.bf16.msra.mxu2 %v5967_v39 }
 0x4de   : > { %v3573_v57 = vpop.f32.mrf.mxu2 }
 0x4df   : > { %v3574_v28 = vadd.f32 %v3573_v57, %v3536_v36 }
 0x4e1   : > { %v7020_v12 = vmax.f32 %v3574_v28, 0.0 }
 0x4e3   : > { %3599 = vst [vmem:[#allocation4 + $0x8] sm:$0xff] %v7020_v12  ;;  %v7025_v58 = vpack.c.bf16 %v7020_v12, %v3591_v53 }
 0x4e6   : > { %v3576_v63 = vpop.f32.mrf.mxu2 }
 0x4e7   : > { %v3577_v50 = vadd.f32 %v3576_v63, %v3539_v14 }
 0x4e9   : > { %v7042_v20 = vmax.f32 %v3577_v50, 0.0 }
 0x4ea   : > { %v3629_v60 = vld [vmem:[#allocation4 + $0x1] sm:$0xff] }
 0x4eb   : > { %3600 = vst [vmem:[#allocation4 + $0x10] sm:$0xff] %v7042_v20  ;;  %v4003_v7 = vpack.c.bf16 %v7042_v20, %v7020_v12  ;;  %v3796_v6 = vld [vmem:[#allocation4 + $0x2] sm:$0xff] }
 0x4ec   : > { %v3897_v59 = vld [vmem:[#allocation4 + $0x7] sm:$0xff] }
 0x4ed   : > { %v5975_v12 = vld [vmem:[%s7258_s6 + $0x1c0] sm:$0xff] }
 0x4ee   : > { %v3579_v17 = vpop.f32.mrf.mxu2 }
 0x4ef   : > { %v3580_v42 = vadd.f32 %v3579_v17, %v3542_v2  ;;  %v5957_v17 = vld [vmem:[%s7258_s6 + $0x130] sm:$0xff] }
 0x4f1   : > { %v7066_v27 = vmax.f32 %v3580_v42, 0.0  ;;  %v5956_v42 = vld [vmem:[%s7258_s6 + $0x128] sm:$0xff] }
 0x4f2   : > { %v7069_v30 = vld [vmem:[#allocation4 + $0x9] sm:$0xff] }
 0x4f3   : > { %v3797_v33 = vld [vmem:[#allocation4 + $0xa] sm:$0xff]  ;;  %3601 = vst [vmem:[#allocation4 + $0x18] sm:$0xff] %v7066_v27  ;;  %v3634_v19 = vpack.c.bf16 %v7069_v30, %v3629_v60  ;;  %v7078_v5 = vpack.c.bf16 %v7066_v27, %v7042_v20  ;;  %v3550_v20 = vpop.f32.mrf.mxu1 }
 0x4f4   : > { %v7071_v55 = vld [vmem:[#allocation4 + $0xf] sm:$0xff]  ;;  %v3801_v54 = vpack.c.bf16 %v3797_v33, %v3796_v6  ;;  %v5954_v33 = vld [vmem:[%s7258_s6 + $0x118] sm:$0xff] }
 0x4f5   : > { %v3902_v24 = vpack.c.bf16 %v7071_v55, %v3897_v59  ;;  %3710 = vmatmul.bf16.vlgmr.msrb.gmra.mxu3 %v3634_v19  ;;  %v4200_v59 = vld [vmem:[#allocation4 + $0xe] sm:$0xff]  ;;  %v5986_v19 = vld [vmem:[%s7258_s6 + $0x218] sm:$0xff] }
 0x4f6   : > { %3877 = vmatmul.bf16.vlgmr.msra.gmra.mxu1 %v3801_v54  ;;  %v3582_v32 = vpop.f32.mrf.mxu2  ;;  %4071 = vmatpush.bf16.msrb.mxu3 %v5958_v34  ;;  %v5952_v54 = vld [vmem:[%s7258_s6 + $0x108] sm:$0xff] }
 0x4f7   : > { %3978 = vmatmul.bf16.vlgmr.msrb.gmra.mxu2 %v3902_v24  ;;  %v3583_v49 = vadd.f32 %v3582_v32, %v3545_v1  ;;  %4475 = vmatpush.bf16.msra.mxu1 %v5990_v41  ;;  %v5984_v24 = vld [vmem:[%s7258_s6 + $0x208] sm:$0xff] }
 0x4f9   : > { %v7098_v52 = vmax.f32 %v3583_v49, 0.0 }
 0x4fa   : > { %v7100_v11 = vld [vmem:[#allocation4 + $0x17] sm:$0xff]  ;;  %4072 = vmatpush.bf16.msrb.mxu3 %v5957_v17 }
 0x4fb   : > { %3602 = vst [vmem:[#allocation4 + $0x20] sm:$0xff] %v7098_v52  ;;  %v4004_v13 = vpack.c.bf16 %v7098_v52, %v7066_v27  ;;  %v4306_v51 = vpack.c.bf16 %v7100_v11, %v7071_v55  ;;  %v3631_v31 = vld [vmem:[#allocation4 + $0x11] sm:$0xff]  ;;  %4476 = vmatpush.bf16.msra.mxu1 %v5989_v26 }
 0x4fc   : > { %v3798_v36 = vld [vmem:[#allocation4 + $0x12] sm:$0xff]  ;;  %v4104_v6 = vpack.c.bf16 %v3631_v31, %v7069_v30 }
 0x4fd   : > { %v4201_v60 = vld [vmem:[#allocation4 + $0x16] sm:$0xff] }
 0x4fe   : > { %v3585_v16 = vpop.f32.mrf.mxu2  ;;  %4073 = vmatpush.bf16.msrb.mxu3 %v5956_v42  ;;  %v4205_v1 = vpack.c.bf16 %v4201_v60, %v4200_v59  ;;  %v5953_v30 = vld [vmem:[%s7258_s6 + $0x110] sm:$0xff] }
 0x4ff   : > { %v3586_v23 = vadd.f32 %v3585_v16, %v3548_v3  ;;  %4477 = vmatpush.bf16.msra.mxu1 %v5988_v10  ;;  %v5982_v3 = vld [vmem:[%s7258_s6 + $0x1f8] sm:$0xff]  ;;  %v5981_v16 = vld [vmem:[%s7258_s6 + $0x1f0] sm:$0xff] }
 0x501   : > { %v3596_v53 = vmax.f32 %v3586_v23, 0.0  ;;  %v5979_v23 = vld [vmem:[%s7258_s6 + $0x1e0] sm:$0xff] }
 0x502   : > { %v7126_v0 = vld [vmem:[#allocation4 + $0x19] sm:$0xff]  ;;  %v3633_v50 = vld [vmem:[#allocation4 + $0x21] sm:$0x1]  ;;  %v3800_v61 = vld [vmem:[#allocation4 + $0x22] sm:$0x1]  ;;  %4074 = vmatpush.bf16.msrb.mxu3 %v5955_v25 }
 0x503   : > { %v3799_v57 = vld [vmem:[#allocation4 + $0x1a] sm:$0xff]  ;;  %v3635_v28 = vpack.c.bf16 %v7126_v0, %v3631_v31  ;;  %3603 = vst [vmem:[#allocation4 + $0x28] sm:$0xff] %v3596_v53  ;;  %v7137_v63 = vpack.c.bf16 %v3596_v53, %v7098_v52  ;;  %v3901_v9 = vld [vmem:[#allocation4 + $0x27] sm:$0x1]  ;;  %v3636_v15 = vpack.c.bf16 %v3633_v50, %v3633_v50  ;;  %v3803_v2 = vpack.c.bf16 %v3800_v61, %v3800_v61  ;;  %v5977_v31 = vld [vmem:[%s7258_s6 + $0x1d0] sm:$0xff] }
 0x504   : > { %v3802_v14 = vpack.c.bf16 %v3799_v57, %v3798_v36  ;;  %v7129_v37 = vld [vmem:[#allocation4 + $0x1f] sm:$0xff]  ;;  %v3904_v46 = vpack.c.bf16 %v3901_v9, %v3901_v9  ;;  %4478 = vmatpush.bf16.msra.mxu1 %v5987_v47  ;;  %v5976_v53 = vld [vmem:[%s7258_s6 + $0x1c8] sm:$0xff]  ;;  %v3551_v57 = vadd.f32 %v6991_v44, %v3550_v20 }
 0x505   : > { %v3903_v38 = vpack.c.bf16 %v7129_v37, %v7100_v11  ;;  %3715 = vmatmul.bf16.gmra.mxu3 %v3635_v28  ;;  %v4202_v43 = vld [vmem:[#allocation4 + $0x1e] sm:$0xff] }
 0x506   : > { %3882 = vmatmul.bf16.gmra.mxu1 %v3802_v14  ;;  %4075 = vmatpush.bf16.msrb.mxu3 %v5954_v33  ;;  %v3609_v4 = vld [vmem:[#allocation4 + $0x20] sm:$0x1] }
 0x507   : > { %3983 = vmatmul.bf16.gmra.mxu2 %v3903_v38  ;;  %v3612_v35 = vpack.c.bf16 %v3609_v4, %v3609_v4 }
 0x508   : > { %4479 = vmatpush.bf16.msra.mxu1 %v5986_v19 }
 0x50a   : > { %4076 = vmatpush.bf16.msrb.mxu3 %v5953_v30  ;;  %v4102_v29 = vld [vmem:[#allocation4 + $0x21] sm:$0xff]  ;;  %v4103_v62 = vld [vmem:[#allocation4 + $0x29] sm:$0x1]  ;;  %v4204_v22 = vld [vmem:[#allocation4 + $0x2e] sm:$0x1] }
 0x50b   : > { %v4203_v32 = vld [vmem:[#allocation4 + $0x26] sm:$0xff]  ;;  %v4105_v49 = vpack.c.bf16 %v4102_v29, %v7126_v0  ;;  %v4106_v48 = vpack.c.bf16 %v4103_v62, %v4103_v62  ;;  %v4207_v40 = vpack.c.bf16 %v4204_v22, %v4204_v22  ;;  %v4305_v47 = vld [vmem:[#allocation4 + $0x2f] sm:$0x1] }
 0x50c   : > { %v4206_v56 = vpack.c.bf16 %v4203_v32, %v4202_v43 }
 0x50e   : > { %4077 = vmatpush.bf16.msrb.mxu3 %v5952_v54 }
 0x512   : > { %4078 = vmatpush.bf16.msrb.mxu3 %v5951_v18 }
 0x515   : > { %3720 = vmatmul.bf16.gmra.mxu3 %v3636_v15 }
 0x516   : > { %3887 = vmatmul.bf16.gmra.mxu1 %v3803_v2 }
 0x517   : > { %3988 = vmatmul.bf16.gmra.mxu2 %v3904_v46  ;;  %v4304_v46 = vld [vmem:[#allocation4 + $0x27] sm:$0xff] }
 0x518   : > { %v4307_v17 = vpack.c.bf16 %v4304_v46, %v7129_v37 }
 0x525   : > { %3781 = vmatmul.bf16.vlgmr.msra.gmra.mxu3 %v7025_v58  ;;  %v5985_v58 = vld [vmem:[%s7258_s6 + $0x210] sm:$0xff] }
 0x526   : > { %4180 = vmatmul.bf16.vlgmr.msrb.gmra.mxu1 %v4104_v6  ;;  %4374 = vmatpush.bf16.msra.mxu3 %v5982_v3 }
 0x527   : > { %4281 = vmatmul.bf16.vlgmr.msra.gmra.mxu2 %v4205_v1  ;;  %4480 = vmatpush.bf16.msra.mxu1 %v5985_v58 }
 0x52a   : > { %4375 = vmatpush.bf16.msra.mxu3 %v5981_v16 }
 0x52b   : > { %4481 = vmatpush.bf16.msra.mxu1 %v5984_v24 }
 0x52e   : > { %4376 = vmatpush.bf16.msra.mxu3 %v5980_v8 }
 0x52f   : > { %4482 = vmatpush.bf16.msra.mxu1 %v5983_v21 }
 0x532   : > { %4377 = vmatpush.bf16.msra.mxu3 %v5979_v23 }
 0x535   : > { %3786 = vmatmul.bf16.gmra.mxu3 %v7078_v5 }
 0x536   : > { %4185 = vmatmul.bf16.gmra.mxu1 %v4105_v49  ;;  %4378 = vmatpush.bf16.msra.mxu3 %v5978_v45 }
 0x537   : > { %4286 = vmatmul.bf16.gmra.mxu2 %v4206_v56 }
 0x53a   : > { %4379 = vmatpush.bf16.msra.mxu3 %v5977_v31 }
 0x53e   : > { %4380 = vmatpush.bf16.msra.mxu3 %v5976_v53 }
 0x542   : > { %4381 = vmatpush.bf16.msra.mxu3 %v5975_v12 }
 0x545   : > { %3791 = vmatmul.bf16.gmra.mxu3 %v3612_v35 }
 0x546   : > { %4190 = vmatmul.bf16.gmra.mxu1 %v4106_v48 }
 0x547   : > { %4291 = vmatmul.bf16.gmra.mxu2 %v4207_v40 }
 0x555   : > { %4079 = vmatmul.bf16.vlgmr.msrb.gmra.mxu3 %v4003_v7  ;;  %v3588_v7 = vpop.f32.mrf.mxu2 }
 0x556   : > { %4483 = vmatmul.bf16.vlgmr.msra.gmra.mxu1 %v7078_v5  ;;  %v4002_v5 = vld [vmem:[#allocation4 + $0x28] sm:$0x1]  ;;  %v3589_v14 = vadd.f32 %v3588_v7, %v3551_v57 }
 0x557   : > { %v4005_v36 = vpack.c.bf16 %v4002_v5, %v4002_v5 }
 0x558   : > { %v3597_v50 = vmax.f32 %v3589_v14, 0.0 }
 0x55a   : > { %3604 = vst [vmem:[#allocation4 + $0x30] sm:$0x1] %v3597_v50 }
 0x561   : > { %v4406_v52 = vld [vmem:[#allocation4 + $0x30] sm:$0x1] }
 0x565   : > { %4084 = vmatmul.bf16.gmra.mxu3 %v4004_v13  ;;  %v4409_v13 = vpack.c.bf16 %v4406_v52, %v4406_v52 }
 0x566   : > { %4488 = vmatmul.bf16.gmra.mxu1 %v7137_v63 }
 0x573   : > { %v3878_v0 = vpop.f32.mrf.mxu1 }
 0x575   : > { %4089 = vmatmul.bf16.gmra.mxu3 %v4005_v36 }
 0x576   : > { %4493 = vmatmul.bf16.gmra.mxu1 %v4409_v13 }
 0x578   : > { %v3711_v28 = vpop.f32.mrf.mxu3 }
 0x57a   : > { %v3979_v38 = vpop.f32.mrf.mxu2 }
 0x57b   : > { %v3880_v39 = vpop.f32.mrf.mxu1 }
 0x580   : > { %v3713_v61 = vpop.f32.mrf.mxu3 }
 0x582   : > { %v3981_v9 = vpop.f32.mrf.mxu2 }
 0x583   : > { %v3883_v27 = vpop.f32.mrf.mxu1 }
 0x585   : > { %4382 = vmatmul.bf16.vlgmr.msra.gmra.mxu3 %v4306_v51  ;;  %v4308_v51 = vpack.c.bf16 %v4305_v47, %v4305_v47 }
 0x588   : > { %v3716_v63 = vpop.f32.mrf.mxu3 }
 0x58a   : > { %v3984_v15 = vpop.f32.mrf.mxu2 }
 0x58b   : > { %v3885_v44 = vpop.f32.mrf.mxu1 }
 0x590   : > { %v3718_v2 = vpop.f32.mrf.mxu3 }
 0x592   : > { %v3986_v34 = vpop.f32.mrf.mxu2 }
 0x593   : > { %v3888_v41 = vpop.f32.mrf.mxu1 }
 0x595   : > { %4387 = vmatmul.bf16.gmra.mxu3 %v4307_v17 }
 0x598   : > { %v3721_v26 = vpop.f32.mrf.mxu3 }
 0x59a   : > { %v3989_v42 = vpop.f32.mrf.mxu2 }
 0x59b   : > { %v3890_v10 = vpop.f32.mrf.mxu1 }
 0x5a0   : > { %v3723_v25 = vpop.f32.mrf.mxu3 }
 0x5a2   : > { %v3991_v55 = vpop.f32.mrf.mxu2 }
 0x5a3   : > { %v4181_v11 = vpop.f32.mrf.mxu1 }
 0x5a5   : > { %4392 = vmatmul.bf16.gmra.mxu3 %v4308_v51 }
 0x5a8   : > { %v3782_v60 = vpop.f32.mrf.mxu3 }
 0x5a9   : > { %v3783_v6 = vadd.f32 %v3782_v60, %v3711_v28 }
 0x5aa   : > { %v4282_v59 = vpop.f32.mrf.mxu2 }
 0x5ab   : > { %v4183_v1 = vpop.f32.mrf.mxu1  ;;  %v3892_v33 = vadd.f32 %v3878_v0, %v3783_v6 }
 0x5ad   : > { %v3993_v19 = vadd.f32 %v3979_v38, %v3892_v33 }
 0x5b0   : > { %v3784_v30 = vpop.f32.mrf.mxu3 }
 0x5b1   : > { %v3785_v58 = vadd.f32 %v3784_v30, %v3713_v61 }
 0x5b2   : > { %v4284_v54 = vpop.f32.mrf.mxu2 }
 0x5b3   : > { %v4186_v37 = vpop.f32.mrf.mxu1  ;;  %v3893_v24 = vadd.f32 %v3880_v39, %v3785_v58 }
 0x5b5   : > { %v3994_v18 = vadd.f32 %v3981_v9, %v3893_v24 }
 0x5b8   : > { %v3787_v21 = vpop.f32.mrf.mxu3 }
 0x5b9   : > { %v3788_v29 = vadd.f32 %v3787_v21, %v3716_v63  ;;  %v4504_v21 = vld [vmem:[%s7260_s8 + $0x8] sm:$0xff] }
 0x5ba   : > { %v4287_v49 = vpop.f32.mrf.mxu2 }
 0x5bb   : > { %v4188_v32 = vpop.f32.mrf.mxu1  ;;  %v3894_v43 = vadd.f32 %v3883_v27, %v3788_v29  ;;  %v4505_v29 = vld [vmem:[%s7260_s8 + $0x10] sm:$0xff] }
 0x5bd   : > { %v3995_v56 = vadd.f32 %v3984_v15, %v3894_v43  ;;  %v6014_v43 = vld [vmem:[%s7259_s7] ss:$0 sm:$0xff] }
 0x5c0   : > { %v3789_v62 = vpop.f32.mrf.mxu3 }
 0x5c1   : > { %v3790_v4 = vadd.f32 %v3789_v62, %v3718_v2 }
 0x5c2   : > { %v4289_v3 = vpop.f32.mrf.mxu2 }
 0x5c3   : > { %v4191_v48 = vpop.f32.mrf.mxu1  ;;  %v3895_v35 = vadd.f32 %v3885_v44, %v3790_v4 }
 0x5c5   : > { %v3996_v22 = vadd.f32 %v3986_v34, %v3895_v35 }
 0x5c8   : > { %v3792_v16 = vpop.f32.mrf.mxu3 }
 0x5c9   : > { %v3793_v40 = vadd.f32 %v3792_v16, %v3721_v26 }
 0x5ca   : > { %v4292_v45 = vpop.f32.mrf.mxu2 }
 0x5cb   : > { %v4193_v8 = vpop.f32.mrf.mxu1  ;;  %v3896_v23 = vadd.f32 %v3888_v41, %v3793_v40 }
 0x5cd   : > { %v3997_v31 = vadd.f32 %v3989_v42, %v3896_v23 }
 0x5d0   : > { %v3794_v53 = vpop.f32.mrf.mxu3 }
 0x5d1   : > { %v4571_v53 = vld [vmem:[%s332_s26 + $0xc] sm:$0x1] }
 0x5d2   : > { %v4294_v12 = vpop.f32.mrf.mxu2 }
 0x5d3   : > { %v4484_v36 = vpop.f32.mrf.mxu1 }
 0x5d8   : > { %v4080_v20 = vpop.f32.mrf.mxu3 }
 0x5d9   : > { %v4094_v7 = vadd.f32 %v4080_v20, %v3993_v19 }
 0x5db   : > { %v4195_v5 = vadd.f32 %v4181_v11, %v4094_v7  ;;  %v4486_v50 = vpop.f32.mrf.mxu1 }
 0x5dd   : > { %v4296_v0 = vadd.f32 %v4282_v59, %v4195_v5 }
 0x5e0   : > { %v4082_v57 = vpop.f32.mrf.mxu3 }
 0x5e1   : > { %v4095_v28 = vadd.f32 %v4082_v57, %v3994_v18  ;;  %v4503_v18 = vld [vmem:[%s7260_s8] sm:$0xff] }
 0x5e3   : > { %v4196_v14 = vadd.f32 %v4183_v1, %v4095_v28  ;;  %v4489_v63 = vpop.f32.mrf.mxu1 }
 0x5e5   : > { %v4297_v38 = vadd.f32 %v4284_v54, %v4196_v14 }
 0x5e8   : > { %v4085_v39 = vpop.f32.mrf.mxu3 }
 0x5e9   : > { %v4096_v61 = vadd.f32 %v4085_v39, %v3995_v56 }
 0x5eb   : > { %v4197_v9 = vadd.f32 %v4186_v37, %v4096_v61  ;;  %v4491_v41 = vpop.f32.mrf.mxu1 }
 0x5ed   : > { %v4298_v27 = vadd.f32 %v4287_v49, %v4197_v9 }
 0x5f0   : > { %v4087_v52 = vpop.f32.mrf.mxu3 }
 0x5f1   : > { %v4097_v13 = vadd.f32 %v4087_v52, %v3996_v22 }
 0x5f3   : > { %v4198_v15 = vadd.f32 %v4188_v32, %v4097_v13  ;;  %v4494_v42 = vpop.f32.mrf.mxu1  ;;  %v4506_v32 = vld [vmem:[%s7260_s8 + $0x18] sm:$0x1] }
 0x5f5   : > { %v4299_v44 = vadd.f32 %v4289_v3, %v4198_v15 }
 0x5f8   : > { %v4090_v2 = vpop.f32.mrf.mxu3 }
 0x5f9   : > { %v4098_v46 = vadd.f32 %v4090_v2, %v3997_v31 }
 0x5fb   : > { %v4199_v34 = vadd.f32 %v4191_v48, %v4098_v46  ;;  %v4496_v55 = vpop.f32.mrf.mxu1 }
 0x5fd   : > { %v4300_v17 = vadd.f32 %v4292_v45, %v4199_v34 }
 0x600   : > { %v4092_v26 = vpop.f32.mrf.mxu3 }
 0x608   : > { %v4383_v10 = vpop.f32.mrf.mxu3 }
 0x609   : > { %v4397_v25 = vadd.f32 %v4383_v10, %v4296_v0 }
 0x60b   : > { %v4498_v47 = vadd.f32 %v4484_v36, %v4397_v25 }
 0x610   : > { %v4385_v11 = vpop.f32.mrf.mxu3 }
 0x611   : > { %v4398_v51 = vadd.f32 %v4385_v11, %v4297_v38 }
 0x613   : > { %v4499_v60 = vadd.f32 %v4486_v50, %v4398_v51 }
 0x618   : > { %v4388_v6 = vpop.f32.mrf.mxu3 }
 0x619   : > { %v4399_v30 = vadd.f32 %v4388_v6, %v4298_v27 }
 0x61b   : > { %v4500_v37 = vadd.f32 %v4489_v63, %v4399_v30 }
 0x620   : > { %v4390_v59 = vpop.f32.mrf.mxu3 }
 0x621   : > { %v4400_v33 = vadd.f32 %v4390_v59, %v4299_v44 }
 0x623   : > { %v4501_v54 = vadd.f32 %v4491_v41, %v4400_v33 }
 0x628   : > { %v4393_v1 = vpop.f32.mrf.mxu3 }
 0x629   : > { %v4401_v19 = vadd.f32 %v4393_v1, %v4300_v17 }
 0x62b   : > { %v4502_v58 = vadd.f32 %v4494_v42, %v4401_v19 }
 0x62d   : > { %5766 = vmatpush.msk.msrb.mxu2 %vm4524_vm2, %v4502_v58 }
 0x62f   : > { %4540 = vmatpush.msrb.mxu2 %v4501_v54 }
 0x630   : > { %v4395_v24 = vpop.f32.mrf.mxu3 }
 0x631   : > { %4541 = vmatpush.msrb.mxu2 %v4500_v37 }
 0x633   : > { %4542 = vmatpush.msrb.mxu2 %v4499_v60 }
 0x635   : > { %4543 = vmatpush.msrb.mxu2 %v4498_v47 }
 0x636   : > { %5767 = vmatmul.msk.f32.vlgmr.msrb.gmra.mxu2 %vm4511_vm3, %v4503_v18 }
 0x63e   : > { %5768 = vmatmul.msk.f32.gmra.mxu2 %vm4511_vm3, %v4504_v21 }
 0x646   : > { %5769 = vmatmul.msk.f32.gmra.mxu2 %vm4511_vm3, %v4505_v29 }
 0x64e   : > { %5770 = vmatmul.msk.f32.gmra.mxu2 %vm4511_vm3, %v4506_v32 }
 0x6b9   : > { %v4545_v49 = vpop.f32.mrf.mxu2 }
 0x6ba   : > { %v4546_v56 = vadd.f32 %v6014_v43, %v4545_v49 }
 0x6bc   : > { %v4557_v48 = vmax.f32 %v4546_v56, 0.0 }
 0x6c1   : > { %v4548_v62 = vpop.f32.mrf.mxu2 }
 0x6c2   : > { %v4549_v4 = vadd.f32 %v6014_v43, %v4548_v62 }
 0x6c4   : > { %v4558_v35 = vmax.f32 %v4549_v4, 0.0 }
 0x6c6   : > { %v5994_v3 = vpack.c.bf16 %v4558_v35, %v4557_v48 }
 0x6c8   : > { %5995 = vst [vmem:[%s332_s26] sm:$0xff] %v5994_v3  }
 0x6c9   : > { %v4551_v22 = vpop.f32.mrf.mxu2 }
 0x6ca   : > { %v4552_v16 = vadd.f32 %v6014_v43, %v4551_v22 }
 0x6cc   : > { %v4559_v40 = vmax.f32 %v4552_v16, 0.0 }
 0x6ce   : > { %v4563_v8 = vpack.c.bf16 %v4559_v40, %v4559_v40 }
 0x6d0   : > { %4567 = vst [vmem:[%s332_s26 + $0x8] sm:$0xf] %v4563_v8 }
 0x6d1   : > { %v4554_v23 = vpop.f32.mrf.mxu2 }
 0x6d2   : > { %v4555_v45 = vadd.f32 %v6014_v43, %v4554_v23 }
 0x6d4   : > { %v4560_v31 = vmax.f32 %v4555_v45, 0.0 }
 0x6d6   : > { %v4564_v12 = vpack.c.bf16 %v4560_v31, %v4560_v31 }
 0x6d8   : > { %v4572_v20 = vsel %vm4570_vm5, %v4564_v12, %v4571_v53 }
 0x6d9   : > { %4573 = vst [vmem:[%s332_s26 + $0xc] sm:$0x1] %v4572_v20 }
 0x6da PF: > { %s19_s30 = sadd.s32 1, %s6022_s30  }
 0x6db   : > { %p16_p4 = scmp.ge.s32.totalorder %s19_s30, 4  }
 0x6dd   :  { %18 = sbr.rel (!%p16_p4) target bundleno = 1 (0x1), region = 102 }

</bundles_post_ra>
